<compile_context>
chip_gen: v5e
topology: v5e:2x2
jax: 0.10.0
libtpu: 0.0.40
codegen_flags: <defaults>
</compile_context>

<pallas_src>
import jax
import jax.numpy as jnp
from jax.experimental import pallas as pl
from jax.experimental.pallas import tpu as pltpu

D_MODEL = 128
N_HEAD = 8
HEAD_DIM = D_MODEL // N_HEAD
D_FF = 2048
NUM_LAYERS = 12
LN_EPS = 1e-5
NEG_INF = -1e9

# Resident-activation budget for the layer-major (weight-reuse) grid order.
_ACT_VMEM_BUDGET = 8 * 1024 * 1024

_LAYER_KEYS = ('wqkv', 'bqkv', 'wo', 'bo', 'ln1w', 'ln1b',
               'wff1', 'bff1', 'wff2', 'bff2', 'ln2w', 'ln2b')


def _layernorm(x, w, b):
    mu = jnp.mean(x, axis=-1, keepdims=True)
    var = jnp.mean(jnp.square(x - mu), axis=-1, keepdims=True)
    return (x - mu) * jax.lax.rsqrt(var + LN_EPS) * w + b


# -----------------------------------------------------------------------------
# Fused forward kernel (factory closes over static tile sizes / grid order)
# -----------------------------------------------------------------------------
def _make_fused_kernel(BT, S, layer_major):
    N = BT * S  # activation rows handled per grid step

    def kernel(xf_ref, y_ref, maskb_ref,
               pre1w, pre1b, pre2w, pre2b,
               wqkv, bqkv, wo, bo, ln1w, ln1b,
               wff1, bff1, wff2, bff2, ln2w, ln2b,
               s1w, s1b, s2w, s2b, s3w, s3b,
               l1wa, l1wb, l1b, l2w, l2b,
               o_ref, act_ref):
        if layer_major:                       # grid = (NUM_LAYERS, n_bt)
            l = pl.program_id(0)
            last = pl.num_programs(0) - 1
            ti = pl.program_id(1)             # batch-tile slot in the scratch
        else:                                 # grid = (n_bt, NUM_LAYERS)
            l = pl.program_id(1)
            last = pl.num_programs(1) - 1
            ti = 0

        def mm(a, w, b):
            # Heavy matmuls: operands in the (possibly bf16) weight dtype,
            # accumulation always in f32.
            return jnp.dot(a.astype(w.dtype), w,
                           preferred_element_type=jnp.float32) + b

        # ---- preprocess MLP Linear(12,48)+ReLU+Linear(48,128): layer 0 only
        @pl.when(l == 0)
        def _():
            h = jnp.dot(xf_ref[...], pre1w[...],
                        preferred_element_type=jnp.float32) + pre1b[...]
            h = jnp.maximum(h, 0.0)
            act_ref[ti] = jnp.dot(h, pre2w[...],
                                  preferred_element_type=jnp.float32) + pre2b[...]

        # ---- encoder layer `l` (post-norm, ReLU, eps=1e-5) -------------------
        x = act_ref[ti]                                              # (N, D) f32

        qkv = mm(x, wqkv[0], bqkv[0])                                # (N, 3D)
        q = qkv[:, :D_MODEL] * (HEAD_DIM ** -0.5)
        k = qkv[:, D_MODEL:2 * D_MODEL]
        v = qkv[:, 2 * D_MODEL:]

        def split_heads(t):                    # (N, D) -> (BT*H, S, HEAD_DIM)
            parts = [t[:, h * HEAD_DIM:(h + 1) * HEAD_DIM]
                     .reshape(BT, 1, S, HEAD_DIM) for h in range(N_HEAD)]
            return jnp.concatenate(parts, axis=1).reshape(
                BT * N_HEAD, S, HEAD_DIM)

        qh, kh, vh = split_heads(q), split_heads(k), split_heads(v)

        # Batched attention over (batch*heads): one score matmul, one softmax
        # chain, one context matmul (replaces the old 8-way per-head loop).
        s = jnp.einsum('bqd,bkd->bqk', qh, kh,
                       preferred_element_type=jnp.float32)           # (BT*H,S,S)
        s = s + maskb_ref[...]                                       # (BT*H,1,S)
        s = s - jnp.max(s, axis=-1, keepdims=True)
        p = jnp.exp(s)
        p = p * pl.reciprocal(jnp.sum(p, axis=-1, keepdims=True), approx=True)
        ctx = jnp.einsum('bqk,bkd->bqd', p, vh,
                         preferred_element_type=jnp.float32)         # (BT*H,S,Dh)

        ctx = ctx.reshape(BT, N_HEAD, S, HEAD_DIM)
        ctx = jnp.concatenate([ctx[:, h] for h in range(N_HEAD)],
                              axis=-1).reshape(N, D_MODEL)
        attn = mm(ctx, wo[0], bo[0])

        x1 = _layernorm(x + attn, ln1w[0], ln1b[0])

        hff = jnp.maximum(mm(x1, wff1[0], bff1[0]), 0.0)             # (N, D_FF)
        x2 = _layernorm(x1 + mm(hff, wff2[0], bff2[0]), ln2w[0], ln2b[0])
        act_ref[ti] = x2

        # ---- pooled sum + scalar MLP + regression head: last layer only -----
        @pl.when(l == last)
        def _():
            pooled = jnp.sum(x2.reshape(BT, S, D_MODEL), axis=1)     # (BT, D)
            ys = jnp.maximum(jnp.dot(y_ref[...], s1w[...],
                                     preferred_element_type=jnp.float32)
                             + s1b[...], 0.0)
            ys = jnp.maximum(jnp.dot(ys, s2w[...],
                                     preferred_element_type=jnp.float32)
                             + s2b[...], 0.0)
            ys = jnp.dot(ys, s3w[...],
                         preferred_element_type=jnp.float32) + s3b[...]
            # concat(pooled, ys) @ W1  ==  pooled @ W1[:128] + ys @ W1[128:]
            hh = (jnp.dot(pooled, l1wa[...], preferred_element_type=jnp.float32)
                  + jnp.dot(ys, l1wb[...], preferred_element_type=jnp.float32)
                  + l1b[...])
            hh = jnp.maximum(hh, 0.0)
            o_ref[...] = jnp.dot(hh, l2w[...],
                                 preferred_element_type=jnp.float32) + l2b[...]

    return kernel


# -----------------------------------------------------------------------------
# Wrapper
# -----------------------------------------------------------------------------
def _pick_batch_tile(B, S, target_rows=512, max_rows=1024):
    """Pick batch-tile size BT and the (possibly padded) batch size."""
    if B * S <= max_rows:          # whole batch per grid step
        return B, B
    # When BT < B it must be a multiple of 8 (second-to-last dim of the
    # (BT, 3)/(BT, 2) y/output blocks); pad B up to a multiple of BT.
    bt = max(8, (max(8, target_rows // max(S, 1)) // 8) * 8)
    while bt > 8 and bt * S > max_rows:
        bt -= 8
    b_pad = ((B + bt - 1) // bt) * bt
    return bt, b_pad


def transformer_ee_v5_forward(params, x, y, mask, *,
                              use_bf16_weights=False, batch_tile=None):
    B, S, _feat = x.shape

    if batch_tile is None:
        BT, B_pad = _pick_batch_tile(B, S)
    else:
        BT = int(batch_tile)
        B_pad = ((B + BT - 1) // BT) * BT
        assert BT == B_pad or BT % 8 == 0, "batch_tile must be a multiple of 8"
    n_bt = B_pad // BT
    N = BT * S

    # Pad the batch (padded rows use an all-valid mask; outputs sliced away).
    if B_pad != B:
        pad = B_pad - B
        x = jnp.pad(x, ((0, pad), (0, 0), (0, 0)))
        y = jnp.pad(y, ((0, pad), (0, 0)))
        mask = jnp.pad(mask, ((0, pad), (0, 0)))

    # Wrapper-side layout plumbing: flatten x, pre-broadcast attention bias.
    xf = x.reshape(B_pad * S, 12).astype(jnp.float32)
    y = y.astype(jnp.float32)
    maskb = jnp.where(mask, NEG_INF, 0.0).astype(jnp.float32)       # (B_pad, S)
    maskb = jnp.broadcast_to(
        maskb[:, None, None, :], (B_pad, N_HEAD, 1, S)
    ).reshape(B_pad * N_HEAD, 1, S)

    lp = dict(params['layers'])
    if use_bf16_weights:
        for kname in ('wqkv', 'wo', 'wff1', 'wff2'):
            lp[kname] = lp[kname].astype(jnp.bfloat16)

    # Grid order: with >1 batch tile put the LAYER axis outer so each layer's
    # weights are fetched once (not once per batch tile), as long as the full
    # activation set fits the VMEM budget.
    act_bytes = B_pad * S * D_MODEL * 4
    layer_major = (n_bt > 1) and (act_bytes <= _ACT_VMEM_BUDGET)
    if layer_major:
        grid = (NUM_LAYERS, n_bt)
        dim_sem = ("arbitrary", "arbitrary")
        t_of = lambda a, b: b     # batch-tile index
        l_of = lambda a, b: a     # layer index
        act_tiles = n_bt
    else:
        grid = (n_bt, NUM_LAYERS)
        dim_sem = ("parallel", "arbitrary")
        t_of = lambda a, b: a
        l_of = lambda a, b: b
        act_tiles = 1

    def bcast_spec(shape):
        nd = len(shape)
        return pl.BlockSpec(tuple(shape), lambda a, b, _nd=nd: (0,) * _nd)

    def layer_spec(shape):
        rest = tuple(shape[1:])
        nd = len(rest)
        return pl.BlockSpec((1,) + rest,
                            lambda a, b, _nd=nd: (l_of(a, b),) + (0,) * _nd)

    in_specs = (
        [pl.BlockSpec((N, 12), lambda a, b: (t_of(a, b), 0)),                  # x flat
         pl.BlockSpec((BT, 3), lambda a, b: (t_of(a, b), 0)),                  # y
         pl.BlockSpec((BT * N_HEAD, 1, S), lambda a, b: (t_of(a, b), 0, 0))]   # mask bias
        + [bcast_spec(params[k].shape)
           for k in ('pre1_w', 'pre1_b', 'pre2_w', 'pre2_b')]
        + [layer_spec(lp[k].shape) for k in _LAYER_KEYS]
        + [bcast_spec(params[k].shape)
           for k in ('s1_w', 's1_b', 's2_w', 's2_b', 's3_w', 's3_b')]
        + [bcast_spec((D_MODEL, 32)), bcast_spec((D_MODEL, 32)),
           bcast_spec(params['l1_b'].shape),
           bcast_spec(params['l2_w'].shape), bcast_spec(params['l2_b'].shape)]
    )

    out = pl.pallas_call(
        _make_fused_kernel(BT, S, layer_major),
        out_shape=jax.ShapeDtypeStruct((B_pad, 2), jnp.float32),
        grid=grid,
        in_specs=in_specs,
        out_specs=pl.BlockSpec((BT, 2), lambda a, b: (t_of(a, b), 0)),
        scratch_shapes=[pltpu.VMEM((act_tiles, N, D_MODEL), jnp.float32)],
        compiler_params=pltpu.CompilerParams(
            dimension_semantics=dim_sem,
            vmem_limit_bytes=32 * 1024 * 1024),
    )(xf, y, maskb,
      params['pre1_w'], params['pre1_b'], params['pre2_w'], params['pre2_b'],
      *[lp[k] for k in _LAYER_KEYS],
      params['s1_w'], params['s1_b'], params['s2_w'], params['s2_b'],
      params['s3_w'], params['s3_b'],
      params['l1_w'][:D_MODEL], params['l1_w'][D_MODEL:], params['l1_b'],
      params['l2_w'], params['l2_b'])
    return out[:B]


# -----------------------------------------------------------------------------
# Pure-JAX reference (same math, XLA) for correctness checking
# -----------------------------------------------------------------------------
def _reference_forward(params, x, y, mask):
    B, S, _ = x.shape
    h = jnp.maximum(x.reshape(B * S, 12) @ params['pre1_w'] + params['pre1_b'], 0.0)
    h = h @ params['pre2_w'] + params['pre2_b']                      # (B*S, D)
    bias = jnp.where(mask, NEG_INF, 0.0)[:, None, None, :]           # (B,1,1,S)
    lp = params['layers']
    for l in range(NUM_LAYERS):
        qkv = h @ lp['wqkv'][l] + lp['bqkv'][l]
        q = (qkv[:, :D_MODEL] * HEAD_DIM ** -0.5).reshape(B, S, N_HEAD, HEAD_DIM)
        k = qkv[:, D_MODEL:2 * D_MODEL].reshape(B, S, N_HEAD, HEAD_DIM)
        v = qkv[:, 2 * D_MODEL:].reshape(B, S, N_HEAD, HEAD_DIM)
        s = jnp.einsum('bqhd,bkhd->bhqk', q, k) + bias
        p = jax.nn.softmax(s, axis=-1)
        ctx = jnp.einsum('bhqk,bkhd->bqhd', p, v).reshape(B * S, D_MODEL)
        attn = ctx @ lp['wo'][l] + lp['bo'][l]
        x1 = _layernorm(h + attn, lp['ln1w'][l], lp['ln1b'][l])
        ff = (jnp.maximum(x1 @ lp['wff1'][l] + lp['bff1'][l], 0.0)
              @ lp['wff2'][l] + lp['bff2'][l])
        h = _layernorm(x1 + ff, lp['ln2w'][l], lp['ln2b'][l])
    pooled = jnp.sum(h.reshape(B, S, D_MODEL), axis=1)
    ys = jnp.maximum(y @ params['s1_w'] + params['s1_b'], 0.0)
    ys = jnp.maximum(ys @ params['s2_w'] + params['s2_b'], 0.0)
    ys = ys @ params['s3_w'] + params['s3_b']
    hh = jnp.maximum(jnp.concatenate([pooled, ys], axis=1) @ params['l1_w']
                     + params['l1_b'], 0.0)
    return hh @ params['l2_w'] + params['l2_b']


# -----------------------------------------------------------------------------
# Deterministic parameter init (linear weights stored transposed: (in, out))
# -----------------------------------------------------------------------------
def _init_linear(key, fan_in, fan_out):
    kw, kb = jax.random.split(key)
    bound = 1.0 / (fan_in ** 0.5)
    w = jax.random.uniform(kw, (fan_in, fan_out), jnp.float32, -bound, bound)
    b = jax.random.uniform(kb, (1, fan_out), jnp.float32, -bound, bound)
    return w, b


def init_params(key):
    keys = jax.random.split(key, 7 + NUM_LAYERS)
    params = {}
    params['pre1_w'], params['pre1_b'] = _init_linear(keys[0], 12, 48)
    params['pre2_w'], params['pre2_b'] = _init_linear(keys[1], 48, D_MODEL)
    params['s1_w'], params['s1_b'] = _init_linear(keys[2], 3, 24)
    params['s2_w'], params['s2_b'] = _init_linear(keys[3], 24, 64)
    params['s3_w'], params['s3_b'] = _init_linear(keys[4], 64, D_MODEL)
    params['l1_w'], params['l1_b'] = _init_linear(keys[5], 2 * D_MODEL, 32)
    params['l2_w'], params['l2_b'] = _init_linear(keys[6], 32, 2)

    stacked = {k: [] for k in _LAYER_KEYS}
    for i in range(NUM_LAYERS):
        lk = jax.random.split(keys[7 + i], 4)
        wqkv, bqkv = _init_linear(lk[0], D_MODEL, 3 * D_MODEL)
        wo, bo = _init_linear(lk[1], D_MODEL, D_MODEL)
        wff1, bff1 = _init_linear(lk[2], D_MODEL, D_FF)
        wff2, bff2 = _init_linear(lk[3], D_FF, D_MODEL)
        vals = dict(
            wqkv=wqkv, bqkv=bqkv, wo=wo, bo=bo,
            ln1w=jnp.ones((1, D_MODEL), jnp.float32),
            ln1b=jnp.zeros((1, D_MODEL), jnp.float32),
            wff1=wff1, bff1=bff1, wff2=wff2, bff2=bff2,
            ln2w=jnp.ones((1, D_MODEL), jnp.float32),
            ln2b=jnp.zeros((1, D_MODEL), jnp.float32),
        )
        for k in _LAYER_KEYS:
            stacked[k].append(vals[k])
    params['layers'] = {k: jnp.stack(v, axis=0) for k, v in stacked.items()}
    return params


# -----------------------------------------------------------------------------
if __name__ == "__main__":
    key = jax.random.PRNGKey(0)
    kx, ky, kp = jax.random.split(key, 3)

    # Small shapes consistent with the module: batch=2, seq=8, 12 features.
    B, S = 2, 8
    x = jax.random.normal(kx, (B, S, 12), jnp.float32)
    y = jax.random.normal(ky, (B, 3), jnp.float32)
    mask = jnp.array([[False] * 6 + [True] * 2,
                      [False] * 8], dtype=bool)        # True = padded key
    params = init_params(kp)

    out = jax.block_until_ready(transformer_ee_v5_forward(params, x, y, mask))
    assert out.shape == (B, 2) and out.dtype == jnp.float32
    assert bool(jnp.all(jnp.isfinite(out)))
    ref = jax.block_until_ready(_reference_forward(params, x, y, mask))
    scale = max(1.0, float(jnp.max(jnp.abs(ref))))
    assert float(jnp.max(jnp.abs(out - ref))) < 0.1 * scale, (out, ref)

    # bf16 weight-streaming variant (perf path; numerics deviate slightly).
    out_bf16 = jax.block_until_ready(
        transformer_ee_v5_forward(params, x, y, mask, use_bf16_weights=True))
    assert out_bf16.shape == (B, 2)
    assert bool(jnp.all(jnp.isfinite(out_bf16)))

    # Exercise the multi-tile, layer-major (weight-reuse) path with BT < B.
    B2 = 16
    kx2, ky2 = jax.random.split(jax.random.PRNGKey(1))
    x2 = jax.random.normal(kx2, (B2, S, 12), jnp.float32)
    y2 = jax.random.normal(ky2, (B2, 3), jnp.float32)
    mask2 = jnp.zeros((B2, S), dtype=bool).at[:, -2:].set(True)
    out2 = jax.block_until_ready(
        transformer_ee_v5_forward(params, x2, y2, mask2, batch_tile=8))
    ref2 = jax.block_until_ready(_reference_forward(params, x2, y2, mask2))
    scale2 = max(1.0, float(jnp.max(jnp.abs(ref2))))
    assert out2.shape == (B2, 2)
    assert bool(jnp.all(jnp.isfinite(out2)))
    assert float(jnp.max(jnp.abs(out2 - ref2))) < 0.1 * scale2, (out2, ref2)

    print("KERNEL_OK")
</pallas_src>

<mosaic_0001>
module attributes {stable_mosaic.version = 11 : i64} {
  func.func @kernel(%arg0: i32, %arg1: i32, %arg2: memref<16x12xf32, #tpu.memory_space<vmem>>, %arg3: memref<2x3xf32, #tpu.memory_space<vmem>>, %arg4: memref<16x1x8xf32, #tpu.memory_space<vmem>>, %arg5: memref<12x48xf32, #tpu.memory_space<vmem>>, %arg6: memref<1x48xf32, #tpu.memory_space<vmem>>, %arg7: memref<48x128xf32, #tpu.memory_space<vmem>>, %arg8: memref<1x128xf32, #tpu.memory_space<vmem>>, %arg9: memref<1x128x384xf32, #tpu.memory_space<vmem>>, %arg10: memref<1x1x384xf32, #tpu.memory_space<vmem>>, %arg11: memref<1x128x128xf32, #tpu.memory_space<vmem>>, %arg12: memref<1x1x128xf32, #tpu.memory_space<vmem>>, %arg13: memref<1x1x128xf32, #tpu.memory_space<vmem>>, %arg14: memref<1x1x128xf32, #tpu.memory_space<vmem>>, %arg15: memref<1x128x2048xf32, #tpu.memory_space<vmem>>, %arg16: memref<1x1x2048xf32, #tpu.memory_space<vmem>>, %arg17: memref<1x2048x128xf32, #tpu.memory_space<vmem>>, %arg18: memref<1x1x128xf32, #tpu.memory_space<vmem>>, %arg19: memref<1x1x128xf32, #tpu.memory_space<vmem>>, %arg20: memref<1x1x128xf32, #tpu.memory_space<vmem>>, %arg21: memref<3x24xf32, #tpu.memory_space<vmem>>, %arg22: memref<1x24xf32, #tpu.memory_space<vmem>>, %arg23: memref<24x64xf32, #tpu.memory_space<vmem>>, %arg24: memref<1x64xf32, #tpu.memory_space<vmem>>, %arg25: memref<64x128xf32, #tpu.memory_space<vmem>>, %arg26: memref<1x128xf32, #tpu.memory_space<vmem>>, %arg27: memref<128x32xf32, #tpu.memory_space<vmem>>, %arg28: memref<128x32xf32, #tpu.memory_space<vmem>>, %arg29: memref<1x32xf32, #tpu.memory_space<vmem>>, %arg30: memref<32x2xf32, #tpu.memory_space<vmem>>, %arg31: memref<1x2xf32, #tpu.memory_space<vmem>>, %arg32: memref<2x2xf32, #tpu.memory_space<vmem>>, %arg33: memref<1x16x128xf32, #tpu.memory_space<vmem>>) attributes {dimension_semantics = [#tpu.dimension_semantics<parallel>, #tpu.dimension_semantics<arbitrary>], iteration_bounds = array<i64: 1, 12>, scalar_prefetch = 0 : i64, scratch_operands = 1 : i64, tpu.core_type = #tpu.core_type<tc>, window_params = [{transform_indices = @transform_0, window_bounds = array<i64: 16, 12>}, {transform_indices = @transform_1, window_bounds = array<i64: 2, 3>}, {transform_indices = @transform_2, window_bounds = array<i64: 16, 1, 8>}, {pipeline_mode = #tpu.pipeline_mode<synchronous>, transform_indices = @transform_3, window_bounds = array<i64: 12, 48>}, {pipeline_mode = #tpu.pipeline_mode<synchronous>, transform_indices = @transform_4, window_bounds = array<i64: 1, 48>}, {pipeline_mode = #tpu.pipeline_mode<synchronous>, transform_indices = @transform_5, window_bounds = array<i64: 48, 128>}, {pipeline_mode = #tpu.pipeline_mode<synchronous>, transform_indices = @transform_6, window_bounds = array<i64: 1, 128>}, {transform_indices = @transform_7, window_bounds = array<i64: 1, 128, 384>}, {transform_indices = @transform_8, window_bounds = array<i64: 1, 1, 384>}, {transform_indices = @transform_9, window_bounds = array<i64: 1, 128, 128>}, {transform_indices = @transform_10, window_bounds = array<i64: 1, 1, 128>}, {transform_indices = @transform_11, window_bounds = array<i64: 1, 1, 128>}, {transform_indices = @transform_12, window_bounds = array<i64: 1, 1, 128>}, {transform_indices = @transform_13, window_bounds = array<i64: 1, 128, 2048>}, {transform_indices = @transform_14, window_bounds = array<i64: 1, 1, 2048>}, {transform_indices = @transform_15, window_bounds = array<i64: 1, 2048, 128>}, {transform_indices = @transform_16, window_bounds = array<i64: 1, 1, 128>}, {transform_indices = @transform_17, window_bounds = array<i64: 1, 1, 128>}, {transform_indices = @transform_18, window_bounds = array<i64: 1, 1, 128>}, {pipeline_mode = #tpu.pipeline_mode<synchronous>, transform_indices = @transform_19, window_bounds = array<i64: 3, 24>}, {pipeline_mode = #tpu.pipeline_mode<synchronous>, transform_indices = @transform_20, window_bounds = array<i64: 1, 24>}, {pipeline_mode = #tpu.pipeline_mode<synchronous>, transform_indices = @transform_21, window_bounds = array<i64: 24, 64>}, {pipeline_mode = #tpu.pipeline_mode<synchronous>, transform_indices = @transform_22, window_bounds = array<i64: 1, 64>}, {pipeline_mode = #tpu.pipeline_mode<synchronous>, transform_indices = @transform_23, window_bounds = array<i64: 64, 128>}, {pipeline_mode = #tpu.pipeline_mode<synchronous>, transform_indices = @transform_24, window_bounds = array<i64: 1, 128>}, {pipeline_mode = #tpu.pipeline_mode<synchronous>, transform_indices = @transform_25, window_bounds = array<i64: 128, 32>}, {pipeline_mode = #tpu.pipeline_mode<synchronous>, transform_indices = @transform_26, window_bounds = array<i64: 128, 32>}, {pipeline_mode = #tpu.pipeline_mode<synchronous>, transform_indices = @transform_27, window_bounds = array<i64: 1, 32>}, {pipeline_mode = #tpu.pipeline_mode<synchronous>, transform_indices = @transform_28, window_bounds = array<i64: 32, 2>}, {pipeline_mode = #tpu.pipeline_mode<synchronous>, transform_indices = @transform_29, window_bounds = array<i64: 1, 2>}, {transform_indices = @transform_30, window_bounds = array<i64: 2, 2>}]} {
    %c0_i32 = arith.constant 0 : i32
    %0 = arith.cmpi eq, %arg1, %c0_i32 : i32
    %1 = arith.extui %0 : i1 to i32
    %c0_i32_0 = arith.constant 0 : i32
    %2 = arith.cmpi ne, %1, %c0_i32_0 : i32
    scf.if %2 {
      %c0_65 = arith.constant 0 : index
      %c0_66 = arith.constant 0 : index
      %188 = vector.load %arg2[%c0_65, %c0_66] : memref<16x12xf32, #tpu.memory_space<vmem>>, vector<16x12xf32>
      %c0_67 = arith.constant 0 : index
      %c0_68 = arith.constant 0 : index
      %189 = vector.load %arg5[%c0_67, %c0_68] : memref<12x48xf32, #tpu.memory_space<vmem>>, vector<12x48xf32>
      %cst_69 = arith.constant dense<0.000000e+00> : vector<16x48xf32>
      %190 = tpu.matmul %188, %189, %cst_69 {dimension_numbers = #tpu.dot_dimension_numbers<[1], [0], [0], [1], [0, 0, 1, 1], [], []>} : vector<16x12xf32>, vector<12x48xf32>, vector<16x48xf32> -> vector<16x48xf32>
      %c0_70 = arith.constant 0 : index
      %c0_71 = arith.constant 0 : index
      %191 = vector.load %arg6[%c0_70, %c0_71] : memref<1x48xf32, #tpu.memory_space<vmem>>, vector<1x48xf32>
      %192 = vector.broadcast %191 : vector<1x48xf32> to vector<16x48xf32>
      %193 = arith.addf %190, %192 : vector<16x48xf32>
      %cst_72 = arith.constant 0.000000e+00 : f32
      %194 = vector.broadcast %cst_72 : f32 to vector<16x48xf32>
      %195 = arith.maximumf %193, %194 : vector<16x48xf32>
      %c0_73 = arith.constant 0 : index
      %c0_74 = arith.constant 0 : index
      %196 = vector.load %arg7[%c0_73, %c0_74] : memref<48x128xf32, #tpu.memory_space<vmem>>, vector<48x128xf32>
      %cst_75 = arith.constant dense<0.000000e+00> : vector<16x128xf32>
      %197 = tpu.matmul %195, %196, %cst_75 {dimension_numbers = #tpu.dot_dimension_numbers<[1], [0], [0], [1], [0, 0, 1, 1], [], []>} : vector<16x48xf32>, vector<48x128xf32>, vector<16x128xf32> -> vector<16x128xf32>
      %c0_76 = arith.constant 0 : index
      %c0_77 = arith.constant 0 : index
      %198 = vector.load %arg8[%c0_76, %c0_77] : memref<1x128xf32, #tpu.memory_space<vmem>>, vector<1x128xf32>
      %199 = vector.broadcast %198 : vector<1x128xf32> to vector<16x128xf32>
      %200 = arith.addf %197, %199 : vector<16x128xf32>
      %c0_78 = arith.constant 0 : index
      %c0_79 = arith.constant 0 : index
      %c0_80 = arith.constant 0 : index
      %201 = vector.load %arg33[%c0_78, %c0_79, %c0_80] : memref<1x16x128xf32, #tpu.memory_space<vmem>>, vector<1x16x128xf32>
      %202 = vector.shape_cast %201 : vector<1x16x128xf32> to vector<16x128xf32>
      %203 = vector.shape_cast %200 : vector<16x128xf32> to vector<1x16x128xf32>
      tpu.vector_store %arg33[%c0_78, %c0_79, %c0_80], %203 {strides = array<i32>} : memref<1x16x128xf32, #tpu.memory_space<vmem>>, vector<1x16x128xf32>,
    } else {
    }
    %c0 = arith.constant 0 : index
    %c0_1 = arith.constant 0 : index
    %c0_2 = arith.constant 0 : index
    %3 = vector.load %arg33[%c0, %c0_1, %c0_2] : memref<1x16x128xf32, #tpu.memory_space<vmem>>, vector<1x16x128xf32>
    %4 = vector.shape_cast %3 : vector<1x16x128xf32> to vector<16x128xf32>
    %c0_3 = arith.constant 0 : index
    %c0_4 = arith.constant 0 : index
    %c0_5 = arith.constant 0 : index
    %5 = vector.load %arg9[%c0_3, %c0_4, %c0_5] : memref<1x128x384xf32, #tpu.memory_space<vmem>>, vector<1x128x384xf32>
    %6 = vector.shape_cast %5 : vector<1x128x384xf32> to vector<128x384xf32>
    %c0_6 = arith.constant 0 : index
    %c0_7 = arith.constant 0 : index
    %c0_8 = arith.constant 0 : index
    %7 = vector.load %arg10[%c0_6, %c0_7, %c0_8] : memref<1x1x384xf32, #tpu.memory_space<vmem>>, vector<1x1x384xf32>
    %8 = vector.shape_cast %7 : vector<1x1x384xf32> to vector<1x384xf32>
    %cst = arith.constant dense<0.000000e+00> : vector<16x384xf32>
    %9 = tpu.matmul %4, %6, %cst {dimension_numbers = #tpu.dot_dimension_numbers<[1], [0], [0], [1], [0, 0, 1, 1], [], []>} : vector<16x128xf32>, vector<128x384xf32>, vector<16x384xf32> -> vector<16x384xf32>
    %10 = vector.broadcast %8 : vector<1x384xf32> to vector<16x384xf32>
    %11 = arith.addf %9, %10 : vector<16x384xf32>
    %12 = vector.extract_strided_slice %11 {offsets = [0, 0], sizes = [16, 128], strides = [1, 1]} : vector<16x384xf32> to vector<16x128xf32>
    %cst_9 = arith.constant 2.500000e-01 : f32
    %13 = vector.broadcast %cst_9 : f32 to vector<16x128xf32>
    %14 = arith.mulf %12, %13 : vector<16x128xf32>
    %15 = vector.extract_strided_slice %11 {offsets = [0, 128], sizes = [16, 128], strides = [1, 1]} : vector<16x384xf32> to vector<16x128xf32>
    %16 = vector.extract_strided_slice %11 {offsets = [0, 256], sizes = [16, 128], strides = [1, 1]} : vector<16x384xf32> to vector<16x128xf32>
    %17 = vector.extract_strided_slice %14 {offsets = [0, 0], sizes = [16, 16], strides = [1, 1]} : vector<16x128xf32> to vector<16x16xf32>
    %18 = vector.shape_cast %17 : vector<16x16xf32> to vector<2x1x8x16xf32>
    %19 = vector.extract_strided_slice %14 {offsets = [0, 16], sizes = [16, 16], strides = [1, 1]} : vector<16x128xf32> to vector<16x16xf32>
    %20 = vector.shape_cast %19 : vector<16x16xf32> to vector<2x1x8x16xf32>
    %21 = vector.extract_strided_slice %14 {offsets = [0, 32], sizes = [16, 16], strides = [1, 1]} : vector<16x128xf32> to vector<16x16xf32>
    %22 = vector.shape_cast %21 : vector<16x16xf32> to vector<2x1x8x16xf32>
    %23 = vector.extract_strided_slice %14 {offsets = [0, 48], sizes = [16, 16], strides = [1, 1]} : vector<16x128xf32> to vector<16x16xf32>
    %24 = vector.shape_cast %23 : vector<16x16xf32> to vector<2x1x8x16xf32>
    %25 = vector.extract_strided_slice %14 {offsets = [0, 64], sizes = [16, 16], strides = [1, 1]} : vector<16x128xf32> to vector<16x16xf32>
    %26 = vector.shape_cast %25 : vector<16x16xf32> to vector<2x1x8x16xf32>
    %27 = vector.extract_strided_slice %14 {offsets = [0, 80], sizes = [16, 16], strides = [1, 1]} : vector<16x128xf32> to vector<16x16xf32>
    %28 = vector.shape_cast %27 : vector<16x16xf32> to vector<2x1x8x16xf32>
    %29 = vector.extract_strided_slice %14 {offsets = [0, 96], sizes = [16, 16], strides = [1, 1]} : vector<16x128xf32> to vector<16x16xf32>
    %30 = vector.shape_cast %29 : vector<16x16xf32> to vector<2x1x8x16xf32>
    %31 = vector.extract_strided_slice %14 {offsets = [0, 112], sizes = [16, 16], strides = [1, 1]} : vector<16x128xf32> to vector<16x16xf32>
    %32 = vector.shape_cast %31 : vector<16x16xf32> to vector<2x1x8x16xf32>
    %33 = tpu.concatenate %18, %20, %22, %24, %26, %28, %30, %32 in 1 : vector<2x1x8x16xf32>, vector<2x1x8x16xf32>, vector<2x1x8x16xf32>, vector<2x1x8x16xf32>, vector<2x1x8x16xf32>, vector<2x1x8x16xf32>, vector<2x1x8x16xf32>, vector<2x1x8x16xf32> -> vector<2x8x8x16xf32>
    %34 = vector.shape_cast %33 : vector<2x8x8x16xf32> to vector<16x8x16xf32>
    %35 = vector.extract_strided_slice %15 {offsets = [0, 0], sizes = [16, 16], strides = [1, 1]} : vector<16x128xf32> to vector<16x16xf32>
    %36 = vector.shape_cast %35 : vector<16x16xf32> to vector<2x1x8x16xf32>
    %37 = vector.extract_strided_slice %15 {offsets = [0, 16], sizes = [16, 16], strides = [1, 1]} : vector<16x128xf32> to vector<16x16xf32>
    %38 = vector.shape_cast %37 : vector<16x16xf32> to vector<2x1x8x16xf32>
    %39 = vector.extract_strided_slice %15 {offsets = [0, 32], sizes = [16, 16], strides = [1, 1]} : vector<16x128xf32> to vector<16x16xf32>
    %40 = vector.shape_cast %39 : vector<16x16xf32> to vector<2x1x8x16xf32>
    %41 = vector.extract_strided_slice %15 {offsets = [0, 48], sizes = [16, 16], strides = [1, 1]} : vector<16x128xf32> to vector<16x16xf32>
    %42 = vector.shape_cast %41 : vector<16x16xf32> to vector<2x1x8x16xf32>
    %43 = vector.extract_strided_slice %15 {offsets = [0, 64], sizes = [16, 16], strides = [1, 1]} : vector<16x128xf32> to vector<16x16xf32>
    %44 = vector.shape_cast %43 : vector<16x16xf32> to vector<2x1x8x16xf32>
    %45 = vector.extract_strided_slice %15 {offsets = [0, 80], sizes = [16, 16], strides = [1, 1]} : vector<16x128xf32> to vector<16x16xf32>
    %46 = vector.shape_cast %45 : vector<16x16xf32> to vector<2x1x8x16xf32>
    %47 = vector.extract_strided_slice %15 {offsets = [0, 96], sizes = [16, 16], strides = [1, 1]} : vector<16x128xf32> to vector<16x16xf32>
    %48 = vector.shape_cast %47 : vector<16x16xf32> to vector<2x1x8x16xf32>
    %49 = vector.extract_strided_slice %15 {offsets = [0, 112], sizes = [16, 16], strides = [1, 1]} : vector<16x128xf32> to vector<16x16xf32>
    %50 = vector.shape_cast %49 : vector<16x16xf32> to vector<2x1x8x16xf32>
    %51 = tpu.concatenate %36, %38, %40, %42, %44, %46, %48, %50 in 1 : vector<2x1x8x16xf32>, vector<2x1x8x16xf32>, vector<2x1x8x16xf32>, vector<2x1x8x16xf32>, vector<2x1x8x16xf32>, vector<2x1x8x16xf32>, vector<2x1x8x16xf32>, vector<2x1x8x16xf32> -> vector<2x8x8x16xf32>
    %52 = vector.shape_cast %51 : vector<2x8x8x16xf32> to vector<16x8x16xf32>
    %53 = vector.extract_strided_slice %16 {offsets = [0, 0], sizes = [16, 16], strides = [1, 1]} : vector<16x128xf32> to vector<16x16xf32>
    %54 = vector.shape_cast %53 : vector<16x16xf32> to vector<2x1x8x16xf32>
    %55 = vector.extract_strided_slice %16 {offsets = [0, 16], sizes = [16, 16], strides = [1, 1]} : vector<16x128xf32> to vector<16x16xf32>
    %56 = vector.shape_cast %55 : vector<16x16xf32> to vector<2x1x8x16xf32>
    %57 = vector.extract_strided_slice %16 {offsets = [0, 32], sizes = [16, 16], strides = [1, 1]} : vector<16x128xf32> to vector<16x16xf32>
    %58 = vector.shape_cast %57 : vector<16x16xf32> to vector<2x1x8x16xf32>
    %59 = vector.extract_strided_slice %16 {offsets = [0, 48], sizes = [16, 16], strides = [1, 1]} : vector<16x128xf32> to vector<16x16xf32>
    %60 = vector.shape_cast %59 : vector<16x16xf32> to vector<2x1x8x16xf32>
    %61 = vector.extract_strided_slice %16 {offsets = [0, 64], sizes = [16, 16], strides = [1, 1]} : vector<16x128xf32> to vector<16x16xf32>
    %62 = vector.shape_cast %61 : vector<16x16xf32> to vector<2x1x8x16xf32>
    %63 = vector.extract_strided_slice %16 {offsets = [0, 80], sizes = [16, 16], strides = [1, 1]} : vector<16x128xf32> to vector<16x16xf32>
    %64 = vector.shape_cast %63 : vector<16x16xf32> to vector<2x1x8x16xf32>
    %65 = vector.extract_strided_slice %16 {offsets = [0, 96], sizes = [16, 16], strides = [1, 1]} : vector<16x128xf32> to vector<16x16xf32>
    %66 = vector.shape_cast %65 : vector<16x16xf32> to vector<2x1x8x16xf32>
    %67 = vector.extract_strided_slice %16 {offsets = [0, 112], sizes = [16, 16], strides = [1, 1]} : vector<16x128xf32> to vector<16x16xf32>
    %68 = vector.shape_cast %67 : vector<16x16xf32> to vector<2x1x8x16xf32>
    %69 = tpu.concatenate %54, %56, %58, %60, %62, %64, %66, %68 in 1 : vector<2x1x8x16xf32>, vector<2x1x8x16xf32>, vector<2x1x8x16xf32>, vector<2x1x8x16xf32>, vector<2x1x8x16xf32>, vector<2x1x8x16xf32>, vector<2x1x8x16xf32>, vector<2x1x8x16xf32> -> vector<2x8x8x16xf32>
    %70 = vector.shape_cast %69 : vector<2x8x8x16xf32> to vector<16x8x16xf32>
    "tpu.trace_start"() <{level = 10 : i32, message = "bqd,bkd->bqk"}> : () -> ()
    %cst_10 = arith.constant dense<0.000000e+00> : vector<16x8x8xf32>
    %71 = tpu.matmul %34, %52, %cst_10 {dimension_numbers = #tpu.dot_dimension_numbers<[2], [2], [1], [1], [0, 0, 0, 1, 1, 1], [0], [0]>} : vector<16x8x16xf32>, vector<16x8x16xf32>, vector<16x8x8xf32> -> vector<16x8x8xf32>
    "tpu.trace_stop"() : () -> ()
    %c0_11 = arith.constant 0 : index
    %c0_12 = arith.constant 0 : index
    %c0_13 = arith.constant 0 : index
    %72 = vector.load %arg4[%c0_11, %c0_12, %c0_13] : memref<16x1x8xf32, #tpu.memory_space<vmem>>, vector<16x1x8xf32>
    %73 = vector.broadcast %72 : vector<16x1x8xf32> to vector<16x8x8xf32>
    %74 = arith.addf %71, %73 : vector<16x8x8xf32>
    %cst_14 = arith.constant dense<0xFF800000> : vector<16x8xf32>
    %75 = vector.multi_reduction <maximumf>, %74, %cst_14 [2] : vector<16x8x8xf32> to vector<16x8xf32>
    %76 = vector.shape_cast %75 : vector<16x8xf32> to vector<16x8x1xf32>
    %77 = vector.broadcast %76 : vector<16x8x1xf32> to vector<16x8x8xf32>
    %78 = arith.subf %74, %77 : vector<16x8x8xf32>
    %79 = math.exp %78 : vector<16x8x8xf32>
    %cst_15 = arith.constant dense<0.000000e+00> : vector<16x8xf32>
    %80 = vector.multi_reduction <add>, %79, %cst_15 [2] : vector<16x8x8xf32> to vector<16x8xf32>
    %81 = vector.shape_cast %80 : vector<16x8xf32> to vector<16x8x1xf32>
    %82 = tpu.reciprocal %81 {approx = true} : vector<16x8x1xf32> -> vector<16x8x1xf32>
    %83 = vector.broadcast %82 : vector<16x8x1xf32> to vector<16x8x8xf32>
    %84 = arith.mulf %79, %83 : vector<16x8x8xf32>
    "tpu.trace_start"() <{level = 10 : i32, message = "bqk,bkd->bqd"}> : () -> ()
    %cst_16 = arith.constant dense<0.000000e+00> : vector<16x8x16xf32>
    %85 = tpu.matmul %84, %70, %cst_16 {dimension_numbers = #tpu.dot_dimension_numbers<[2], [1], [1], [2], [0, 0, 0, 1, 1, 2], [0], [0]>} : vector<16x8x8xf32>, vector<16x8x16xf32>, vector<16x8x16xf32> -> vector<16x8x16xf32>
    "tpu.trace_stop"() : () -> ()
    %86 = vector.shape_cast %85 : vector<16x8x16xf32> to vector<2x8x8x16xf32>
    %87 = vector.extract_strided_slice %86 {offsets = [0, 0, 0, 0], sizes = [2, 1, 8, 16], strides = [1, 1, 1, 1]} : vector<2x8x8x16xf32> to vector<2x1x8x16xf32>
    %88 = vector.shape_cast %87 : vector<2x1x8x16xf32> to vector<2x8x16xf32>
    %89 = vector.extract_strided_slice %86 {offsets = [0, 1, 0, 0], sizes = [2, 1, 8, 16], strides = [1, 1, 1, 1]} : vector<2x8x8x16xf32> to vector<2x1x8x16xf32>
    %90 = vector.shape_cast %89 : vector<2x1x8x16xf32> to vector<2x8x16xf32>
    %91 = vector.extract_strided_slice %86 {offsets = [0, 2, 0, 0], sizes = [2, 1, 8, 16], strides = [1, 1, 1, 1]} : vector<2x8x8x16xf32> to vector<2x1x8x16xf32>
    %92 = vector.shape_cast %91 : vector<2x1x8x16xf32> to vector<2x8x16xf32>
    %93 = vector.extract_strided_slice %86 {offsets = [0, 3, 0, 0], sizes = [2, 1, 8, 16], strides = [1, 1, 1, 1]} : vector<2x8x8x16xf32> to vector<2x1x8x16xf32>
    %94 = vector.shape_cast %93 : vector<2x1x8x16xf32> to vector<2x8x16xf32>
    %95 = vector.extract_strided_slice %86 {offsets = [0, 4, 0, 0], sizes = [2, 1, 8, 16], strides = [1, 1, 1, 1]} : vector<2x8x8x16xf32> to vector<2x1x8x16xf32>
    %96 = vector.shape_cast %95 : vector<2x1x8x16xf32> to vector<2x8x16xf32>
    %97 = vector.extract_strided_slice %86 {offsets = [0, 5, 0, 0], sizes = [2, 1, 8, 16], strides = [1, 1, 1, 1]} : vector<2x8x8x16xf32> to vector<2x1x8x16xf32>
    %98 = vector.shape_cast %97 : vector<2x1x8x16xf32> to vector<2x8x16xf32>
    %99 = vector.extract_strided_slice %86 {offsets = [0, 6, 0, 0], sizes = [2, 1, 8, 16], strides = [1, 1, 1, 1]} : vector<2x8x8x16xf32> to vector<2x1x8x16xf32>
    %100 = vector.shape_cast %99 : vector<2x1x8x16xf32> to vector<2x8x16xf32>
    %101 = vector.extract_strided_slice %86 {offsets = [0, 7, 0, 0], sizes = [2, 1, 8, 16], strides = [1, 1, 1, 1]} : vector<2x8x8x16xf32> to vector<2x1x8x16xf32>
    %102 = vector.shape_cast %101 : vector<2x1x8x16xf32> to vector<2x8x16xf32>
    %103 = tpu.concatenate %88, %90, %92, %94, %96, %98, %100, %102 in 2 : vector<2x8x16xf32>, vector<2x8x16xf32>, vector<2x8x16xf32>, vector<2x8x16xf32>, vector<2x8x16xf32>, vector<2x8x16xf32>, vector<2x8x16xf32>, vector<2x8x16xf32> -> vector<2x8x128xf32>
    %104 = vector.shape_cast %103 : vector<2x8x128xf32> to vector<16x128xf32>
    %c0_17 = arith.constant 0 : index
    %c0_18 = arith.constant 0 : index
    %c0_19 = arith.constant 0 : index
    %105 = vector.load %arg11[%c0_17, %c0_18, %c0_19] : memref<1x128x128xf32, #tpu.memory_space<vmem>>, vector<1x128x128xf32>
    %106 = vector.shape_cast %105 : vector<1x128x128xf32> to vector<128x128xf32>
    %c0_20 = arith.constant 0 : index
    %c0_21 = arith.constant 0 : index
    %c0_22 = arith.constant 0 : index
    %107 = vector.load %arg12[%c0_20, %c0_21, %c0_22] : memref<1x1x128xf32, #tpu.memory_space<vmem>>, vector<1x1x128xf32>
    %108 = vector.shape_cast %107 : vector<1x1x128xf32> to vector<1x128xf32>
    %cst_23 = arith.constant dense<0.000000e+00> : vector<16x128xf32>
    %109 = tpu.matmul %104, %106, %cst_23 {dimension_numbers = #tpu.dot_dimension_numbers<[1], [0], [0], [1], [0, 0, 1, 1], [], []>} : vector<16x128xf32>, vector<128x128xf32>, vector<16x128xf32> -> vector<16x128xf32>
    %110 = vector.broadcast %108 : vector<1x128xf32> to vector<16x128xf32>
    %111 = arith.addf %109, %110 : vector<16x128xf32>
    %112 = arith.addf %4, %111 : vector<16x128xf32>
    %c0_24 = arith.constant 0 : index
    %c0_25 = arith.constant 0 : index
    %c0_26 = arith.constant 0 : index
    %113 = vector.load %arg13[%c0_24, %c0_25, %c0_26] : memref<1x1x128xf32, #tpu.memory_space<vmem>>, vector<1x1x128xf32>
    %114 = vector.shape_cast %113 : vector<1x1x128xf32> to vector<1x128xf32>
    %c0_27 = arith.constant 0 : index
    %c0_28 = arith.constant 0 : index
    %c0_29 = arith.constant 0 : index
    %115 = vector.load %arg14[%c0_27, %c0_28, %c0_29] : memref<1x1x128xf32, #tpu.memory_space<vmem>>, vector<1x1x128xf32>
    %116 = vector.shape_cast %115 : vector<1x1x128xf32> to vector<1x128xf32>
    %cst_30 = arith.constant dense<0.000000e+00> : vector<16xf32>
    %117 = vector.multi_reduction <add>, %112, %cst_30 [1] : vector<16x128xf32> to vector<16xf32>
    %118 = vector.shape_cast %117 : vector<16xf32> to vector<16x1xf32>
    %cst_31 = arith.constant 1.280000e+02 : f32
    %119 = vector.broadcast %cst_31 : f32 to vector<16x1xf32>
    %120 = arith.divf %118, %119 : vector<16x1xf32>
    %121 = vector.broadcast %120 : vector<16x1xf32> to vector<16x128xf32>
    %122 = arith.subf %112, %121 : vector<16x128xf32>
    %123 = arith.mulf %122, %122 : vector<16x128xf32>
    %cst_32 = arith.constant dense<0.000000e+00> : vector<16xf32>
    %124 = vector.multi_reduction <add>, %123, %cst_32 [1] : vector<16x128xf32> to vector<16xf32>
    %125 = vector.shape_cast %124 : vector<16xf32> to vector<16x1xf32>
    %cst_33 = arith.constant 1.280000e+02 : f32
    %126 = vector.broadcast %cst_33 : f32 to vector<16x1xf32>
    %127 = arith.divf %125, %126 : vector<16x1xf32>
    %128 = vector.broadcast %120 : vector<16x1xf32> to vector<16x128xf32>
    %129 = arith.subf %112, %128 : vector<16x128xf32>
    %cst_34 = arith.constant 9.99999974E-6 : f32
    %130 = vector.broadcast %cst_34 : f32 to vector<16x1xf32>
    %131 = arith.addf %127, %130 : vector<16x1xf32>
    %132 = math.rsqrt %131 : vector<16x1xf32>
    %133 = vector.broadcast %132 : vector<16x1xf32> to vector<16x128xf32>
    %134 = arith.mulf %129, %133 : vector<16x128xf32>
    %135 = vector.broadcast %114 : vector<1x128xf32> to vector<16x128xf32>
    %136 = arith.mulf %134, %135 : vector<16x128xf32>
    %137 = vector.broadcast %116 : vector<1x128xf32> to vector<16x128xf32>
    %138 = arith.addf %136, %137 : vector<16x128xf32>
    %c0_35 = arith.constant 0 : index
    %c0_36 = arith.constant 0 : index
    %c0_37 = arith.constant 0 : index
    %139 = vector.load %arg15[%c0_35, %c0_36, %c0_37] : memref<1x128x2048xf32, #tpu.memory_space<vmem>>, vector<1x128x2048xf32>
    %140 = vector.shape_cast %139 : vector<1x128x2048xf32> to vector<128x2048xf32>
    %c0_38 = arith.constant 0 : index
    %c0_39 = arith.constant 0 : index
    %c0_40 = arith.constant 0 : index
    %141 = vector.load %arg16[%c0_38, %c0_39, %c0_40] : memref<1x1x2048xf32, #tpu.memory_space<vmem>>, vector<1x1x2048xf32>
    %142 = vector.shape_cast %141 : vector<1x1x2048xf32> to vector<1x2048xf32>
    %cst_41 = arith.constant dense<0.000000e+00> : vector<16x2048xf32>
    %143 = tpu.matmul %138, %140, %cst_41 {dimension_numbers = #tpu.dot_dimension_numbers<[1], [0], [0], [1], [0, 0, 1, 1], [], []>} : vector<16x128xf32>, vector<128x2048xf32>, vector<16x2048xf32> -> vector<16x2048xf32>
    %144 = vector.broadcast %142 : vector<1x2048xf32> to vector<16x2048xf32>
    %145 = arith.addf %143, %144 : vector<16x2048xf32>
    %cst_42 = arith.constant 0.000000e+00 : f32
    %146 = vector.broadcast %cst_42 : f32 to vector<16x2048xf32>
    %147 = arith.maximumf %145, %146 : vector<16x2048xf32>
    %c0_43 = arith.constant 0 : index
    %c0_44 = arith.constant 0 : index
    %c0_45 = arith.constant 0 : index
    %148 = vector.load %arg17[%c0_43, %c0_44, %c0_45] : memref<1x2048x128xf32, #tpu.memory_space<vmem>>, vector<1x2048x128xf32>
    %149 = vector.shape_cast %148 : vector<1x2048x128xf32> to vector<2048x128xf32>
    %c0_46 = arith.constant 0 : index
    %c0_47 = arith.constant 0 : index
    %c0_48 = arith.constant 0 : index
    %150 = vector.load %arg18[%c0_46, %c0_47, %c0_48] : memref<1x1x128xf32, #tpu.memory_space<vmem>>, vector<1x1x128xf32>
    %151 = vector.shape_cast %150 : vector<1x1x128xf32> to vector<1x128xf32>
    %cst_49 = arith.constant dense<0.000000e+00> : vector<16x128xf32>
    %152 = tpu.matmul %147, %149, %cst_49 {dimension_numbers = #tpu.dot_dimension_numbers<[1], [0], [0], [1], [0, 0, 1, 1], [], []>} : vector<16x2048xf32>, vector<2048x128xf32>, vector<16x128xf32> -> vector<16x128xf32>
    %153 = vector.broadcast %151 : vector<1x128xf32> to vector<16x128xf32>
    %154 = arith.addf %152, %153 : vector<16x128xf32>
    %155 = arith.addf %138, %154 : vector<16x128xf32>
    %c0_50 = arith.constant 0 : index
    %c0_51 = arith.constant 0 : index
    %c0_52 = arith.constant 0 : index
    %156 = vector.load %arg19[%c0_50, %c0_51, %c0_52] : memref<1x1x128xf32, #tpu.memory_space<vmem>>, vector<1x1x128xf32>
    %157 = vector.shape_cast %156 : vector<1x1x128xf32> to vector<1x128xf32>
    %c0_53 = arith.constant 0 : index
    %c0_54 = arith.constant 0 : index
    %c0_55 = arith.constant 0 : index
    %158 = vector.load %arg20[%c0_53, %c0_54, %c0_55] : memref<1x1x128xf32, #tpu.memory_space<vmem>>, vector<1x1x128xf32>
    %159 = vector.shape_cast %158 : vector<1x1x128xf32> to vector<1x128xf32>
    %cst_56 = arith.constant dense<0.000000e+00> : vector<16xf32>
    %160 = vector.multi_reduction <add>, %155, %cst_56 [1] : vector<16x128xf32> to vector<16xf32>
    %161 = vector.shape_cast %160 : vector<16xf32> to vector<16x1xf32>
    %cst_57 = arith.constant 1.280000e+02 : f32
    %162 = vector.broadcast %cst_57 : f32 to vector<16x1xf32>
    %163 = arith.divf %161, %162 : vector<16x1xf32>
    %164 = vector.broadcast %163 : vector<16x1xf32> to vector<16x128xf32>
    %165 = arith.subf %155, %164 : vector<16x128xf32>
    %166 = arith.mulf %165, %165 : vector<16x128xf32>
    %cst_58 = arith.constant dense<0.000000e+00> : vector<16xf32>
    %167 = vector.multi_reduction <add>, %166, %cst_58 [1] : vector<16x128xf32> to vector<16xf32>
    %168 = vector.shape_cast %167 : vector<16xf32> to vector<16x1xf32>
    %cst_59 = arith.constant 1.280000e+02 : f32
    %169 = vector.broadcast %cst_59 : f32 to vector<16x1xf32>
    %170 = arith.divf %168, %169 : vector<16x1xf32>
    %171 = vector.broadcast %163 : vector<16x1xf32> to vector<16x128xf32>
    %172 = arith.subf %155, %171 : vector<16x128xf32>
    %cst_60 = arith.constant 9.99999974E-6 : f32
    %173 = vector.broadcast %cst_60 : f32 to vector<16x1xf32>
    %174 = arith.addf %170, %173 : vector<16x1xf32>
    %175 = math.rsqrt %174 : vector<16x1xf32>
    %176 = vector.broadcast %175 : vector<16x1xf32> to vector<16x128xf32>
    %177 = arith.mulf %172, %176 : vector<16x128xf32>
    %178 = vector.broadcast %157 : vector<1x128xf32> to vector<16x128xf32>
    %179 = arith.mulf %177, %178 : vector<16x128xf32>
    %180 = vector.broadcast %159 : vector<1x128xf32> to vector<16x128xf32>
    %181 = arith.addf %179, %180 : vector<16x128xf32>
    %c0_61 = arith.constant 0 : index
    %c0_62 = arith.constant 0 : index
    %c0_63 = arith.constant 0 : index
    %182 = vector.load %arg33[%c0_61, %c0_62, %c0_63] : memref<1x16x128xf32, #tpu.memory_space<vmem>>, vector<1x16x128xf32>
    %183 = vector.shape_cast %182 : vector<1x16x128xf32> to vector<16x128xf32>
    %184 = vector.shape_cast %181 : vector<16x128xf32> to vector<1x16x128xf32>
    tpu.vector_store %arg33[%c0_61, %c0_62, %c0_63], %184 {strides = array<i32>} : memref<1x16x128xf32, #tpu.memory_space<vmem>>, vector<1x16x128xf32>,
    %c11_i32 = arith.constant 11 : i32
    %185 = arith.cmpi eq, %arg1, %c11_i32 : i32
    %186 = arith.extui %185 : i1 to i32
    %c0_i32_64 = arith.constant 0 : i32
    %187 = arith.cmpi ne, %186, %c0_i32_64 : i32
    scf.if %187 {
      %188 = vector.shape_cast %181 : vector<16x128xf32> to vector<2x8x128xf32>
      %cst_65 = arith.constant dense<0.000000e+00> : vector<2x128xf32>
      %189 = vector.multi_reduction <add>, %188, %cst_65 [1] : vector<2x8x128xf32> to vector<2x128xf32>
      %c0_66 = arith.constant 0 : index
      %c0_67 = arith.constant 0 : index
      %190 = vector.load %arg3[%c0_66, %c0_67] : memref<2x3xf32, #tpu.memory_space<vmem>>, vector<2x3xf32>
      %c0_68 = arith.constant 0 : index
      %c0_69 = arith.constant 0 : index
      %191 = vector.load %arg21[%c0_68, %c0_69] : memref<3x24xf32, #tpu.memory_space<vmem>>, vector<3x24xf32>
      %cst_70 = arith.constant dense<0.000000e+00> : vector<2x24xf32>
      %192 = tpu.matmul %190, %191, %cst_70 {dimension_numbers = #tpu.dot_dimension_numbers<[1], [0], [0], [1], [0, 0, 1, 1], [], []>} : vector<2x3xf32>, vector<3x24xf32>, vector<2x24xf32> -> vector<2x24xf32>
      %c0_71 = arith.constant 0 : index
      %c0_72 = arith.constant 0 : index
      %193 = vector.load %arg22[%c0_71, %c0_72] : memref<1x24xf32, #tpu.memory_space<vmem>>, vector<1x24xf32>
      %194 = vector.broadcast %193 : vector<1x24xf32> to vector<2x24xf32>
      %195 = arith.addf %192, %194 : vector<2x24xf32>
      %cst_73 = arith.constant 0.000000e+00 : f32
      %196 = vector.broadcast %cst_73 : f32 to vector<2x24xf32>
      %197 = arith.maximumf %195, %196 : vector<2x24xf32>
      %c0_74 = arith.constant 0 : index
      %c0_75 = arith.constant 0 : index
      %198 = vector.load %arg23[%c0_74, %c0_75] : memref<24x64xf32, #tpu.memory_space<vmem>>, vector<24x64xf32>
      %cst_76 = arith.constant dense<0.000000e+00> : vector<2x64xf32>
      %199 = tpu.matmul %197, %198, %cst_76 {dimension_numbers = #tpu.dot_dimension_numbers<[1], [0], [0], [1], [0, 0, 1, 1], [], []>} : vector<2x24xf32>, vector<24x64xf32>, vector<2x64xf32> -> vector<2x64xf32>
      %c0_77 = arith.constant 0 : index
      %c0_78 = arith.constant 0 : index
      %200 = vector.load %arg24[%c0_77, %c0_78] : memref<1x64xf32, #tpu.memory_space<vmem>>, vector<1x64xf32>
      %201 = vector.broadcast %200 : vector<1x64xf32> to vector<2x64xf32>
      %202 = arith.addf %199, %201 : vector<2x64xf32>
      %cst_79 = arith.constant 0.000000e+00 : f32
      %203 = vector.broadcast %cst_79 : f32 to vector<2x64xf32>
      %204 = arith.maximumf %202, %203 : vector<2x64xf32>
      %c0_80 = arith.constant 0 : index
      %c0_81 = arith.constant 0 : index
      %205 = vector.load %arg25[%c0_80, %c0_81] : memref<64x128xf32, #tpu.memory_space<vmem>>, vector<64x128xf32>
      %cst_82 = arith.constant dense<0.000000e+00> : vector<2x128xf32>
      %206 = tpu.matmul %204, %205, %cst_82 {dimension_numbers = #tpu.dot_dimension_numbers<[1], [0], [0], [1], [0, 0, 1, 1], [], []>} : vector<2x64xf32>, vector<64x128xf32>, vector<2x128xf32> -> vector<2x128xf32>
      %c0_83 = arith.constant 0 : index
      %c0_84 = arith.constant 0 : index
      %207 = vector.load %arg26[%c0_83, %c0_84] : memref<1x128xf32, #tpu.memory_space<vmem>>, vector<1x128xf32>
      %208 = vector.broadcast %207 : vector<1x128xf32> to vector<2x128xf32>
      %209 = arith.addf %206, %208 : vector<2x128xf32>
      %c0_85 = arith.constant 0 : index
      %c0_86 = arith.constant 0 : index
      %210 = vector.load %arg27[%c0_85, %c0_86] : memref<128x32xf32, #tpu.memory_space<vmem>>, vector<128x32xf32>
      %cst_87 = arith.constant dense<0.000000e+00> : vector<2x32xf32>
      %211 = tpu.matmul %189, %210, %cst_87 {dimension_numbers = #tpu.dot_dimension_numbers<[1], [0], [0], [1], [0, 0, 1, 1], [], []>} : vector<2x128xf32>, vector<128x32xf32>, vector<2x32xf32> -> vector<2x32xf32>
      %c0_88 = arith.constant 0 : index
      %c0_89 = arith.constant 0 : index
      %212 = vector.load %arg28[%c0_88, %c0_89] : memref<128x32xf32, #tpu.memory_space<vmem>>, vector<128x32xf32>
      %cst_90 = arith.constant dense<0.000000e+00> : vector<2x32xf32>
      %213 = tpu.matmul %209, %212, %cst_90 {dimension_numbers = #tpu.dot_dimension_numbers<[1], [0], [0], [1], [0, 0, 1, 1], [], []>} : vector<2x128xf32>, vector<128x32xf32>, vector<2x32xf32> -> vector<2x32xf32>
      %214 = arith.addf %211, %213 : vector<2x32xf32>
      %c0_91 = arith.constant 0 : index
      %c0_92 = arith.constant 0 : index
      %215 = vector.load %arg29[%c0_91, %c0_92] : memref<1x32xf32, #tpu.memory_space<vmem>>, vector<1x32xf32>
      %216 = vector.broadcast %215 : vector<1x32xf32> to vector<2x32xf32>
      %217 = arith.addf %214, %216 : vector<2x32xf32>
      %cst_93 = arith.constant 0.000000e+00 : f32
      %218 = vector.broadcast %cst_93 : f32 to vector<2x32xf32>
      %219 = arith.maximumf %217, %218 : vector<2x32xf32>
      %c0_94 = arith.constant 0 : index
      %c0_95 = arith.constant 0 : index
      %220 = vector.load %arg30[%c0_94, %c0_95] : memref<32x2xf32, #tpu.memory_space<vmem>>, vector<32x2xf32>
      %cst_96 = arith.constant dense<0.000000e+00> : vector<2x2xf32>
      %221 = tpu.matmul %219, %220, %cst_96 {dimension_numbers = #tpu.dot_dimension_numbers<[1], [0], [0], [1], [0, 0, 1, 1], [], []>} : vector<2x32xf32>, vector<32x2xf32>, vector<2x2xf32> -> vector<2x2xf32>
      %c0_97 = arith.constant 0 : index
      %c0_98 = arith.constant 0 : index
      %222 = vector.load %arg31[%c0_97, %c0_98] : memref<1x2xf32, #tpu.memory_space<vmem>>, vector<1x2xf32>
      %223 = vector.broadcast %222 : vector<1x2xf32> to vector<2x2xf32>
      %224 = arith.addf %221, %223 : vector<2x2xf32>
      %c0_99 = arith.constant 0 : index
      %c0_100 = arith.constant 0 : index
      %225 = vector.load %arg32[%c0_99, %c0_100] : memref<2x2xf32, #tpu.memory_space<vmem>>, vector<2x2xf32>
      tpu.vector_store %arg32[%c0_99, %c0_100], %224 {strides = array<i32>} : memref<2x2xf32, #tpu.memory_space<vmem>>, vector<2x2xf32>,
    } else {
    }
    return
  }
  func.func @transform_0(%arg0: i32, %arg1: i32) -> (i32, i32) {
    %c0_i32 = arith.constant 0 : i32
    %c0_i32_0 = arith.constant 0 : i32
    return %arg0, %c0_i32 : i32, i32
  }
  func.func @transform_1(%arg0: i32, %arg1: i32) -> (i32, i32) {
    %c0_i32 = arith.constant 0 : i32
    %c0_i32_0 = arith.constant 0 : i32
    return %arg0, %c0_i32 : i32, i32
  }
  func.func @transform_2(%arg0: i32, %arg1: i32) -> (i32, i32, i32) {
    %c0_i32 = arith.constant 0 : i32
    %c0_i32_0 = arith.constant 0 : i32
    %c0_i32_1 = arith.constant 0 : i32
    return %arg0, %c0_i32, %c0_i32_0 : i32, i32, i32
  }
  func.func @transform_3(%arg0: i32, %arg1: i32) -> (i32, i32) {
    %c0_i32 = arith.constant 0 : i32
    %c0_i32_0 = arith.constant 0 : i32
    %c0_i32_1 = arith.constant 0 : i32
    return %c0_i32, %c0_i32_0 : i32, i32
  }
  func.func @transform_4(%arg0: i32, %arg1: i32) -> (i32, i32) {
    %c0_i32 = arith.constant 0 : i32
    %c0_i32_0 = arith.constant 0 : i32
    %c0_i32_1 = arith.constant 0 : i32
    return %c0_i32, %c0_i32_0 : i32, i32
  }
  func.func @transform_5(%arg0: i32, %arg1: i32) -> (i32, i32) {
    %c0_i32 = arith.constant 0 : i32
    %c0_i32_0 = arith.constant 0 : i32
    %c0_i32_1 = arith.constant 0 : i32
    return %c0_i32, %c0_i32_0 : i32, i32
  }
  func.func @transform_6(%arg0: i32, %arg1: i32) -> (i32, i32) {
    %c0_i32 = arith.constant 0 : i32
    %c0_i32_0 = arith.constant 0 : i32
    %c0_i32_1 = arith.constant 0 : i32
    return %c0_i32, %c0_i32_0 : i32, i32
  }
  func.func @transform_7(%arg0: i32, %arg1: i32) -> (i32, i32, i32) {
    %c0_i32 = arith.constant 0 : i32
    %c0_i32_0 = arith.constant 0 : i32
    %c0_i32_1 = arith.constant 0 : i32
    return %arg1, %c0_i32, %c0_i32_0 : i32, i32, i32
  }
  func.func @transform_8(%arg0: i32, %arg1: i32) -> (i32, i32, i32) {
    %c0_i32 = arith.constant 0 : i32
    %c0_i32_0 = arith.constant 0 : i32
    %c0_i32_1 = arith.constant 0 : i32
    return %arg1, %c0_i32, %c0_i32_0 : i32, i32, i32
  }
  func.func @transform_9(%arg0: i32, %arg1: i32) -> (i32, i32, i32) {
    %c0_i32 = arith.constant 0 : i32
    %c0_i32_0 = arith.constant 0 : i32
    %c0_i32_1 = arith.constant 0 : i32
    return %arg1, %c0_i32, %c0_i32_0 : i32, i32, i32
  }
  func.func @transform_10(%arg0: i32, %arg1: i32) -> (i32, i32, i32) {
    %c0_i32 = arith.constant 0 : i32
    %c0_i32_0 = arith.constant 0 : i32
    %c0_i32_1 = arith.constant 0 : i32
    return %arg1, %c0_i32, %c0_i32_0 : i32, i32, i32
  }
  func.func @transform_11(%arg0: i32, %arg1: i32) -> (i32, i32, i32) {
    %c0_i32 = arith.constant 0 : i32
    %c0_i32_0 = arith.constant 0 : i32
    %c0_i32_1 = arith.constant 0 : i32
    return %arg1, %c0_i32, %c0_i32_0 : i32, i32, i32
  }
  func.func @transform_12(%arg0: i32, %arg1: i32) -> (i32, i32, i32) {
    %c0_i32 = arith.constant 0 : i32
    %c0_i32_0 = arith.constant 0 : i32
    %c0_i32_1 = arith.constant 0 : i32
    return %arg1, %c0_i32, %c0_i32_0 : i32, i32, i32
  }
  func.func @transform_13(%arg0: i32, %arg1: i32) -> (i32, i32, i32) {
    %c0_i32 = arith.constant 0 : i32
    %c0_i32_0 = arith.constant 0 : i32
    %c0_i32_1 = arith.constant 0 : i32
    return %arg1, %c0_i32, %c0_i32_0 : i32, i32, i32
  }
  func.func @transform_14(%arg0: i32, %arg1: i32) -> (i32, i32, i32) {
    %c0_i32 = arith.constant 0 : i32
    %c0_i32_0 = arith.constant 0 : i32
    %c0_i32_1 = arith.constant 0 : i32
    return %arg1, %c0_i32, %c0_i32_0 : i32, i32, i32
  }
  func.func @transform_15(%arg0: i32, %arg1: i32) -> (i32, i32, i32) {
    %c0_i32 = arith.constant 0 : i32
    %c0_i32_0 = arith.constant 0 : i32
    %c0_i32_1 = arith.constant 0 : i32
    return %arg1, %c0_i32, %c0_i32_0 : i32, i32, i32
  }
  func.func @transform_16(%arg0: i32, %arg1: i32) -> (i32, i32, i32) {
    %c0_i32 = arith.constant 0 : i32
    %c0_i32_0 = arith.constant 0 : i32
    %c0_i32_1 = arith.constant 0 : i32
    return %arg1, %c0_i32, %c0_i32_0 : i32, i32, i32
  }
  func.func @transform_17(%arg0: i32, %arg1: i32) -> (i32, i32, i32) {
    %c0_i32 = arith.constant 0 : i32
    %c0_i32_0 = arith.constant 0 : i32
    %c0_i32_1 = arith.constant 0 : i32
    return %arg1, %c0_i32, %c0_i32_0 : i32, i32, i32
  }
  func.func @transform_18(%arg0: i32, %arg1: i32) -> (i32, i32, i32) {
    %c0_i32 = arith.constant 0 : i32
    %c0_i32_0 = arith.constant 0 : i32
    %c0_i32_1 = arith.constant 0 : i32
    return %arg1, %c0_i32, %c0_i32_0 : i32, i32, i32
  }
  func.func @transform_19(%arg0: i32, %arg1: i32) -> (i32, i32) {
    %c0_i32 = arith.constant 0 : i32
    %c0_i32_0 = arith.constant 0 : i32
    %c0_i32_1 = arith.constant 0 : i32
    return %c0_i32, %c0_i32_0 : i32, i32
  }
  func.func @transform_20(%arg0: i32, %arg1: i32) -> (i32, i32) {
    %c0_i32 = arith.constant 0 : i32
    %c0_i32_0 = arith.constant 0 : i32
    %c0_i32_1 = arith.constant 0 : i32
    return %c0_i32, %c0_i32_0 : i32, i32
  }
  func.func @transform_21(%arg0: i32, %arg1: i32) -> (i32, i32) {
    %c0_i32 = arith.constant 0 : i32
    %c0_i32_0 = arith.constant 0 : i32
    %c0_i32_1 = arith.constant 0 : i32
    return %c0_i32, %c0_i32_0 : i32, i32
  }
  func.func @transform_22(%arg0: i32, %arg1: i32) -> (i32, i32) {
    %c0_i32 = arith.constant 0 : i32
    %c0_i32_0 = arith.constant 0 : i32
    %c0_i32_1 = arith.constant 0 : i32
    return %c0_i32, %c0_i32_0 : i32, i32
  }
  func.func @transform_23(%arg0: i32, %arg1: i32) -> (i32, i32) {
    %c0_i32 = arith.constant 0 : i32
    %c0_i32_0 = arith.constant 0 : i32
    %c0_i32_1 = arith.constant 0 : i32
    return %c0_i32, %c0_i32_0 : i32, i32
  }
  func.func @transform_24(%arg0: i32, %arg1: i32) -> (i32, i32) {
    %c0_i32 = arith.constant 0 : i32
    %c0_i32_0 = arith.constant 0 : i32
    %c0_i32_1 = arith.constant 0 : i32
    return %c0_i32, %c0_i32_0 : i32, i32
  }
  func.func @transform_25(%arg0: i32, %arg1: i32) -> (i32, i32) {
    %c0_i32 = arith.constant 0 : i32
    %c0_i32_0 = arith.constant 0 : i32
    %c0_i32_1 = arith.constant 0 : i32
    return %c0_i32, %c0_i32_0 : i32, i32
  }
  func.func @transform_26(%arg0: i32, %arg1: i32) -> (i32, i32) {
    %c0_i32 = arith.constant 0 : i32
    %c0_i32_0 = arith.constant 0 : i32
    %c0_i32_1 = arith.constant 0 : i32
    return %c0_i32, %c0_i32_0 : i32, i32
  }
  func.func @transform_27(%arg0: i32, %arg1: i32) -> (i32, i32) {
    %c0_i32 = arith.constant 0 : i32
    %c0_i32_0 = arith.constant 0 : i32
    %c0_i32_1 = arith.constant 0 : i32
    return %c0_i32, %c0_i32_0 : i32, i32
  }
  func.func @transform_28(%arg0: i32, %arg1: i32) -> (i32, i32) {
    %c0_i32 = arith.constant 0 : i32
    %c0_i32_0 = arith.constant 0 : i32
    %c0_i32_1 = arith.constant 0 : i32
    return %c0_i32, %c0_i32_0 : i32, i32
  }
  func.func @transform_29(%arg0: i32, %arg1: i32) -> (i32, i32) {
    %c0_i32 = arith.constant 0 : i32
    %c0_i32_0 = arith.constant 0 : i32
    %c0_i32_1 = arith.constant 0 : i32
    return %c0_i32, %c0_i32_0 : i32, i32
  }
  func.func @transform_30(%arg0: i32, %arg1: i32) -> (i32, i32) {
    %c0_i32 = arith.constant 0 : i32
    %c0_i32_0 = arith.constant 0 : i32
    return %arg0, %c0_i32 : i32, i32
  }
}

</mosaic_0001>

<bundles_post_ra>
// kernel: tpu_custom_call.1
= control target key start
LH: loop header
LB: loop body
LE: loop exit
PB: predicated region body
PF: predicated region fallthrough
CT: control target
= control target key end

     0   :  { %s6550_s6 = smov 1   ;;  %s6551_s10 = smov 2   ;;  %s8368_s0 = inlined_call_operand.smem [shape: u32[31], index: -1, kind: input, shape index: {}] }
   0x1   :  { %s6618_s5 = sld [smem:[%s8368_s0]]   ;;  %s6552_s14 = smov 3  }
   0x2   :  { %s6623_s9 = sld [smem:[%s8368_s0 + %s6550_s6]]   ;;  %s6553_s18 = smov 4  }
   0x3   :  { %s6628_s13 = sld [smem:[%s8368_s0 + %s6551_s10]]   ;;  %s6554_s22 = smov 5  }
   0x4   :  { %s6633_s17 = sld [smem:[%s8368_s0 + %s6552_s14]]   ;;  %s6555_s26 = smov 6  }
   0x5   :  { %s6638_s21 = sld [smem:[%s8368_s0 + %s6553_s18]]   ;;  %s6556_s30 = smov 7  }
   0x6   :  { %s6643_s25 = sld [smem:[%s8368_s0 + %s6554_s22]]   ;;  %s6557_s4 = smov 8  }
   0x7   :  { %8417 = sst [smem:[#allocation50_spill]] %s6618_s5  ;;  %s6558_s10 = smov 9  }
   0x8   :  { %8418 = sst [smem:[#allocation51_spill]] %s6623_s9  ;;  %s6559_s15 = smov 10  }
   0x9   :  { %8419 = sst [smem:[#allocation52_spill]] %s6628_s13  ;;  %s6560_s20 = smov 11  }
   0xa   :  { %8420 = sst [smem:[#allocation53_spill]] %s6633_s17  ;;  %s6562_s1 = smov 13  }
   0xb   :  { %s6648_s29 = sld [smem:[%s8368_s0 + %s6555_s26]]   ;;  %s6561_s26 = smov 12  }
   0xc   :  { %s6653_s3 = sld [smem:[%s8368_s0 + %s6556_s30]]   ;;  %s6563_s7 = smov 14  }
   0xd   :  { %s6658_s8 = sld [smem:[%s8368_s0 + %s6557_s4]]   ;;  %s6565_s22 = smov 16  }
   0xe   :  { %s6663_s14 = sld [smem:[%s8368_s0 + %s6558_s10]]   ;;  %s6566_s28 = smov 17  }
   0xf   :  { %s6668_s19 = sld [smem:[%s8368_s0 + %s6559_s15]]   ;;  %s6564_s15 = smov 15  }
  0x10   :  { %s6673_s24 = sld [smem:[%s8368_s0 + %s6560_s20]]  }
  0x11   :  { %s6678_s30 = sld [smem:[%s8368_s0 + %s6561_s26]]  }
  0x12   :  { %8421 = sst [smem:[#allocation54_spill]] %s6653_s3 }
  0x13   :  { %8422 = sst [smem:[#allocation55_spill]] %s6658_s8 }
  0x14   :  { %8423 = sst [smem:[#allocation56_spill]] %s6663_s14 }
  0x15   :  { %8424 = sst [smem:[#allocation57_spill]] %s6668_s19 }
  0x16   :  { %8425 = sst [smem:[#allocation58_spill]] %s6673_s24 }
  0x17   :  { %8426 = sst [smem:[#allocation59_spill]] %s6678_s30 }
  0x18   :  { %s6683_s6 = sld [smem:[%s8368_s0 + %s6562_s1]]  }
  0x19   :  { %s6688_s12 = sld [smem:[%s8368_s0 + %s6563_s7]]   ;;  %s6567_s7 = smov 18  }
  0x1a   :  { %s6693_s20 = sld [smem:[%s8368_s0 + %s6564_s15]]   ;;  %s6568_s15 = smov 19  }
  0x1b   :  { %s6698_s27 = sld [smem:[%s8368_s0 + %s6565_s22]]   ;;  %s6569_s22 = smov 20  }
  0x1c   :  { %s6703_s4 = sld [smem:[%s8368_s0 + %s6566_s28]]   ;;  %s6570_s28 = smov 21  }
  0x1d   :  { %s6708_s13 = sld [smem:[%s8368_s0 + %s6567_s7]]   ;;  %s6571_s7 = smov 22  }
  0x1e   :  { %8427 = sst [smem:[#allocation60_spill]] %s6683_s6 }
  0x1f   :  { %8428 = sst [smem:[#allocation61_spill]] %s6688_s12 }
  0x20   :  { %8429 = sst [smem:[#allocation62_spill]] %s6693_s20 }
  0x21   :  { %8430 = sst [smem:[#allocation63_spill]] %s6698_s27 }
  0x22   :  { %8431 = sst [smem:[#allocation64_spill]] %s6703_s4 }
  0x23   :  { %8432 = sst [smem:[#allocation65_spill]] %s6708_s13 }
  0x24   :  { %s6713_s20 = sld [smem:[%s8368_s0 + %s6568_s15]]   ;;  %s6572_s15 = smov 23  }
  0x25   :  { %s6718_s27 = sld [smem:[%s8368_s0 + %s6569_s22]]   ;;  %s6573_s22 = smov 24  }
  0x26   :  { %s6723_s4 = sld [smem:[%s8368_s0 + %s6570_s28]]   ;;  %s6574_s28 = smov 25  }
  0x27   :  { %s6728_s13 = sld [smem:[%s8368_s0 + %s6571_s7]]   ;;  %s6575_s7 = smov 26  }
  0x28   :  { %s6733_s12 = sld [smem:[%s8368_s0 + %s6572_s15]]   ;;  %s6576_s15 = smov 27  }
  0x29   :  { %s6738_s6 = sld [smem:[%s8368_s0 + %s6573_s22]]   ;;  %s6577_s22 = smov 28  }
  0x2a   :  { %s6743_s30 = sld [smem:[%s8368_s0 + %s6574_s28]]   ;;  %s6578_s28 = smov 29  }
  0x2b   :  { %s6748_s24 = sld [smem:[%s8368_s0 + %s6575_s7]]   ;;  %s6579_s7 = smov 30  }
  0x2c   :  { %8433 = sst [smem:[#allocation66_spill]] %s6723_s4 }
  0x2d   :  { %s6753_s19 = sld [smem:[%s8368_s0 + %s6576_s15]]  }
  0x2e   :  { %8434 = sst [smem:[#allocation67_spill]] %s6733_s12 }
  0x2f   :  { %8435 = sst [smem:[#allocation68_spill]] %s6738_s6 }
  0x30   :  { %8436 = sst [smem:[#allocation69_spill]] %s6743_s30 }
  0x31   :  { %8437 = sst [smem:[#allocation70_spill]] %s6748_s24 }
  0x32   :  { %s6758_s14 = sld [smem:[%s8368_s0 + %s6577_s22]]  }
  0x33   :  { %s6763_s30 = sld [smem:[%s8368_s0 + %s6578_s28]]  }
  0x34   :  { %s6768_s24 = sld [smem:[%s8368_s0 + %s6579_s7]]  }
  0x38   :  { %8438 = sst [smem:[#allocation71_spill]] %s6758_s14 }
  0x3a   :  { %8439 = sst [smem:[#allocation72_spill]] %s6768_s24 }
  0x3b   :  { %66 = vsyncpa [#allocation4], 0 }
  0x3c   :  { %67 = vsyncpa [#allocation7], 0 }
  0x3d   :  { %68 = vsyncpa [#allocation10], 0 }
  0x3e   :  { %69 = vsyncpa [#allocation13], 0 }
  0x3f   :  { %70 = vsyncpa [#allocation30], 0 }
  0x40   :  { %71 = vsyncpa [#allocation33], 0 }
  0x41   :  { %72 = vsyncpa [#allocation36], 0 }
  0x42   :  { %73 = vsyncpa [#allocation5], 0  ;;  %s6770_s15 = smov 0   ;;  %s6772_s16 = smov 0  }
  0x43   :  { %s6774_s18 = smov 0   ;;  %s6776_s22 = smov 0  }
  0x44   :  { %s6778_s23 = smov 0   ;;  %s6780_s0 = smov 0  }
  0x45 LB: > { %s8440_s12 = sld [smem:[#allocation67_spill]]  ;;  %s6799_s26 = sadd.s32 4294967295, %s6548_s0   ;;  %s6532_s16 = sphi %s6772_s16, %s8494_s16   ;;  %s6528_s15 = sphi %s6770_s15, %s8491_s15   ;;  %s6548_s0 = sphi %s6780_s0, %s79_s0   ;;  %s6544_s23 = sphi %s6778_s23, %s8497_s23   ;;  %s6540_s22 = sphi %s6776_s22, %s8496_s22   ;;  %s6536_s18 = sphi %s6774_s18, %s8495_s18  }
  0x46   : > { %s8441_s8 = sld [smem:[#allocation55_spill]]  ;;  %s88_s28 = sadd.s32 1, %s6544_s23 }
  0x47   : > { %s8442_s6 = sld [smem:[#allocation68_spill]]  ;;  %p89_p0 = scmp.ge.s32.totalorder %s88_s28, 12 }
  0x48   : > { %s8443_s5 = sld [smem:[#allocation50_spill]]  ;;  %s260_s1 = sadd.s32 1, %s6536_s18 }
  0x49   : > { %s8444_s4 = sld [smem:[#allocation66_spill]]  ;;  %p267_p1 = scmp.ne.s32.totalorder %s6536_s18, %s6532_s16 }
  0x4a   : > { %s8445_s3 = sld [smem:[#allocation54_spill]]  ;;  %p268_p2 = scmp.eq.s32.totalorder %s6548_s0, 0 }
  0x4b   : > { %s8446_s17 = sld [smem:[#allocation53_spill]]  ;;  %s8499_s28 = smov (%p89_p0, %s88_s28), 0 }
  0x4c   : > { %s8447_s9 = sld [smem:[#allocation51_spill]]  ;;  %p6808_p3 = por %p268_p2, %p267_p1 }
  0x4d   : > { %8448 = sst [smem:[#allocation73_spill]] %s6532_s16  ;;  %p273_p4 = scmp.ne.s32.totalorder %s6532_s16, %s6528_s15 }
  0x4e   : > { %8449 = sst [smem:[#allocation74_spill]] %s6540_s22  ;;  %s257_s7 = ssub.s32 %s6544_s23, %s8499_s28 }
  0x4f   : > { %8450 = sst [smem:[#allocation75_spill]] %s6799_s26  ;;  %p274_p5 = scmp.eq.s32.totalorder %s6799_s26, 0 }
  0x50   : > { %8451 = sst [smem:[#allocation76_spill]] %s8499_s28  ;;  %p258_p6 = scmp.eq.s32.totalorder %s257_s7, 0 }
  0x51   : > { %p5136_p7 = scmp.ge.s32.totalorder %s6548_s0, 1  ;;  %p6819_p8 = por %p274_p5, %p273_p4 }
  0x52   : > { %p827_p9 = scmp.lt.s32.totalorder %s6548_s0, 13  ;;  %s858_s14 = sshll.u32 %s8447_s9, 4  ;;  %s859_s14 = int_to_ptr.hbm [resolvable:$true] %s858_s14 }
  0x53   : > { %s8453_s10 = scalar_select %p6819_p8, 1, 0 }
  0x54   : > { %s6825_s11 = scalar_select %p258_p6, %s6536_s18, %s260_s1  }
  0x55   : > { %8454 = sst [smem:[#allocation77_spill]] %s8453_s10  ;;  %p6827_p10 = pnand %p5136_p7, %p827_p9 }
  0x56   : > { %8455 = sst [smem:[#allocation78_spill]] %s6825_s11  ;;  %s6580_s15 = smov [#allocation6]  }
  0x57   : > { %s8456_s24 = scalar_select %p6827_p10, 1, 0 }
  0x58   : > { %p5349_p11 = pneg %p6827_p10  ;;  %s860_s7 = sshll.u32 %s6580_s15, 4  ;;  %s861_s7 = int_to_ptr.vmem [resolvable:$true] %s860_s7 }
  0x59   : > { %8457 = sst [smem:[#allocation79_spill]] %s8456_s24  ;;  %s892_s28 = sshll.u32 %s6638_s21, 4  ;;  %s6841_s28 = int_to_ptr.hbm [resolvable:$true] %s892_s28 }
  0x5a   : > { %p6837_p12 = pnand %p5349_p11, %p274_p5  ;;  %s6581_s1 = smov [#allocation9]  }
  0x5b   : > { %s6843_s11 = sshll.u32 %s6581_s1, 4  ;;  %s5670_s10 = sshra.s32 %s859_s14, 4  ;;  %s5671_s10 = int_to_ptr.hbm [resolvable:$true] %s5670_s10  ;;  %s895_s11 = int_to_ptr.vmem [resolvable:$true] %s6843_s11 }
  0x5c   : > { %s5672_s16 = scalar_lea.hbm %s5671_s10, 2  ;;  %p6847_p0 = pneg %p6837_p12 }
  0x5d   : > { %p5673_p13 = scmp.ne.s32.totalorder %s5671_s10, %s5672_s16  ;;  %s5677_s26 = scalar_lea.hbm %s8447_s9, 2 }
  0x5e   : > { %p5678_p4 = scmp.lt.s32.totalorder %s5671_s10, %s8447_s9  ;;  %p5679_p6 = scmp.lt.s32.totalorder %s5677_s26, %s5672_s16 }
  0x5f   : > { %p5675_p1 = pnand %p6847_p0, %p5673_p13 }
  0x60   : > { %p5680_p7 = por %p5679_p6, %p5678_p4 }
  0x61   : > { %p5676_p2 = pneg %p5675_p1 }
  0x63   : > { %p5681_p9 = pnand %p5680_p7, %p5676_p2 }
  0x65   : > { %5684 = shalt.err (!%p5681_p9)
}
  0x66   : > { %5355 = dma.hbm_to_vmem [thread:$0]  (!%p6837_p12), %s859_s14, 32, %s861_s7, [#allocation7]  }
  0x67   : > { %s5700_s1 = sshra.s32 %s6841_s28, 4  ;;  %s5707_s16 = scalar_lea.hbm %s6638_s21, 1  ;;  %s5701_s1 = int_to_ptr.hbm [resolvable:$true] %s5700_s1 }
  0x68   : > { %s5702_s24 = scalar_lea.hbm %s5701_s1, 1  ;;  %p5708_p4 = scmp.lt.s32.totalorder %s5701_s1, %s6638_s21 }
  0x69   : > { %p5703_p11 = scmp.ne.s32.totalorder %s5701_s1, %s5702_s24  ;;  %p5709_p2 = scmp.lt.s32.totalorder %s5707_s16, %s5702_s24 }
  0x6b   : > { %p5705_p13 = pnand %p5703_p11, %p6847_p0  ;;  %p5710_p6 = por %p5709_p2, %p5708_p4 }
  0x6d   : > { %p5706_p1 = pneg %p5705_p13 }
  0x6f   : > { %p5711_p7 = pnand %p5710_p6, %p5706_p1 }
  0x71   : > { %5714 = shalt.err (!%p5711_p7)
}
  0x72   : > { %5361 = dma.hbm_to_vmem [thread:$0]  (!%p6837_p12), %s6841_s28, 16, %s895_s11, [#allocation10]  }
  0x73   : > { %s877_s14 = sshll.u32 %s8446_s17, 4  ;;  %s6582_s26 = smov [#allocation8]   ;;  %s878_s14 = int_to_ptr.hbm [resolvable:$true] %s877_s14 }
  0x74   : > { %s879_s10 = sshll.u32 %s6582_s26, 4  ;;  %s903_s7 = sshll.u32 %s6643_s25, 4  ;;  %s880_s10 = int_to_ptr.vmem [resolvable:$true] %s879_s10  ;;  %s6868_s7 = int_to_ptr.hbm [resolvable:$true] %s903_s7 }
  0x75   : > { %s5730_s24 = sshra.s32 %s878_s14, 4  ;;  %s5737_s16 = scalar_lea.hbm %s8446_s17, 16  ;;  %s5731_s24 = int_to_ptr.hbm [resolvable:$true] %s5730_s24 }
  0x76   : > { %s5732_s1 = scalar_lea.hbm %s5731_s24, 16  ;;  %p5738_p1 = scmp.lt.s32.totalorder %s5731_s24, %s8446_s17 }
  0x77   : > { %p5733_p9 = scmp.ne.s32.totalorder %s5731_s24, %s5732_s1  ;;  %p5739_p4 = scmp.lt.s32.totalorder %s5737_s16, %s5732_s1 }
  0x79   : > { %p5735_p11 = pnand %p5733_p9, %p6847_p0  ;;  %p5740_p2 = por %p5739_p4, %p5738_p1 }
  0x7b   : > { %p5736_p13 = pneg %p5735_p11 }
  0x7d   : > { %p5741_p6 = pnand %p5740_p2, %p5736_p13 }
  0x7f   : > { %5744 = shalt.err (!%p5741_p6)
}
  0x80   : > { %s8394_s28 = smov 128   ;;  %s8396_s11 = smov 8  }
  0x81   : > { %5358 = dma.hbm_to_vmem [thread:$0]  (!%p6837_p12), %s878_s14, 256, %s880_s10, [#allocation7], %s8394_s28, %s8394_s28, %s8396_s11  }
  0x82   : > { %s918_s26 = sshll.u32 %s6648_s29, 4  ;;  %s6585_s9 = smov [#allocation11]   ;;  %s6880_s26 = int_to_ptr.hbm [resolvable:$true] %s918_s26 }
  0x83   : > { %s905_s24 = sshll.u32 %s6585_s9, 4  ;;  %s5760_s1 = sshra.s32 %s6868_s7, 4  ;;  %s906_s24 = int_to_ptr.vmem [resolvable:$true] %s905_s24  ;;  %s5761_s1 = int_to_ptr.hbm [resolvable:$true] %s5760_s1 }
  0x84   : > { %s5762_s16 = scalar_lea.hbm %s5761_s1, 48  ;;  %s5767_s17 = scalar_lea.hbm %s6643_s25, 48 }
  0x85   : > { %p5763_p7 = scmp.ne.s32.totalorder %s5761_s1, %s5762_s16  ;;  %p5768_p13 = scmp.lt.s32.totalorder %s5761_s1, %s6643_s25 }
  0x86   : > { %p5769_p1 = scmp.lt.s32.totalorder %s5767_s17, %s5762_s16 }
  0x87   : > { %p5765_p9 = pnand %p5763_p7, %p6847_p0 }
  0x88   : > { %p5770_p4 = por %p5769_p1, %p5768_p13 }
  0x89   : > { %p5766_p11 = pneg %p5765_p9 }
  0x8b   : > { %p5771_p2 = pnand %p5770_p4, %p5766_p11 }
  0x8d   : > { %5774 = shalt.err (!%p5771_p2)
}
  0x8e   : > { %5364 = dma.hbm_to_vmem [thread:$0]  (!%p6837_p12), %s6868_s7, 768, %s906_s24, [#allocation10], %s8394_s28, %s8394_s28, %s8396_s11  }
  0x8f   : > { %s6586_s9 = smov [#allocation12]   ;;  %s968_s10 = sshll.u32 %s6728_s13, 4  ;;  %s6894_s10 = int_to_ptr.hbm [resolvable:$true] %s968_s10 }
  0x90   : > { %s920_s14 = sshll.u32 %s6586_s9, 4  ;;  %s5790_s17 = sshra.s32 %s6880_s26, 4  ;;  %s921_s14 = int_to_ptr.vmem [resolvable:$true] %s920_s14  ;;  %s5791_s17 = int_to_ptr.hbm [resolvable:$true] %s5790_s17 }
  0x91   : > { %s5792_s1 = scalar_lea.hbm %s5791_s17, 1  ;;  %s5797_s16 = scalar_lea.hbm %s6648_s29, 1 }
  0x92   : > { %p5793_p6 = scmp.ne.s32.totalorder %s5791_s17, %s5792_s1  ;;  %p5798_p11 = scmp.lt.s32.totalorder %s5791_s17, %s6648_s29 }
  0x93   : > { %p5799_p13 = scmp.lt.s32.totalorder %s5797_s16, %s5792_s1 }
  0x94   : > { %p5795_p7 = pnand %p5793_p6, %p6847_p0 }
  0x95   : > { %p5800_p1 = por %p5799_p13, %p5798_p11 }
  0x96   : > { %p5796_p9 = pneg %p5795_p7 }
  0x98   : > { %p5801_p4 = pnand %p5800_p1, %p5796_p9 }
  0x9a   : > { %5804 = shalt.err (!%p5801_p4)
}
  0x9b   : > { %5367 = dma.hbm_to_vmem [thread:$0]  (!%p6837_p12), %s6880_s26, 16, %s921_s14, [#allocation13]  }
  0x9c   : > { %s994_s7 = sshll.u32 %s8442_s6, 4  ;;  %s6587_s24 = smov [#allocation29]   ;;  %s6905_s7 = int_to_ptr.hbm [resolvable:$true] %s994_s7 }
  0x9d   : > { %s970_s9 = sshll.u32 %s6587_s24, 4  ;;  %s5820_s17 = sshra.s32 %s6894_s10, 4  ;;  %s971_s9 = int_to_ptr.vmem [resolvable:$true] %s970_s9  ;;  %s5821_s17 = int_to_ptr.hbm [resolvable:$true] %s5820_s17 }
  0x9e   : > { %s5822_s1 = scalar_lea.hbm %s5821_s17, 1  ;;  %s5827_s16 = scalar_lea.hbm %s6728_s13, 1 }
  0x9f   : > { %p5823_p2 = scmp.ne.s32.totalorder %s5821_s17, %s5822_s1  ;;  %p5828_p9 = scmp.lt.s32.totalorder %s5821_s17, %s6728_s13 }
  0xa0   : > { %p5829_p11 = scmp.lt.s32.totalorder %s5827_s16, %s5822_s1 }
  0xa1   : > { %p5825_p6 = pnand %p5823_p2, %p6847_p0 }
  0xa2   : > { %p5830_p13 = por %p5829_p11, %p5828_p9 }
  0xa3   : > { %p5826_p7 = pneg %p5825_p6 }
  0xa5   : > { %p5831_p1 = pnand %p5830_p13, %p5826_p7 }
  0xa7   : > { %5834 = shalt.err (!%p5831_p1)
}
  0xa8   : > { %5379 = dma.hbm_to_vmem [thread:$0]  (!%p6837_p12), %s6894_s10, 16, %s971_s9, [#allocation30]  }
  0xa9   : > { %s6588_s26 = smov [#allocation32]   ;;  %s5850_s24 = sshra.s32 %s6905_s7, 4  ;;  %s5851_s24 = int_to_ptr.hbm [resolvable:$true] %s5850_s24 }
  0xaa   : > { %s996_s14 = sshll.u32 %s6588_s26, 4  ;;  %s5852_s28 = scalar_lea.hbm %s5851_s24, 1  ;;  %s997_s14 = int_to_ptr.vmem [resolvable:$true] %s996_s14 }
  0xab   : > { %p5853_p4 = scmp.ne.s32.totalorder %s5851_s24, %s5852_s28  ;;  %s5857_s17 = scalar_lea.hbm %s8442_s6, 1 }
  0xac   : > { %p5858_p7 = scmp.lt.s32.totalorder %s5851_s24, %s8442_s6  ;;  %p5859_p9 = scmp.lt.s32.totalorder %s5857_s17, %s5852_s28 }
  0xad   : > { %p5855_p2 = pnand %p5853_p4, %p6847_p0 }
  0xae   : > { %p5860_p11 = por %p5859_p9, %p5858_p7 }
  0xaf   : > { %p5856_p6 = pneg %p5855_p2 }
  0xb1   : > { %p5861_p13 = pnand %p5860_p11, %p5856_p6 }
  0xb3   : > { %5864 = shalt.err (!%p5861_p13)
}
  0xb4   : > { %5385 = dma.hbm_to_vmem [thread:$0]  (!%p6837_p12), %s6905_s7, 16, %s997_s14, [#allocation33]  }
  0xb5   : > { %s841_s10 = sshll.u32 %s8443_s5, 4  ;;  %s6589_s9 = smov [#allocation3]   ;;  %s842_s10 = int_to_ptr.hbm [resolvable:$true] %s841_s10 }
  0xb6   : > { %s843_s1 = sshll.u32 %s6589_s9, 4  ;;  %s930_s16 = sshll.u32 %s6713_s20, 4  ;;  %s844_s1 = int_to_ptr.vmem [resolvable:$true] %s843_s1  ;;  %s931_s16 = int_to_ptr.hbm [resolvable:$true] %s930_s16 }
  0xb7   : > { %s5880_s26 = sshra.s32 %s842_s10, 4  ;;  %s5887_s24 = scalar_lea.hbm %s8443_s5, 16  ;;  %s5881_s26 = int_to_ptr.hbm [resolvable:$true] %s5880_s26 }
  0xb8   : > { %s5882_s28 = scalar_lea.hbm %s5881_s26, 16  ;;  %p5888_p6 = scmp.lt.s32.totalorder %s5881_s26, %s8443_s5 }
  0xb9   : > { %p5883_p1 = scmp.ne.s32.totalorder %s5881_s26, %s5882_s28  ;;  %p5889_p7 = scmp.lt.s32.totalorder %s5887_s24, %s5882_s28 }
  0xbb   : > { %p5885_p4 = pnand %p5883_p1, %p6847_p0  ;;  %p5890_p9 = por %p5889_p7, %p5888_p6 }
  0xbd   : > { %p5886_p2 = pneg %p5885_p4 }
  0xbf   : > { %p5891_p11 = pnand %p5890_p9, %p5886_p2 }
  0xc1   : > { %5894 = shalt.err (!%p5891_p11)
}
  0xc2   : > { %s8460_s7 = smov 128   ;;  %s6590_s14 = smov [#allocation26]  }
  0xc3   : > { %5352 = dma.hbm_to_vmem [thread:$0]  (!%p6837_p12), %s842_s10, 256, %s844_s1, [#allocation4], %s8460_s7, %s8460_s7, %s8396_s11  }
  0xc4   : > { %s932_s17 = sshll.u32 %s6590_s14, 4  ;;  %s942_s9 = sshll.u32 %s6718_s27, 4  ;;  %s933_s17 = int_to_ptr.vmem [resolvable:$true] %s932_s17  ;;  %s6935_s9 = int_to_ptr.hbm [resolvable:$true] %s942_s9 }
  0xc5   : > { %s5910_s26 = sshra.s32 %s931_s16, 4  ;;  %s5917_s24 = scalar_lea.hbm %s6713_s20, 4  ;;  %s5911_s26 = int_to_ptr.hbm [resolvable:$true] %s5910_s26 }
  0xc6   : > { %s5912_s28 = scalar_lea.hbm %s5911_s26, 4  ;;  %p5918_p2 = scmp.lt.s32.totalorder %s5911_s26, %s6713_s20 }
  0xc7   : > { %p5913_p13 = scmp.ne.s32.totalorder %s5911_s26, %s5912_s28  ;;  %p5919_p6 = scmp.lt.s32.totalorder %s5917_s24, %s5912_s28 }
  0xc9   : > { %p5915_p1 = pnand %p5913_p13, %p6847_p0  ;;  %p5920_p7 = por %p5919_p6, %p5918_p2 }
  0xcb   : > { %p5916_p4 = pneg %p5915_p1 }
  0xcd   : > { %p5921_p9 = pnand %p5920_p7, %p5916_p4 }
  0xcf   : > { %5924 = shalt.err (!%p5921_p9)
}
  0xd0   : > { %5370 = dma.hbm_to_vmem [thread:$0]  (!%p6837_p12), %s931_s16, 64, %s933_s17, [#allocation7]  }
  0xd1   : > { %s953_s10 = sshll.u32 %s8444_s4, 4  ;;  %s6591_s1 = smov [#allocation27]   ;;  %s6944_s10 = int_to_ptr.hbm [resolvable:$true] %s953_s10 }
  0xd2   : > { %s944_s14 = sshll.u32 %s6591_s1, 4  ;;  %s5940_s11 = sshra.s32 %s6935_s9, 4  ;;  %s945_s14 = int_to_ptr.vmem [resolvable:$true] %s944_s14  ;;  %s5941_s11 = int_to_ptr.hbm [resolvable:$true] %s5940_s11 }
  0xd3   : > { %s5942_s26 = scalar_lea.hbm %s5941_s11, 1  ;;  %s5947_s28 = scalar_lea.hbm %s6718_s27, 1 }
  0xd4   : > { %p5943_p11 = scmp.ne.s32.totalorder %s5941_s11, %s5942_s26  ;;  %p5948_p4 = scmp.lt.s32.totalorder %s5941_s11, %s6718_s27 }
  0xd5   : > { %p5949_p2 = scmp.lt.s32.totalorder %s5947_s28, %s5942_s26 }
  0xd6   : > { %p5945_p13 = pnand %p5943_p11, %p6847_p0 }
  0xd7   : > { %p5950_p6 = por %p5949_p2, %p5948_p4 }
  0xd8   : > { %p5946_p1 = pneg %p5945_p13 }
  0xda   : > { %p5951_p7 = pnand %p5950_p6, %p5946_p1 }
  0xdc   : > { %5954 = shalt.err (!%p5951_p7)
}
  0xdd   : > { %5373 = dma.hbm_to_vmem [thread:$0]  (!%p6837_p12), %s6935_s9, 16, %s945_s14, [#allocation10]  }
  0xde   : > { %s6592_s16 = smov [#allocation28]   ;;  %s979_s24 = sshll.u32 %s8440_s12, 4  ;;  %s6955_s24 = int_to_ptr.hbm [resolvable:$true] %s979_s24 }
  0xdf   : > { %s955_s17 = sshll.u32 %s6592_s16, 4  ;;  %s5970_s11 = sshra.s32 %s6944_s10, 4  ;;  %s956_s17 = int_to_ptr.vmem [resolvable:$true] %s955_s17  ;;  %s5971_s11 = int_to_ptr.hbm [resolvable:$true] %s5970_s11 }
  0xe0   : > { %s5972_s1 = scalar_lea.hbm %s5971_s11, 24  ;;  %s5977_s26 = scalar_lea.hbm %s8444_s4, 24 }
  0xe1   : > { %p5973_p9 = scmp.ne.s32.totalorder %s5971_s11, %s5972_s1  ;;  %p5978_p1 = scmp.lt.s32.totalorder %s5971_s11, %s8444_s4 }
  0xe2   : > { %p5979_p4 = scmp.lt.s32.totalorder %s5977_s26, %s5972_s1 }
  0xe3   : > { %p5975_p11 = pnand %p5973_p9, %p6847_p0 }
  0xe4   : > { %p5980_p2 = por %p5979_p4, %p5978_p1 }
  0xe5   : > { %p5976_p13 = pneg %p5975_p11 }
  0xe7   : > { %p5981_p6 = pnand %p5980_p2, %p5976_p13 }
  0xe9   : > { %5984 = shalt.err (!%p5981_p6)
}
  0xea   : > { %s8461_s9 = smov 8   ;;  %s1012_s14 = sshll.u32 %s6753_s19, 4  ;;  %s6969_s14 = int_to_ptr.hbm [resolvable:$true] %s1012_s14 }
  0xeb   : > { %5376 = dma.hbm_to_vmem [thread:$0]  (!%p6837_p12), %s6944_s10, 384, %s956_s17, [#allocation13], %s8460_s7, %s8460_s7, %s8461_s9  }
  0xec   : > { %s6593_s28 = smov [#allocation31]   ;;  %s6000_s11 = sshra.s32 %s6955_s24, 4  ;;  %s6001_s11 = int_to_ptr.hbm [resolvable:$true] %s6000_s11 }
  0xed   : > { %s981_s16 = sshll.u32 %s6593_s28, 4  ;;  %s6002_s1 = scalar_lea.hbm %s6001_s11, 64  ;;  %s982_s16 = int_to_ptr.vmem [resolvable:$true] %s981_s16 }
  0xee   : > { %p6003_p7 = scmp.ne.s32.totalorder %s6001_s11, %s6002_s1  ;;  %s6007_s26 = scalar_lea.hbm %s8440_s12, 64 }
  0xef   : > { %p6008_p13 = scmp.lt.s32.totalorder %s6001_s11, %s8440_s12  ;;  %p6009_p1 = scmp.lt.s32.totalorder %s6007_s26, %s6002_s1 }
  0xf0   : > { %p6005_p9 = pnand %p6003_p7, %p6847_p0 }
  0xf1   : > { %p6010_p4 = por %p6009_p1, %p6008_p13 }
  0xf2   : > { %p6006_p11 = pneg %p6005_p9 }
  0xf4   : > { %p6011_p2 = pnand %p6010_p4, %p6006_p11 }
  0xf6   : > { %6014 = shalt.err (!%p6011_p2)
}
  0xf7   : > { %5382 = dma.hbm_to_vmem [thread:$0]  (!%p6837_p12), %s6955_s24, 1024, %s982_s16, [#allocation30], %s8460_s7, %s8460_s7, %s8461_s9  }
  0xf8   : > { %s6594_s10 = smov [#allocation34]   ;;  %s1027_s28 = sshll.u32 %s6763_s30, 4  ;;  %s1028_s28 = int_to_ptr.hbm [resolvable:$true] %s1027_s28 }
  0xf9   : > { %s1014_s17 = sshll.u32 %s6594_s10, 4  ;;  %s6030_s11 = sshra.s32 %s6969_s14, 4  ;;  %s1015_s17 = int_to_ptr.vmem [resolvable:$true] %s1014_s17  ;;  %s6031_s11 = int_to_ptr.hbm [resolvable:$true] %s6030_s11 }
  0xfa   : > { %s6032_s1 = scalar_lea.hbm %s6031_s11, 1  ;;  %s6037_s26 = scalar_lea.hbm %s6753_s19, 1 }
  0xfb   : > { %p6033_p6 = scmp.ne.s32.totalorder %s6031_s11, %s6032_s1  ;;  %p6038_p11 = scmp.lt.s32.totalorder %s6031_s11, %s6753_s19 }
  0xfc   : > { %p6039_p13 = scmp.lt.s32.totalorder %s6037_s26, %s6032_s1 }
  0xfd   : > { %p6035_p7 = pnand %p6033_p6, %p6847_p0 }
  0xfe   : > { %p6040_p1 = por %p6039_p13, %p6038_p11 }
  0xff   : > { %p6036_p9 = pneg %p6035_p7 }
 0x101   : > { %p6041_p4 = pnand %p6040_p1, %p6036_p9 }
 0x103   : > { %6044 = shalt.err (!%p6041_p4)
}
 0x104   : > { %5388 = dma.hbm_to_vmem [thread:$0]  (!%p6837_p12), %s6969_s14, 16, %s1015_s17, [#allocation33]  }
 0x105   : > { %s6595_s7 = smov [#allocation35]   ;;  %s6060_s9 = sshra.s32 %s1028_s28, 4  ;;  %s6061_s9 = int_to_ptr.hbm [resolvable:$true] %s6060_s9 }
 0x106   : > { %s1029_s24 = sshll.u32 %s6595_s7, 4  ;;  %s6062_s16 = scalar_lea.hbm %s6061_s9, 1  ;;  %s1030_s24 = int_to_ptr.vmem [resolvable:$true] %s1029_s24 }
 0x107   : > { %p6063_p2 = scmp.ne.s32.totalorder %s6061_s9, %s6062_s16  ;;  %s6067_s10 = scalar_lea.hbm %s6763_s30, 1 }
 0x108   : > { %p6068_p9 = scmp.lt.s32.totalorder %s6061_s9, %s6763_s30  ;;  %p6069_p11 = scmp.lt.s32.totalorder %s6067_s10, %s6062_s16 }
 0x109   : > { %p6065_p6 = pnand %p6063_p2, %p6847_p0 }
 0x10a   : > { %p6070_p13 = por %p6069_p11, %p6068_p9 }
 0x10b   : > { %p6066_p7 = pneg %p6065_p6 }
 0x10d   : > { %p6071_p1 = pnand %p6070_p13, %p6066_p7 }
 0x10f   : > { %6074 = shalt.err (!%p6071_p1)
}
 0x110   : > { %5391 = dma.hbm_to_vmem [thread:$0]  (!%p6837_p12), %s1028_s28, 16, %s1030_s24, [#allocation36]  }
 0x111   : > { %p5152_p4 = scmp.ge.s32.totalorder %s6548_s0, 12 }
 0x112   : > { %s1040_s14 = sand.u32 (!%p5152_p4), 1, %s6548_s0   ;;  %s7000_s15 = sand.u32 (!%p5152_p4), 1, %s6536_s18  }
 0x113   : > { %1036 = sbr.rel (%p5152_p4) target bundleno = 501 (0x1f5), region = 88  ;;  %s7006_s24 = scalar_lea.sflag (!%p5152_p4), [#allocation4], %s1040_s14 }
 0x114   : > { %s5259_s17 = smul.u32 (!%p5152_p4), 384, %s7000_s15  ;;  %s6096_s10 = scalar_lea.hbm (!%p5152_p4), %s8445_s3, 4608 }
 0x115   : > { %s5260_s11 = smul.u32 (!%p5152_p4), 384, %s6544_s23 }
 0x116   : > { %s1044_s22 = scalar_lea.vmem (!%p5152_p4), [#allocation14], %s5259_s17  ;;  %s5261_s7 = smul.u32 (!%p5152_p4), 3, %s7000_s15 }
 0x117   : > { %s1049_s1 = scalar_lea.hbm (!%p5152_p4), %s8445_s3, %s5260_s11  ;;  %s1052_s28 = sshll.u32 (!%p5152_p4), %s1044_s22, 4  ;;  %s1053_s28 = int_to_ptr.vmem [resolvable:$true] %s1052_s28 }
 0x118   : > { %s1050_s26 = sshll.u32 %s1049_s1, 4  ;;  %s1051_s26 = int_to_ptr.hbm [resolvable:$true] %s1050_s26 }
 0x119   : > { %s6090_s9 = sshra.s32 %s1051_s26, 4  ;;  %s6091_s9 = int_to_ptr.hbm [resolvable:$true] %s6090_s9 }
 0x11a   : > { %s6092_s16 = scalar_lea.hbm %s6091_s9, 384  ;;  %p6097_p6 = scmp.lt.s32.totalorder %s6091_s9, %s8445_s3 }
 0x11b   : > { %p6093_p12 = scmp.ne.s32.totalorder %s6091_s9, %s6092_s16  ;;  %p6098_p7 = scmp.lt.s32.totalorder %s6096_s10, %s6092_s16 }
 0x11d   : > { %p6094_p0 = pnand %p6093_p12, %p6808_p3  ;;  %p6099_p9 = por %p6098_p7, %p6097_p6 }
 0x11f   : > { %p6095_p2 = pneg %p6094_p0 }
 0x121   : > { %p6100_p11 = pnand %p6099_p9, %p6095_p2 }
 0x123   : > { %6103 = shalt.err (!%p6100_p11)
}
 0x124   : > { %s6596_s17 = smov 384   ;;  %s6597_s14 = smov 24  }
 0x125   : > { %5293 = dma.hbm_to_vmem [thread:$0]  (%p6808_p3), %s1051_s26, 6144, %s1053_s28, %s7006_s24, %s6596_s17, %s6596_s17, %s6597_s14  }
 0x126   : > { %s5262_s11 = smul.u32 3, %s6544_s23  ;;  %s1066_s1 = scalar_lea.vmem [#allocation15], %s5261_s7 }
 0x127   : > { %s1074_s22 = sshll.u32 %s1066_s1, 4  ;;  %s5154_s9 = sshll.u32 %s7000_s15, 7  ;;  %s1075_s22 = int_to_ptr.vmem [resolvable:$true] %s1074_s22 }
 0x128   : > { %s1070_s16 = scalar_lea.hbm %s8441_s8, %s5262_s11  ;;  %s5248_s3 = sshll.u32 %s6544_s23, 7 }
 0x129   : > { %s1072_s10 = sshll.u32 %s1070_s16, 4  ;;  %s6124_s6 = scalar_lea.hbm %s8441_s8, 36  ;;  %s1073_s10 = int_to_ptr.hbm [resolvable:$true] %s1072_s10 }
 0x12a   : > { %s6118_s4 = sshra.s32 %s1073_s10, 4  ;;  %s6119_s4 = int_to_ptr.hbm [resolvable:$true] %s6118_s4 }
 0x12b   : > { %s6120_s5 = scalar_lea.hbm %s6119_s4, 3  ;;  %p6125_p12 = scmp.lt.s32.totalorder %s6119_s4, %s8441_s8 }
 0x12c   : > { %p6121_p13 = scmp.ne.s32.totalorder %s6119_s4, %s6120_s5  ;;  %p6126_p0 = scmp.lt.s32.totalorder %s6124_s6, %s6120_s5 }
 0x12e   : > { %p6122_p1 = pnand %p6121_p13, %p6808_p3  ;;  %p6127_p2 = por %p6126_p0, %p6125_p12 }
 0x130   : > { %p6123_p4 = pneg %p6122_p1 }
 0x132   : > { %p6128_p6 = pnand %p6127_p2, %p6123_p4 }
 0x134   : > { %6131 = shalt.err (!%p6128_p6)
}
 0x135   : > { %s8462_s28 = sld [smem:[#allocation56_spill]]  ;;  %s1085_s7 = scalar_lea.vmem [#allocation16], %s5154_s9 }
 0x136   : > { %5294 = dma.hbm_to_vmem [thread:$0]  (%p6808_p3), %s1073_s10, 48, %s1075_s22, %s7006_s24  }
 0x137   : > { %s1093_s17 = sshll.u32 %s1085_s7, 4  ;;  %s1094_s17 = int_to_ptr.vmem [resolvable:$true] %s1093_s17 }
 0x13b   : > { %s1090_s26 = scalar_lea.hbm %s8462_s28, %s5248_s3  ;;  %s6152_s6 = scalar_lea.hbm %s8462_s28, 1536 }
 0x13c   : > { %s1091_s14 = sshll.u32 %s1090_s26, 4  ;;  %s1092_s14 = int_to_ptr.hbm [resolvable:$true] %s1091_s14 }
 0x13d   : > { %s6146_s11 = sshra.s32 %s1092_s14, 4  ;;  %s6147_s11 = int_to_ptr.hbm [resolvable:$true] %s6146_s11 }
 0x13e   : > { %s6148_s5 = scalar_lea.hbm %s6147_s11, 128  ;;  %p6153_p13 = scmp.lt.s32.totalorder %s6147_s11, %s8462_s28 }
 0x13f   : > { %p6149_p7 = scmp.ne.s32.totalorder %s6147_s11, %s6148_s5  ;;  %p6154_p1 = scmp.lt.s32.totalorder %s6152_s6, %s6148_s5 }
 0x141   : > { %p6150_p9 = pnand %p6149_p7, %p6808_p3  ;;  %p6155_p4 = por %p6154_p1, %p6153_p13 }
 0x143   : > { %p6151_p11 = pneg %p6150_p9 }
 0x145   : > { %p6156_p12 = pnand %p6155_p4, %p6151_p11 }
 0x147   : > { %6159 = shalt.err (!%p6156_p12)
}
 0x148   : > { %s8403_s4 = smov 128   ;;  %s8463_s3 = sld [smem:[#allocation57_spill]] }
 0x149   : > { %s8402_s1 = smov 8   ;;  %s1106_s9 = scalar_lea.vmem [#allocation17], %s7000_s15 }
 0x14a   : > { %5295 = dma.hbm_to_vmem [thread:$0]  (%p6808_p3), %s1092_s14, 2048, %s1094_s17, %s7006_s24, %s8403_s4, %s8403_s4, %s8402_s1  }
 0x14b   : > { %s1113_s16 = sshll.u32 %s1106_s9, 4  ;;  %s1114_s16 = int_to_ptr.vmem [resolvable:$true] %s1113_s16 }
 0x14e   : > { %s1109_s22 = scalar_lea.hbm %s8463_s3, %s6544_s23  ;;  %s6180_s11 = scalar_lea.hbm %s8463_s3, 12 }
 0x14f   : > { %s1111_s10 = sshll.u32 %s1109_s22, 4  ;;  %s1112_s10 = int_to_ptr.hbm [resolvable:$true] %s1111_s10 }
 0x150   : > { %s6174_s26 = sshra.s32 %s1112_s10, 4  ;;  %s6175_s26 = int_to_ptr.hbm [resolvable:$true] %s6174_s26 }
 0x151   : > { %s6176_s7 = scalar_lea.hbm %s6175_s26, 1  ;;  %p6181_p7 = scmp.lt.s32.totalorder %s6175_s26, %s8463_s3 }
 0x152   : > { %p6177_p0 = scmp.ne.s32.totalorder %s6175_s26, %s6176_s7  ;;  %p6182_p9 = scmp.lt.s32.totalorder %s6180_s11, %s6176_s7 }
 0x154   : > { %p6178_p2 = pnand %p6177_p0, %p6808_p3  ;;  %p6183_p11 = por %p6182_p9, %p6181_p7 }
 0x156   : > { %p6179_p6 = pneg %p6178_p2 }
 0x158   : > { %p6184_p13 = pnand %p6183_p11, %p6179_p6 }
 0x15a   : > { %6187 = shalt.err (!%p6184_p13)
}
 0x15b   : > { %s8464_s17 = sld [smem:[#allocation58_spill]]  ;;  %s1123_s5 = scalar_lea.vmem [#allocation18], %s7000_s15 }
 0x15c   : > { %5296 = dma.hbm_to_vmem [thread:$0]  (%p6808_p3), %s1112_s10, 16, %s1114_s16, %s7006_s24  }
 0x15d   : > { %s1130_s6 = sshll.u32 %s1123_s5, 4  ;;  %s1131_s6 = int_to_ptr.vmem [resolvable:$true] %s1130_s6 }
 0x161   : > { %s1126_s14 = scalar_lea.hbm %s8464_s17, %s6544_s23  ;;  %s6208_s7 = scalar_lea.hbm %s8464_s17, 12 }
 0x162   : > { %s1128_s22 = sshll.u32 %s1126_s14, 4  ;;  %s1129_s22 = int_to_ptr.hbm [resolvable:$true] %s1128_s22 }
 0x163   : > { %s6202_s9 = sshra.s32 %s1129_s22, 4  ;;  %s6203_s9 = int_to_ptr.hbm [resolvable:$true] %s6202_s9 }
 0x164   : > { %s6204_s26 = scalar_lea.hbm %s6203_s9, 1  ;;  %p6209_p0 = scmp.lt.s32.totalorder %s6203_s9, %s8464_s17 }
 0x165   : > { %p6205_p1 = scmp.ne.s32.totalorder %s6203_s9, %s6204_s26  ;;  %p6210_p2 = scmp.lt.s32.totalorder %s6208_s7, %s6204_s26 }
 0x167   : > { %p6206_p4 = pnand %p6205_p1, %p6808_p3  ;;  %p6211_p6 = por %p6210_p2, %p6209_p0 }
 0x169   : > { %p6207_p12 = pneg %p6206_p4 }
 0x16b   : > { %p6212_p7 = pnand %p6211_p6, %p6207_p12 }
 0x16d   : > { %6215 = shalt.err (!%p6212_p7)
}
 0x16e   : > { %s8465_s16 = sld [smem:[#allocation59_spill]]  ;;  %s1140_s14 = scalar_lea.vmem [#allocation19], %s7000_s15 }
 0x16f   : > { %5297 = dma.hbm_to_vmem [thread:$0]  (%p6808_p3), %s1129_s22, 16, %s1131_s6, %s7006_s24  }
 0x170   : > { %s1147_s5 = sshll.u32 %s1140_s14, 4  ;;  %s8406_s9 = sshll.u32 %s7000_s15, 11  ;;  %s1148_s5 = int_to_ptr.vmem [resolvable:$true] %s1147_s5 }
 0x174   : > { %s8466_s10 = smov %s8465_s16  ;;  %s1143_s11 = scalar_lea.hbm %s8465_s16, %s6544_s23 }
 0x175   : > { %s1145_s1 = sshll.u32 %s1143_s11, 4  ;;  %s6236_s4 = scalar_lea.hbm %s8466_s10, 12  ;;  %s1146_s1 = int_to_ptr.hbm [resolvable:$true] %s1145_s1 }
 0x176   : > { %s6230_s26 = sshra.s32 %s1146_s1, 4  ;;  %s6231_s26 = int_to_ptr.hbm [resolvable:$true] %s6230_s26 }
 0x177   : > { %s6232_s7 = scalar_lea.hbm %s6231_s26, 1  ;;  %p6237_p1 = scmp.lt.s32.totalorder %s6231_s26, %s8466_s10 }
 0x178   : > { %p6233_p9 = scmp.ne.s32.totalorder %s6231_s26, %s6232_s7  ;;  %p6238_p4 = scmp.lt.s32.totalorder %s6236_s4, %s6232_s7 }
 0x17a   : > { %p6234_p11 = pnand %p6233_p9, %p6808_p3  ;;  %p6239_p12 = por %p6238_p4, %p6237_p1 }
 0x17c   : > { %p6235_p13 = pneg %p6234_p11 }
 0x17e   : > { %p6240_p0 = pnand %p6239_p12, %p6235_p13 }
 0x180   : > { %6243 = shalt.err (!%p6240_p0)
}
 0x181   : > { %s8467_s6 = sld [smem:[#allocation60_spill]]  ;;  %s8407_s22 = sshll.u32 %s6544_s23, 11 }
 0x182   : > { %5298 = dma.hbm_to_vmem [thread:$0]  (%p6808_p3), %s1146_s1, 16, %s1148_s5, %s7006_s24  }
 0x183   : > { %s1158_s11 = scalar_lea.vmem [#allocation20], %s8406_s9 }
 0x184   : > { %s1166_s4 = sshll.u32 %s1158_s11, 4  ;;  %s1167_s4 = int_to_ptr.vmem [resolvable:$true] %s1166_s4 }
 0x187   : > { %s1163_s16 = scalar_lea.hbm %s8467_s6, %s8407_s22  ;;  %s6264_s3 = scalar_lea.hbm %s8467_s6, 24576 }
 0x188   : > { %s1164_s14 = sshll.u32 %s1163_s16, 4  ;;  %s1165_s14 = int_to_ptr.hbm [resolvable:$true] %s1164_s14 }
 0x189   : > { %s6258_s26 = sshra.s32 %s1165_s14, 4  ;;  %s6259_s26 = int_to_ptr.hbm [resolvable:$true] %s6258_s26 }
 0x18a   : > { %s6260_s7 = scalar_lea.hbm %s6259_s26, 2048  ;;  %p6265_p9 = scmp.lt.s32.totalorder %s6259_s26, %s8467_s6 }
 0x18b   : > { %p6261_p2 = scmp.ne.s32.totalorder %s6259_s26, %s6260_s7  ;;  %p6266_p11 = scmp.lt.s32.totalorder %s6264_s3, %s6260_s7 }
 0x18d   : > { %p6262_p6 = pnand %p6261_p2, %p6808_p3  ;;  %p6267_p13 = por %p6266_p11, %p6265_p9 }
 0x18f   : > { %p6263_p7 = pneg %p6262_p6 }
 0x191   : > { %p6268_p1 = pnand %p6267_p13, %p6263_p7 }
 0x193   : > { %6271 = shalt.err (!%p6268_p1)
}
 0x194   : > { %s6600_s1 = smov 2048   ;;  %s8468_s5 = smov 128  }
 0x195   : > { %s8469_s16 = sld [smem:[#allocation61_spill]]  ;;  %s5160_s9 = sshll.u32 %s7000_s15, 4 }
 0x196   : > { %5299 = dma.hbm_to_vmem [thread:$0]  (%p6808_p3), %s1165_s14, 32768, %s1167_s4, %s7006_s24, %s6600_s1, %s6600_s1, %s8468_s5  }
 0x197   : > { %s5161_s22 = sshll.u32 %s6544_s23, 4  ;;  %s1180_s3 = scalar_lea.vmem [#allocation21], %s5160_s9 }
 0x198   : > { %s1188_s7 = sshll.u32 %s1180_s3, 4  ;;  %s1189_s7 = int_to_ptr.vmem [resolvable:$true] %s1188_s7 }
 0x19b   : > { %s8470_s11 = smov %s8469_s16  ;;  %s1184_s8 = scalar_lea.hbm %s8469_s16, %s5161_s22 }
 0x19c   : > { %s1186_s26 = sshll.u32 %s1184_s8, 4  ;;  %s6292_s12 = scalar_lea.hbm %s8470_s11, 192  ;;  %s1187_s26 = int_to_ptr.hbm [resolvable:$true] %s1186_s26 }
 0x19d   : > { %s6286_s6 = sshra.s32 %s1187_s26, 4  ;;  %s6287_s6 = int_to_ptr.hbm [resolvable:$true] %s6286_s6 }
 0x19e   : > { %s6288_s10 = scalar_lea.hbm %s6287_s6, 16  ;;  %p6293_p2 = scmp.lt.s32.totalorder %s6287_s6, %s8470_s11 }
 0x19f   : > { %p6289_p4 = scmp.ne.s32.totalorder %s6287_s6, %s6288_s10  ;;  %p6294_p6 = scmp.lt.s32.totalorder %s6292_s12, %s6288_s10 }
 0x1a1   : > { %p6290_p12 = pnand %p6289_p4, %p6808_p3  ;;  %p6295_p7 = por %p6294_p6, %p6293_p2 }
 0x1a3   : > { %p6291_p0 = pneg %p6290_p12 }
 0x1a5   : > { %p6296_p9 = pnand %p6295_p7, %p6291_p0 }
 0x1a7   : > { %6299 = shalt.err (!%p6296_p9)
}
 0x1a8   : > { %s8471_s8 = sld [smem:[#allocation62_spill]]  ;;  %s8472_s9 = sshll.u32 %s6544_s23, 11 }
 0x1a9   : > { %5300 = dma.hbm_to_vmem [thread:$0]  (%p6808_p3), %s1187_s26, 256, %s1189_s7, %s7006_s24  }
 0x1aa   : > { %s8473_s14 = sshll.u32 %s7000_s15, 11 }
 0x1ab   : > { %s1199_s1 = scalar_lea.vmem [#allocation22], %s8473_s14 }
 0x1ac   : > { %s1207_s6 = sshll.u32 %s1199_s1, 4  ;;  %s1208_s6 = int_to_ptr.vmem [resolvable:$true] %s1207_s6 }
 0x1ae   : > { %s1204_s22 = scalar_lea.hbm %s8471_s8, %s8472_s9  ;;  %s6320_s16 = scalar_lea.hbm %s8471_s8, 24576 }
 0x1af   : > { %s1205_s4 = sshll.u32 %s1204_s22, 4  ;;  %s1206_s4 = int_to_ptr.hbm [resolvable:$true] %s1205_s4 }
 0x1b0   : > { %s6314_s12 = sshra.s32 %s1206_s4, 4  ;;  %s6315_s12 = int_to_ptr.hbm [resolvable:$true] %s6314_s12 }
 0x1b1   : > { %s6316_s10 = scalar_lea.hbm %s6315_s12, 2048  ;;  %p6321_p4 = scmp.lt.s32.totalorder %s6315_s12, %s8471_s8 }
 0x1b2   : > { %p6317_p11 = scmp.ne.s32.totalorder %s6315_s12, %s6316_s10  ;;  %p6322_p12 = scmp.lt.s32.totalorder %s6320_s16, %s6316_s10 }
 0x1b4   : > { %p6318_p13 = pnand %p6317_p11, %p6808_p3  ;;  %p6323_p0 = por %p6322_p12, %p6321_p4 }
 0x1b6   : > { %p6319_p1 = pneg %p6318_p13 }
 0x1b8   : > { %p6324_p2 = pnand %p6323_p0, %p6319_p1 }
 0x1ba   : > { %6327 = shalt.err (!%p6324_p2)
}
 0x1bb   : > { %s8474_s26 = smov 8   ;;  %s8475_s3 = sld [smem:[#allocation63_spill]] }
 0x1bc   : > { %5301 = dma.hbm_to_vmem [thread:$0]  (%p6808_p3), %s1206_s4, 32768, %s1208_s6, %s7006_s24, %s8468_s5, %s8468_s5, %s8474_s26  }
 0x1bd   : > { %s1220_s22 = scalar_lea.vmem [#allocation23], %s7000_s15 }
 0x1be   : > { %s1227_s14 = sshll.u32 %s1220_s22, 4  ;;  %s1228_s14 = int_to_ptr.vmem [resolvable:$true] %s1227_s14 }
 0x1c1   : > { %s1223_s7 = scalar_lea.hbm %s8475_s3, %s6544_s23  ;;  %s6348_s10 = scalar_lea.hbm %s8475_s3, 12 }
 0x1c2   : > { %s1225_s9 = sshll.u32 %s1223_s7, 4  ;;  %s1226_s9 = int_to_ptr.hbm [resolvable:$true] %s1225_s9 }
 0x1c3   : > { %s6342_s1 = sshra.s32 %s1226_s9, 4  ;;  %s6343_s1 = int_to_ptr.hbm [resolvable:$true] %s6342_s1 }
 0x1c4   : > { %s6344_s12 = scalar_lea.hbm %s6343_s1, 1  ;;  %p6349_p11 = scmp.lt.s32.totalorder %s6343_s1, %s8475_s3 }
 0x1c5   : > { %p6345_p6 = scmp.ne.s32.totalorder %s6343_s1, %s6344_s12  ;;  %p6350_p13 = scmp.lt.s32.totalorder %s6348_s10, %s6344_s12 }
 0x1c7   : > { %p6346_p7 = pnand %p6345_p6, %p6808_p3  ;;  %p6351_p1 = por %p6350_p13, %p6349_p11 }
 0x1c9   : > { %p6347_p9 = pneg %p6346_p7 }
 0x1cb   : > { %p6352_p4 = pnand %p6351_p1, %p6347_p9 }
 0x1cd   : > { %6355 = shalt.err (!%p6352_p4)
}
 0x1ce   : > { %s8476_s5 = sld [smem:[#allocation64_spill]]  ;;  %s1237_s16 = scalar_lea.vmem [#allocation24], %s7000_s15 }
 0x1cf   : > { %5302 = dma.hbm_to_vmem [thread:$0]  (%p6808_p3), %s1226_s9, 16, %s1228_s14, %s7006_s24  }
 0x1d0   : > { %s1244_s26 = sshll.u32 %s1237_s16, 4  ;;  %s1245_s26 = int_to_ptr.vmem [resolvable:$true] %s1244_s26 }
 0x1d4   : > { %s1240_s4 = scalar_lea.hbm %s8476_s5, %s6544_s23  ;;  %s6376_s1 = scalar_lea.hbm %s8476_s5, 12 }
 0x1d5   : > { %s1242_s6 = sshll.u32 %s1240_s4, 4  ;;  %s1243_s6 = int_to_ptr.hbm [resolvable:$true] %s1242_s6 }
 0x1d6   : > { %s6370_s7 = sshra.s32 %s1243_s6, 4  ;;  %s6371_s7 = int_to_ptr.hbm [resolvable:$true] %s6370_s7 }
 0x1d7   : > { %s6372_s22 = scalar_lea.hbm %s6371_s7, 1  ;;  %p6377_p6 = scmp.lt.s32.totalorder %s6371_s7, %s8476_s5 }
 0x1d8   : > { %p6373_p12 = scmp.ne.s32.totalorder %s6371_s7, %s6372_s22  ;;  %p6378_p7 = scmp.lt.s32.totalorder %s6376_s1, %s6372_s22 }
 0x1da   : > { %p6374_p0 = pnand %p6373_p12, %p6808_p3  ;;  %p6379_p9 = por %p6378_p7, %p6377_p6 }
 0x1dc   : > { %p6375_p2 = pneg %p6374_p0 }
 0x1de   : > { %p6380_p11 = pnand %p6379_p9, %p6375_p2 }
 0x1e0   : > { %6383 = shalt.err (!%p6380_p11)
}
 0x1e1   : > { %s8477_s9 = sld [smem:[#allocation65_spill]]  ;;  %s1254_s10 = scalar_lea.vmem [#allocation25], %s7000_s15 }
 0x1e2   : > { %5303 = dma.hbm_to_vmem [thread:$0]  (%p6808_p3), %s1243_s6, 16, %s1245_s26, %s7006_s24  }
 0x1e3   : > { %s1261_s4 = sshll.u32 %s1254_s10, 4  ;;  %s1262_s4 = int_to_ptr.vmem [resolvable:$true] %s1261_s4 }
 0x1e7   : > { %s1257_s14 = scalar_lea.hbm %s8477_s9, %s6544_s23  ;;  %s6404_s22 = scalar_lea.hbm %s8477_s9, 12 }
 0x1e8   : > { %s1259_s12 = sshll.u32 %s1257_s14, 4  ;;  %s1260_s12 = int_to_ptr.hbm [resolvable:$true] %s1259_s12 }
 0x1e9   : > { %s6398_s16 = sshra.s32 %s1260_s12, 4  ;;  %s6399_s16 = int_to_ptr.hbm [resolvable:$true] %s6398_s16 }
 0x1ea   : > { %s6400_s7 = scalar_lea.hbm %s6399_s16, 1  ;;  %p6405_p12 = scmp.lt.s32.totalorder %s6399_s16, %s8477_s9 }
 0x1eb   : > { %p6401_p13 = scmp.ne.s32.totalorder %s6399_s16, %s6400_s7  ;;  %p6406_p0 = scmp.lt.s32.totalorder %s6404_s22, %s6400_s7 }
 0x1ed   : > { %p6402_p1 = pnand %p6401_p13, %p6808_p3  ;;  %p6407_p2 = por %p6406_p0, %p6405_p12 }
 0x1ef   : > { %p6403_p4 = pneg %p6402_p1 }
 0x1f1   : > { %p6408_p6 = pnand %p6407_p2, %p6403_p4 }
 0x1f3   : > { %6411 = shalt.err (!%p6408_p6)
}
 0x1f4   : > { %5304 = dma.hbm_to_vmem [thread:$0]  (%p6808_p3), %s1260_s12, 16, %s1262_s4, %s7006_s24  }
 0x1f5 PF: > { %1270 = sbr.rel (%p6827_p10) target bundleno = 3635 (0xe33), region = 140  ;;  %s8479_s6 = sld [smem:[#allocation75_spill]] (!%p6827_p10) }
 0x1fa   : > { %6479 = dma.done.wait (%p274_p5), [#allocation4], 256  }
 0x1fb   : > { %6481 = vsyncadd (%p274_p5), [#allocation4], 4294967040 }
 0x1fc   : > { %6483 = dma.done.wait (%p274_p5), [#allocation7], 288  }
 0x1fd   : > { %6485 = vsyncadd (%p274_p5), [#allocation7], 4294967008 }
 0x1fe   : > { %6487 = dma.done.wait (%p274_p5), [#allocation10], 784  }
 0x1ff   : > { %6489 = vsyncadd (%p274_p5), [#allocation10], 4294966512 }
 0x200   : > { %6491 = dma.done.wait (%p274_p5), [#allocation13], 16  }
 0x201   : > { %6493 = vsyncadd (%p274_p5), [#allocation13], 4294967280  ;;  %s8480_s2 = sld [smem:[#allocation73_spill]]  ;;  %s1302_s26 = sand.u32 1, %s8479_s6  }
 0x202   : > { %s1303_s12 = scalar_lea.sflag [#allocation4], %s1302_s26 }
 0x207   : > { %s7157_s1 = sand.u32 1, %s8480_s2  }
 0x208   : > { %s5263_s14 = smul.u32 384, %s7157_s1 }
 0x20a   : > { %s7160_s10 = scalar_lea.vmem [#allocation14], %s5263_s14 }
 0x20b   : > { %6495 = dma.done.wait (%p6819_p8), %s1303_s12, 74128  }
 0x20c   : > { %6497 = vsyncadd (%p6819_p8), %s1303_s12, 4294893168  ;;  %s5264_s4 = smul.u32 3, %s7157_s1  ;;  %s5172_s16 = sshll.u32 %s7157_s1, 7 }
 0x20d   : > { %s5173_s7 = sshll.u32 %s7157_s1, 11  ;;  %s5174_s22 = sshll.u32 %s7157_s1, 4 }
 0x20e   : > { %s7170_s15 = scalar_lea.vmem [#allocation15], %s5264_s4  ;;  %s7172_s2 = scalar_lea.vmem [#allocation16], %s5172_s16 }
 0x20f   : > { %s1335_s24 = scalar_lea.vmem [#allocation17], %s7157_s1  ;;  %s1344_s26 = scalar_lea.vmem [#allocation18], %s7157_s1 }
 0x210   : > { %s1353_s14 = scalar_lea.vmem [#allocation19], %s7157_s1  ;;  %s7177_s12 = scalar_lea.vmem [#allocation20], %s5173_s7 }
 0x211   : > { %s7179_s3 = scalar_lea.vmem [#allocation21], %s5174_s22  ;;  %s7181_s5 = scalar_lea.vmem [#allocation22], %s5173_s7 }
 0x212   : > { %s1392_s8 = scalar_lea.vmem [#allocation23], %s7157_s1  ;;  %s1401_s9 = scalar_lea.vmem [#allocation24], %s7157_s1 }
 0x213   : > { %6499 = dma.done.wait (%p274_p5), [#allocation7], 64  }
 0x214   : > { %6501 = vsyncadd (%p274_p5), [#allocation7], 4294967232 }
 0x215   : > { %6503 = dma.done.wait (%p274_p5), [#allocation10], 16  }
 0x216   : > { %6505 = vsyncadd (%p274_p5), [#allocation10], 4294967280 }
 0x217   : > { %6507 = dma.done.wait (%p274_p5), [#allocation13], 384  }
 0x218   : > { %6509 = vsyncadd (%p274_p5), [#allocation13], 4294966912 }
 0x219   : > { %6511 = dma.done.wait (%p274_p5), [#allocation30], 1040  }
 0x21a   : > { %6513 = vsyncadd (%p274_p5), [#allocation30], 4294966256 }
 0x21b   : > { %6515 = dma.done.wait (%p274_p5), [#allocation33], 32  }
 0x21c   : > { %6517 = vsyncadd (%p274_p5), [#allocation33], 4294967264 }
 0x21d   : > { %6519 = dma.done.wait (%p274_p5), [#allocation36], 16  }
 0x21e   : > { %6521 = vsyncadd (%p274_p5), [#allocation36], 4294967280  ;;  %s8482_s4 = sld [smem:[#allocation74_spill]] }
 0x224   : > { %p5184_p3 = scmp.ne.s32.totalorder %s8482_s4, 0 }
 0x226   : > { %1585 = sbr.rel (%p5184_p3) target bundleno = 830 (0x33e), region = 248 }
 0x22b   : > { %v1589_v0 = vld [vmem:[#allocation8 + $0x8] sm:$0xf]  ;;  %vm1601_vm0 = vcmask 1043456   ;;  %v1588_v1 = vld [vmem:[#allocation8] sm:$0xff]  ;;  %v1587_v2 = vld [vmem:[#allocation3 + $0x8] sm:$0xff]  ;;  %vm1594_vm1 = vcmask 97280  }
 0x22c   : > { %5251 = vmatpush.msk.msra.mxu3 %vm1601_vm0, %v1589_v0  ;;  %5185 = vmatpush.msk.msra.mxu0 %vm1601_vm0, %v1589_v0  ;;  %v1586_v3 = vld [vmem:[#allocation3] sm:$0xff]  ;;  %v1635_v4 = vld [vmem:[#allocation11 + $0x28] sm:$0xff]  ;;  %v1632_v7 = vld [vmem:[#allocation11 + $0x10] sm:$0xff]  ;;  %vm1640_vm2 = vcmask 392192  }
 0x22d   : > { %5253 = vmatpush.msra.mxu2 %v1635_v4  ;;  %v1634_v5 = vld [vmem:[#allocation11 + $0x20] sm:$0xff]  ;;  %1657 = vmatpush.msra.mxu1 %v1635_v4  ;;  %v1633_v6 = vld [vmem:[#allocation11 + $0x18] sm:$0xff]  ;;  %v1631_v8 = vld [vmem:[#allocation11 + $0x8] sm:$0xff] }
 0x22e   : > { %5252 = vmatpush.msra.mxu3 %v1588_v1  ;;  %1620 = vmatpush.msra.mxu0 %v1588_v1  ;;  %v1630_v9 = vld [vmem:[#allocation11] sm:$0xff]  ;;  %v5530_v10 = vld [vmem:[#allocation9] ss:$0 sm:$0xff]  ;;  %v5531_v17 = vld [vmem:[#allocation12] ss:$0 sm:$0xff] }
 0x22f   : > { %5187 = vmatmul.msk.f32.vlgmr.msra.gmra.mxu3 %vm1594_vm1, %v1587_v2  ;;  %5186 = vmatmul.msk.f32.vlgmr.msra.gmra.mxu0 %vm1594_vm1, %v1586_v3 }
 0x230   : > { %5254 = vmatpush.msra.mxu2 %v1634_v5  ;;  %1658 = vmatpush.msra.mxu1 %v1634_v5 }
 0x232   : > { %5255 = vmatpush.msra.mxu2 %v1633_v6  ;;  %1659 = vmatpush.msra.mxu1 %v1633_v6 }
 0x234   : > { %5256 = vmatpush.msra.mxu2 %v1632_v7  ;;  %1660 = vmatpush.msra.mxu1 %v1632_v7 }
 0x236   : > { %5257 = vmatpush.msra.mxu2 %v1631_v8  ;;  %1661 = vmatpush.msra.mxu1 %v1631_v8 }
 0x238   : > { %5258 = vmatpush.msra.mxu2 %v1630_v9  ;;  %1662 = vmatpush.msra.mxu1 %v1630_v9 }
 0x2ac   : > { %v1622_v11 = vpop.f32.mrf.mxu0 }
 0x2ad   : > { %v1623_v12 = vadd.f32 %v5530_v10, %v1622_v11 }
 0x2af   : > { %v1628_v13 = vmax.f32 %v1623_v12, 0.0 }
 0x2b1   : > { %5188 = vmatmul.msk.f32.vlgmr.msra.gmra.mxu1 %vm1640_vm2, %v1628_v13 }
 0x2b2   : > { %v1625_v14 = vpop.f32.mrf.mxu3 }
 0x2b3   : > { %v1626_v15 = vadd.f32 %v5530_v10, %v1625_v14 }
 0x2b5   : > { %v1629_v16 = vmax.f32 %v1626_v15, 0.0 }
 0x2b7   : > { %5189 = vmatmul.msk.f32.vlgmr.msra.gmra.mxu2 %vm1640_vm2, %v1629_v16 }
 0x32e   : > { %v1664_v18 = vpop.f32.mrf.mxu1 }
 0x32f   : > { %v1665_v19 = vadd.f32 %v5531_v17, %v1664_v18 }
 0x331   : > { %1670 = vst [vmem:[#allocation2] sm:$0xff] %v1665_v19 }
 0x33a   : > { %v1667_v20 = vpop.f32.mrf.mxu2 }
 0x33b   : > { %v1668_v21 = vadd.f32 %v5531_v17, %v1667_v20 }
 0x33d   : > { %1671 = vst [vmem:[#allocation2 + $0x8] sm:$0xff] %v1668_v21 }
 0x33e PF: > { %v1720_v22 = vld [vmem:[%s7160_s10 + $0x170] sm:$0xff]  ;;  %v1719_v23 = vld [vmem:[%s7160_s10 + $0x168] sm:$0xff]  ;;  %v1717_v24 = vld [vmem:[%s7160_s10 + $0x158] sm:$0xff]  ;;  %vm1969_vm3 = vcmask 130048   ;;  %s6601_s6 = smov 80   ;;  %s6602_s16 = smov 96  }
 0x33f   : > { %1753 = vmatpush.msra.mxu1 %v1720_v22  ;;  %1730 = vmatpush.msra.mxu0 %v1719_v23  ;;  %v1716_v25 = vld [vmem:[%s7160_s10 + $0x150] sm:$0xff]  ;;  %v1714_v26 = vld [vmem:[%s7160_s10 + $0x140] sm:$0xff]  ;;  %v1713_v27 = vld [vmem:[%s7160_s10 + $0x138] sm:$0xff]  ;;  %s6604_s7 = smov 48   ;;  %s6605_s22 = smov 64   ;;  %vm2354_vm4 = vcmask 64512  }
 0x340   : > { %v1711_v28 = vld [vmem:[%s7160_s10 + $0x128] sm:$0xff]  ;;  %v1710_v29 = vld [vmem:[%s7160_s10 + $0x120] sm:$0xff]  ;;  %v1708_v30 = vld [vmem:[%s7160_s10 + $0x110] sm:$0xff]  ;;  %s6607_s4 = smov 16   ;;  %s8483_s11 = sld [smem:[#allocation52_spill]]  ;;  %vm2957_vm5 = vcmask 261120  }
 0x341   : > { %1754 = vmatpush.msra.mxu1 %v1717_v24  ;;  %1731 = vmatpush.msra.mxu0 %v1716_v25  ;;  %v1707_v31 = vld [vmem:[%s7160_s10 + $0x108] sm:$0xff]  ;;  %v1705_v32 = vld [vmem:[%s7160_s10 + $0xf8] sm:$0xff]  ;;  %v1704_v33 = vld [vmem:[%s7160_s10 + $0xf0] sm:$0xff]  ;;  %vm2960_vm6 = vcmask 392192   ;;  %vm2963_vm7 = vcmask 523264   ;;  %vm2966_vm8 = vcmask 654336  }
 0x342   : > { %v1702_v34 = vld [vmem:[%s7160_s10 + $0xe0] sm:$0xff]  ;;  %v1701_v35 = vld [vmem:[%s7160_s10 + $0xd8] sm:$0xff]  ;;  %v1699_v38 = vld [vmem:[%s7160_s10 + $0xc8] sm:$0xff]  ;;  %vm2969_vm9 = vcmask 785408   ;;  %vm2972_vm10 = vcmask 916480  }
 0x343   : > { %1755 = vmatpush.msra.mxu1 %v1714_v26  ;;  %1732 = vmatpush.msra.mxu0 %v1713_v27  ;;  %v1721_v36 = vld [vmem:[%s7160_s10 + $0x178] sm:$0xff]  ;;  %v1718_v37 = vld [vmem:[%s7160_s10 + $0x160] sm:$0xff]  ;;  %v1715_v40 = vld [vmem:[%s7160_s10 + $0x148] sm:$0xff] }
 0x344   : > { %v1698_v39 = vld [vmem:[%s7160_s10 + $0xc0] sm:$0xff]  ;;  %1776 = vmatpush.msra.mxu2 %v1721_v36  ;;  %v1696_v41 = vld [vmem:[%s7160_s10 + $0xb0] sm:$0xff]  ;;  %v1695_v42 = vld [vmem:[%s7160_s10 + $0xa8] sm:$0xff] }
 0x345   : > { %1756 = vmatpush.msra.mxu1 %v1711_v28  ;;  %1733 = vmatpush.msra.mxu0 %v1710_v29  ;;  %v1693_v43 = vld [vmem:[%s7160_s10 + $0x98] sm:$0xff]  ;;  %v1692_v44 = vld [vmem:[%s7160_s10 + $0x90] sm:$0xff]  ;;  %v1690_v46 = vld [vmem:[%s7160_s10 + $0x80] sm:$0xff] }
 0x346   : > { %1777 = vmatpush.msra.mxu2 %v1718_v37  ;;  %v1712_v45 = vld [vmem:[%s7160_s10 + $0x130] sm:$0xff]  ;;  %v1689_v47 = vld [vmem:[%s7160_s10 + $0x78] sm:$0xff]  ;;  %v1706_v49 = vld [vmem:[%s7160_s10 + $0x100] sm:$0xff] }
 0x347   : > { %1757 = vmatpush.msra.mxu1 %v1708_v30  ;;  %1734 = vmatpush.msra.mxu0 %v1707_v31  ;;  %v1709_v48 = vld [vmem:[%s7160_s10 + $0x118] sm:$0xff]  ;;  %v1687_v50 = vld [vmem:[%s7160_s10 + $0x68] sm:$0xff]  ;;  %v1686_v51 = vld [vmem:[%s7160_s10 + $0x60] sm:$0xff] }
 0x348   : > { %1778 = vmatpush.msra.mxu2 %v1715_v40  ;;  %v1684_v52 = vld [vmem:[%s7160_s10 + $0x50] sm:$0xff]  ;;  %v1683_v53 = vld [vmem:[%s7160_s10 + $0x48] sm:$0xff]  ;;  %v1681_v56 = vld [vmem:[%s7160_s10 + $0x38] sm:$0xff] }
 0x349   : > { %1758 = vmatpush.msra.mxu1 %v1705_v32  ;;  %1735 = vmatpush.msra.mxu0 %v1704_v33  ;;  %v1703_v54 = vld [vmem:[%s7160_s10 + $0xe8] sm:$0xff]  ;;  %v1700_v55 = vld [vmem:[%s7160_s10 + $0xd0] sm:$0xff]  ;;  %v1697_v58 = vld [vmem:[%s7160_s10 + $0xb8] sm:$0xff] }
 0x34a   : > { %1779 = vmatpush.msra.mxu2 %v1712_v45  ;;  %v1680_v57 = vld [vmem:[%s7160_s10 + $0x30] sm:$0xff]  ;;  %v1678_v59 = vld [vmem:[%s7160_s10 + $0x20] sm:$0xff]  ;;  %v1677_v60 = vld [vmem:[%s7160_s10 + $0x18] sm:$0xff] }
 0x34b   : > { %1759 = vmatpush.msra.mxu1 %v1702_v34  ;;  %1736 = vmatpush.msra.mxu0 %v1701_v35  ;;  %v1694_v61 = vld [vmem:[%s7160_s10 + $0xa0] sm:$0xff]  ;;  %v1675_v62 = vld [vmem:[%s7160_s10 + $0x8] sm:$0xff]  ;;  %v1688_v2 = vld [vmem:[%s7160_s10 + $0x70] sm:$0xff] }
 0x34c   : > { %1780 = vmatpush.msra.mxu2 %v1709_v48  ;;  %v1674_v63 = vld [vmem:[%s7160_s10] sm:$0xff]  ;;  %v1691_v1 = vld [vmem:[%s7160_s10 + $0x88] sm:$0xff]  ;;  %v1685_v3 = vld [vmem:[%s7160_s10 + $0x58] sm:$0xff] }
 0x34d   : > { %1760 = vmatpush.msra.mxu1 %v1699_v38  ;;  %1737 = vmatpush.msra.mxu0 %v1698_v39  ;;  %v1672_v0 = vld [vmem:[#allocation2] sm:$0xff]  ;;  %v1673_v5 = vld [vmem:[#allocation2 + $0x8] sm:$0xff]  ;;  %v1676_v7 = vld [vmem:[%s7160_s10 + $0x10] sm:$0xff] }
 0x34e   : > { %1781 = vmatpush.msra.mxu2 %v1706_v49  ;;  %v1682_v4 = vld [vmem:[%s7160_s10 + $0x40] sm:$0xff]  ;;  %v1679_v6 = vld [vmem:[%s7160_s10 + $0x28] sm:$0xff]  ;;  %s6603_s10 = smov 112   ;;  %v5567_v39 = vld [vmem:[%s8483_s11] ss:$0 sm:$0xff] }
 0x34f   : > { %1761 = vmatpush.msra.mxu1 %v1696_v41  ;;  %1738 = vmatpush.msra.mxu0 %v1695_v42  ;;  %v1722_v8 = vld [vmem:[%s7170_s15] sm:$0x7]  ;;  %s6606_s15 = smov 32  }
 0x350   : > { %1782 = vmatpush.msra.mxu2 %v1703_v54  ;;  %v1725_v9 = vperm.slane %v1722_v8, 1  ;;  %v1724_v10 = vperm.slane %v1722_v8, 0  ;;  %v1726_v21 = vperm.slane %v1722_v8, 2 }
 0x351   : > { %1762 = vmatpush.msra.mxu1 %v1693_v43  ;;  %1739 = vmatpush.msra.mxu0 %v1692_v44 }
 0x352   : > { %1783 = vmatpush.msra.mxu2 %v1700_v55 }
 0x353   : > { %1763 = vmatpush.msra.mxu1 %v1690_v46  ;;  %1740 = vmatpush.msra.mxu0 %v1689_v47 }
 0x354   : > { %1784 = vmatpush.msra.mxu2 %v1697_v58 }
 0x355   : > { %1764 = vmatpush.msra.mxu1 %v1687_v50  ;;  %1741 = vmatpush.msra.mxu0 %v1686_v51 }
 0x356   : > { %1785 = vmatpush.msra.mxu2 %v1694_v61 }
 0x357   : > { %1765 = vmatpush.msra.mxu1 %v1684_v52  ;;  %1742 = vmatpush.msra.mxu0 %v1683_v53 }
 0x358   : > { %1786 = vmatpush.msra.mxu2 %v1691_v1 }
 0x359   : > { %1766 = vmatpush.msra.mxu1 %v1681_v56  ;;  %1743 = vmatpush.msra.mxu0 %v1680_v57 }
 0x35a   : > { %1787 = vmatpush.msra.mxu2 %v1688_v2 }
 0x35b   : > { %1767 = vmatpush.msra.mxu1 %v1678_v59  ;;  %1744 = vmatpush.msra.mxu0 %v1677_v60 }
 0x35c   : > { %1788 = vmatpush.msra.mxu2 %v1685_v3  ;;  %v5570_v3 = vld [vmem:[%s8483_s11 + $0x6] ss:$0 sm:$0xff] }
 0x35d   : > { %1768 = vmatpush.msra.mxu1 %v1675_v62  ;;  %1745 = vmatpush.msra.mxu0 %v1674_v63 }
 0x35e   : > { %1769 = vmatmul.f32.vlgmr.msra.gmra.mxu1 %v1672_v0  ;;  %1746 = vmatmul.f32.vlgmr.msra.gmra.mxu0 %v1672_v0 }
 0x35f   : > { %1789 = vmatpush.msra.mxu2 %v1682_v4 }
 0x361   : > { %1790 = vmatpush.msra.mxu2 %v1679_v6 }
 0x363   : > { %1791 = vmatpush.msra.mxu2 %v1676_v7 }
 0x364   : > { %1792 = vmatmul.f32.vlgmr.msra.gmra.mxu2 %v1672_v0 }
 0x366   : > { %1749 = vmatmul.f32.gmra.mxu0 %v1673_v5  ;;  %1772 = vmatmul.f32.gmra.mxu1 %v1673_v5 }
 0x36c   : > { %1795 = vmatmul.f32.gmra.mxu2 %v1673_v5 }
 0x3db   : > { %v1770_v11 = vpop.f32.mrf.mxu1  ;;  %v1747_v12 = vpop.f32.mrf.mxu0 }
 0x3dc   : > { %v1771_v13 = vadd.f32 %v1770_v11, %v1725_v9  ;;  %v1748_v14 = vadd.f32 %v1747_v12, %v1724_v10 }
 0x3de   : > { %v1799_v15 = vmul.f32 0.25, %v1748_v14  ;;  %1841 = vrot.lane.b32.xlu2 %v1771_v13, %s6601_s6  ;;  %1837 = vrot.lane.b32.xlu1 %v1771_v13, %s6602_s16 }
 0x3df   : > { %1833 = vrot.lane.b32.xlu0 %v1771_v13, %s6603_s10  ;;  %5190 = vmatpush.xpose.msk.msra.mxu3 %vm1969_vm3, %v1771_v13 }
 0x3e2   : > { %5191 = vmatmul.msk.f32.vlgmr.msra.gmra.mxu3 %vm1969_vm3, %v1799_v15 }
 0x3e3   : > { %v1750_v16 = vpop.f32.mrf.mxu0  ;;  %v1773_v18 = vpop.f32.mrf.mxu1 }
 0x3e4   : > { %v1751_v17 = vadd.f32 %v1750_v16, %v1724_v10  ;;  %v7276_v20 = vadd.f32 %v1773_v18, %v1725_v9  ;;  %v5573_v10 = vld [vmem:[%s8483_s11 + $0xa] ss:$0 sm:$0xff]  ;;  %v5575_v18 = vld [vmem:[%s8483_s11 + $0x7] ss:$0 sm:$0xff] }
 0x3e6   : > { %1811 = vrot.lane.b32.xlu2 %v1799_v15, %s6601_s6  ;;  %1807 = vrot.lane.b32.xlu1 %v1799_v15, %s6602_s16  ;;  %v7274_v19 = vmul.f32 0.25, %v1751_v17 }
 0x3e7   : > { %1803 = vrot.lane.b32.xlu0 %v1799_v15, %s6603_s10  ;;  %v1793_v22 = vpop.f32.mrf.mxu2 }
 0x3e8   : > { %v7289_v23 = vadd.f32 %v1793_v22, %v1726_v21 }
 0x3ea   : > { %2549 = vmatpush.msrb.mxu2 %v7289_v23 }
 0x3ee   : > { %1849 = vrot.lane.b32.xlu2 %v1771_v13, %s6604_s7  ;;  %1815 = vrot.lane.b32.xlu1 %v1799_v15, %s6605_s22 }
 0x3ef   : > { %1845 = vrot.lane.b32.xlu0 %v1771_v13, %s6605_s22  ;;  %v1796_v24 = vpop.f32.mrf.mxu2 }
 0x3f0   : > { %v7307_v25 = vadd.f32 %v1796_v24, %v1726_v21  ;;  %v5571_v24 = vld [vmem:[%s8483_s11 + $0x3] ss:$0 sm:$0xff] }
 0x3f2   : > { %v5532_v26 = vpack.i.bf16 %v7307_v25, %v7289_v23 }
 0x3f6   : > { %1823 = vrot.lane.b32.xlu2 %v1799_v15, %s6606_s15  ;;  %1853 = vrot.lane.b32.xlu1 %v1771_v13, %s6606_s15 }
 0x3f7   : > { %1857 = vrot.lane.b32.xlu0 %v1771_v13, %s6607_s4 }
 0x3fe   : > { %1839 = vrot.lane.b32.xlu2 %v7276_v20, %s6602_s16  ;;  %1805 = vrot.lane.b32.xlu1 %v7274_v19, %s6603_s10 }
 0x3ff   : > { %1819 = vrot.lane.b32.xlu0 %v1799_v15, %s6604_s7 }
 0x406   : > { %1851 = vrot.lane.b32.xlu2 %v7276_v20, %s6604_s7  ;;  %1809 = vrot.lane.b32.xlu1 %v7274_v19, %s6602_s16 }
 0x407   : > { %1835 = vrot.lane.b32.xlu0 %v7276_v20, %s6603_s10 }
 0x40e   : > { %1847 = vrot.lane.b32.xlu2 %v7276_v20, %s6605_s22  ;;  %1821 = vrot.lane.b32.xlu1 %v7274_v19, %s6604_s7 }
 0x40f   : > { %1827 = vrot.lane.b32.xlu0 %v1799_v15, %s6607_s4 }
 0x416   : > { %1817 = vrot.lane.b32.xlu1 %v7274_v19, %s6605_s22  ;;  %1813 = vrot.lane.b32.xlu2 %v7274_v19, %s6601_s6 }
 0x417   : > { %1843 = vrot.lane.b32.xlu0 %v7276_v20, %s6601_s6 }
 0x41e   : > { %1859 = vrot.lane.b32.xlu1 %v7276_v20, %s6607_s4  ;;  %1825 = vrot.lane.b32.xlu2 %v7274_v19, %s6606_s15 }
 0x41f   : > { %1855 = vrot.lane.b32.xlu0 %v7276_v20, %s6606_s15 }
 0x426   : > { %5533 = vrot.lane.b32.xlu1 %v5532_v26, %s6603_s10  ;;  %1875 = vrot.lane.b32.xlu2 %v7289_v23, %s6601_s6 }
 0x427   : > { %1829 = vrot.lane.b32.xlu0 %v7274_v19, %s6607_s4 }
 0x42e   : > { %1887 = vrot.lane.b32.xlu2 %v7289_v23, %s6604_s7 }
 0x42f   : > { %5543 = vrot.lane.b32.xlu0 %v5532_v26, %s6605_s22 }
 0x436   : > { %5538 = vrot.lane.b32.xlu2 %v5532_v26, %s6602_s16 }
 0x438   : > { %v1842_v27 = vpop.permute.xlu2 %1841 }
 0x440   : > { %v1812_v28 = vpop.permute.xlu2 %1811 }
 0x448   : > { %v1850_v29 = vpop.permute.xlu2 %1849 }
 0x450   : > { %v1838_v30 = vpop.permute.xlu1 %1837  ;;  %v1824_v31 = vpop.permute.xlu2 %1823 }
 0x451   : > { %v1834_v32 = vpop.permute.xlu0 %1833 }
 0x452   : > { %5192 = vmatpush.xpose.msk.msrb.mxu3 %vm1969_vm3, %v1834_v32  ;;  %v5577_v32 = vld [vmem:[%s8483_s11 + $0xb] ss:$0 sm:$0xff] }
 0x456   : > { %5194 = vmatpush.xpose.msk.msra.mxu3 %vm1969_vm3, %v1838_v30 }
 0x458   : > { %v1840_v33 = vpop.permute.xlu2 %1839  ;;  %v1808_v34 = vpop.permute.xlu1 %1807 }
 0x459   : > { %v1804_v35 = vpop.permute.xlu0 %1803 }
 0x45a   : > { %5193 = vmatmul.msk.f32.vlgmr.msrb.gmra.mxu3 %vm1969_vm3, %v1804_v35 }
 0x45b   : > { %5196 = vmatpush.xpose.msk.msrb.mxu3 %vm1969_vm3, %v1842_v27  ;;  %v5568_v27 = vld [vmem:[%s8483_s11 + $0x1] ss:$0 sm:$0xff] }
 0x460   : > { %v1816_v36 = vpop.permute.xlu1 %1815  ;;  %v1852_v38 = vpop.permute.xlu2 %1851 }
 0x461   : > { %v1846_v37 = vpop.permute.xlu0 %1845 }
 0x462   : > { %5195 = vmatmul.msk.f32.vlgmr.msra.gmra.mxu3 %vm1969_vm3, %v1808_v34  ;;  %v5576_v34 = vld [vmem:[%s8483_s11 + $0x8] ss:$0 sm:$0xff] }
 0x463   : > { %5198 = vmatpush.xpose.msk.msra.mxu3 %vm1969_vm3, %v1846_v37 }
 0x465   : > { %v1991_v40 = vpop.f32.mrf.mxu3 }
 0x466   : > { %v7327_v41 = vadd.f32 %v5567_v39, %v1991_v40 }
 0x468   : > { %v1854_v42 = vpop.permute.xlu1 %1853  ;;  %v2355_v43 = vsel %vm2354_vm4, %v7327_v41, -inf  ;;  %v1848_v45 = vpop.permute.xlu2 %1847 }
 0x469   : > { %v1858_v44 = vpop.permute.xlu0 %1857  ;;  %2356 = vmax.xlane.f32.xlu1 %v2355_v43  ;;  %5202 = vmatpush.xpose.msk.msrb.mxu0 %vm1969_vm3, %v1854_v42 }
 0x46a   : > { %5197 = vmatmul.msk.f32.vlgmr.msrb.gmra.mxu3 %vm1969_vm3, %v1812_v28  ;;  %5204 = vmatpush.xpose.msk.msrb.mxu1 %vm1969_vm3, %v1858_v44 }
 0x46b   : > { %5200 = vmatpush.xpose.msk.msrb.mxu3 %vm1969_vm3, %v1850_v29 }
 0x46c   : > { %5203 = vmatmul.msk.f32.vlgmr.msrb.gmra.mxu0 %vm1969_vm3, %v1824_v31 }
 0x46d   : > { %5210 = vmatpush.xpose.msk.msra.mxu0 %vm1969_vm3, %v1840_v33  ;;  %v5578_v33 = vld [vmem:[%s8483_s11 + $0xc] ss:$0 sm:$0xff] }
 0x470   : > { %v1806_v46 = vpop.permute.xlu1 %1805  ;;  %v1814_v54 = vpop.permute.xlu2 %1813 }
 0x471   : > { %5214 = vmatpush.xpose.msk.msrb.mxu0 %vm1969_vm3, %v1848_v45  ;;  %v1820_v47 = vpop.permute.xlu0 %1819 }
 0x472   : > { %5199 = vmatmul.msk.f32.vlgmr.msra.gmra.mxu3 %vm1969_vm3, %v1816_v36 }
 0x473   : > { %5206 = vmatpush.xpose.msk.msra.mxu3 %vm1969_vm3, %v7276_v20 }
 0x478   : > { %v1810_v48 = vpop.permute.xlu1 %1809  ;;  %v1826_v57 = vpop.permute.xlu2 %1825 }
 0x479   : > { %v1836_v49 = vpop.permute.xlu0 %1835  ;;  %5211 = vmatmul.msk.f32.vlgmr.msra.gmra.mxu0 %vm1969_vm3, %v1810_v48  ;;  %v5580_v48 = vld [vmem:[%s8483_s11 + $0xe] ss:$0 sm:$0xff] }
 0x47a   : > { %5201 = vmatmul.msk.f32.vlgmr.msrb.gmra.mxu3 %vm1969_vm3, %v1820_v47 }
 0x47b   : > { %5208 = vmatpush.xpose.msk.msrb.mxu3 %vm1969_vm3, %v1836_v49  ;;  %v5581_v49 = vld [vmem:[%s8483_s11 + $0xd] ss:$0 sm:$0xff] }
 0x480   : > { %v1822_v50 = vpop.permute.xlu1 %1821  ;;  %v1876_v61 = vpop.permute.xlu2 %1875 }
 0x481   : > { %v1828_v51 = vpop.permute.xlu0 %1827 }
 0x482   : > { %5205 = vmatmul.msk.f32.vlgmr.msrb.gmra.mxu1 %vm1969_vm3, %v1828_v51  ;;  %5207 = vmatmul.msk.f32.vlgmr.msra.gmra.mxu3 %vm1969_vm3, %v7274_v19  ;;  %v5582_v51 = vld [vmem:[%s8483_s11 + $0xf] ss:$0 sm:$0xff] }
 0x483   : > { %5216 = vmatpush.xpose.msk.msra.mxu3 %vm1969_vm3, %v1852_v38 }
 0x488   : > { %v1818_v52 = vpop.permute.xlu1 %1817  ;;  %v1888_v62 = vpop.permute.xlu2 %1887 }
 0x489   : > { %v1844_v53 = vpop.permute.xlu0 %1843  ;;  %5215 = vmatmul.msk.f32.vlgmr.msrb.gmra.mxu0 %vm1969_vm3, %v1818_v52 }
 0x48a   : > { %5212 = vmatpush.xpose.msk.msra.mxu1 %vm1969_vm3, %v1844_v53  ;;  %5209 = vmatmul.msk.f32.vlgmr.msrb.gmra.mxu3 %vm1969_vm3, %v1806_v46 }
 0x48d   : > { %5213 = vmatmul.msk.f32.vlgmr.msra.gmra.mxu1 %vm1969_vm3, %v1814_v54 }
 0x490   : > { %v1860_v55 = vpop.permute.xlu1 %1859  ;;  %v7362_v0 = vpop.permute.xlu2 %5538 }
 0x491   : > { %v1856_v56 = vpop.permute.xlu0 %1855  ;;  %5220 = vmatpush.xpose.msk.msrb.mxu1 %vm1969_vm3, %v1860_v55  ;;  %v5540_v1 = vunpack.i.l.bf16 %v7362_v0 }
 0x492   : > { %5218 = vmatpush.xpose.msk.msra.mxu0 %vm1969_vm3, %v1856_v56  ;;  %5217 = vmatmul.msk.f32.vlgmr.msra.gmra.mxu3 %vm1969_vm3, %v1822_v50 }
 0x495   : > { %5219 = vmatmul.msk.f32.vlgmr.msra.gmra.mxu0 %vm1969_vm3, %v1826_v57  ;;  %2618 = vmatpush.msra.mxu1 %v1876_v61 }
 0x496   : > { %2595 = vmatpush.msrb.mxu0 %v5540_v1 }
 0x498   : > { %v7358_v58 = vpop.permute.xlu1 %5533 }
 0x499   : > { %v1830_v59 = vpop.permute.xlu0 %1829  ;;  %v5535_v60 = vunpack.i.l.bf16 %v7358_v58 }
 0x49a   : > { %5221 = vmatmul.msk.f32.vlgmr.msrb.gmra.mxu1 %vm1969_vm3, %v1830_v59 }
 0x49b   : > { %2572 = vmatpush.msrb.mxu3 %v5535_v60  ;;  %v5572_v60 = vld [vmem:[%s8483_s11 + $0x4] ss:$0 sm:$0xff] }
 0x49d   : > { %2664 = vmatpush.msra.mxu3 %v1888_v62  ;;  %v5579_v62 = vld [vmem:[%s8483_s11 + $0x9] ss:$0 sm:$0xff] }
 0x4a1   : > { %v7374_v15 = vpop.permute.xlu0 %5543 }
 0x4a2   : > { %v5545_v17 = vunpack.i.l.bf16 %v7374_v15 }
 0x4a4   : > { %2641 = vmatpush.msra.mxu2 %v5545_v17 }
 0x4dc   : > { %v2357_v7 = vpop.xlane.xlu1 %2356 }
 0x4dd   : > { %v2015_v63 = vpop.f32.mrf.mxu3  ;;  %v2403_v9 = vsub.f32 %v7327_v41, %v2357_v7  ;;  %v5569_v41 = vld [vmem:[%s8483_s11 + $0x2] ss:$0 sm:$0xff] }
 0x4de   : > { %v7392_v31 = vadd.f32 %v5568_v27, %v2015_v63 }
 0x4df   : > { %v2419_v11 = vmul.f32 1.442695, %v2403_v9 }
 0x4e0   : > { %v2358_v38 = vsel %vm2354_vm4, %v7392_v31, -inf }
 0x4e1   : > { %5589 = vpow2.f32 %v2419_v11 }
 0x4e5   : > { %v2039_v2 = vpop.f32.mrf.mxu3 }
 0x4e6   : > { %v7412_v46 = vadd.f32 %v5569_v41, %v2039_v2 }
 0x4e7   : > { %v7380_v20 = vpop.eup %5589 }
 0x4e8   : > { %v2451_v26 = vsel %vm2354_vm4, %v7380_v20, 0.0  ;;  %v2361_v52 = vsel %vm2354_vm4, %v7412_v46, -inf }
 0x4e9   : > { %v2135_v4 = vpop.f32.mrf.mxu0 }
 0x4ea   : > { %v7366_v5 = vadd.f32 %v5570_v3, %v2135_v4  ;;  %v5574_v3 = vld [vmem:[%s8483_s11 + $0x5] ss:$0 sm:$0xff] }
 0x4ec   : > { %v2373_v6 = vsel %vm2354_vm4, %v7366_v5, -inf }
 0x4ed   : > { %v2063_v8 = vpop.f32.mrf.mxu3  ;;  %2374 = vmax.xlane.f32.xlu0 %v2373_v6 }
 0x4ee   : > { %v7390_v29 = vadd.f32 %v5571_v24, %v2063_v8 }
 0x4f0   : > { %v2364_v36 = vsel %vm2354_vm4, %v7390_v29, -inf }
 0x4f5   : > { %v2087_v12 = vpop.f32.mrf.mxu3 }
 0x4f6   : > { %v2231_v13 = vpop.f32.mrf.mxu0  ;;  %v7435_v1 = vadd.f32 %v5572_v60, %v2087_v12 }
 0x4f7   : > { %v7372_v14 = vadd.f32 %v5573_v10, %v2231_v13 }
 0x4f8   : > { %v2367_v4 = vsel %vm2354_vm4, %v7435_v1, -inf }
 0x4f9   : > { %v2385_v16 = vsel %vm2354_vm4, %v7372_v14, -inf }
 0x4fa   : > { %2386 = vmax.xlane.f32.xlu1 %v2385_v16 }
 0x4fd   : > { %v2111_v19 = vpop.f32.mrf.mxu3 }
 0x4fe   : > { %v7444_v7 = vadd.f32 %v5574_v3, %v2111_v19 }
 0x4ff   : > { %v2159_v21 = vpop.f32.mrf.mxu1 }
 0x500   : > { %v7382_v22 = vadd.f32 %v5575_v18, %v2159_v21  ;;  %v2370_v8 = vsel %vm2354_vm4, %v7444_v7, -inf }
 0x502   : > { %v2376_v28 = vsel %vm2354_vm4, %v7382_v22, -inf  ;;  %2452 = vadd.xlane.f32.xlu1 %v2451_v26 }
 0x503   : > { %2377 = vmax.xlane.f32.xlu2 %v2376_v28 }
 0x505   : > { %v2183_v30 = vpop.f32.mrf.mxu3 }
 0x506   : > { %v2279_v35 = vpop.f32.mrf.mxu0  ;;  %v7406_v42 = vadd.f32 %v5576_v34, %v2183_v30 }
 0x507   : > { %v7403_v40 = vadd.f32 %v5578_v33, %v2279_v35 }
 0x508   : > { %v2379_v47 = vsel %vm2354_vm4, %v7406_v42, -inf }
 0x509   : > { %v2391_v45 = vsel %vm2354_vm4, %v7403_v40, -inf }
 0x50a   : > { %v2255_v37 = vpop.f32.mrf.mxu1  ;;  %2365 = vmax.xlane.f32.xlu1 %v2364_v36 }
 0x50b   : > { %v7401_v39 = vadd.f32 %v5577_v32, %v2255_v37  ;;  %2359 = vmax.xlane.f32.xlu2 %v2358_v38 }
 0x50d   : > { %v2388_v43 = vsel %vm2354_vm4, %v7401_v39, -inf  ;;  %v2207_v44 = vpop.f32.mrf.mxu3 }
 0x50e   : > { %2389 = vmax.xlane.f32.xlu0 %v2388_v43  ;;  %v7437_v2 = vadd.f32 %v5579_v62, %v2207_v44 }
 0x510   : > { %v2382_v6 = vsel %vm2354_vm4, %v7437_v2, -inf }
 0x512   : > { %2380 = vmax.xlane.f32.xlu1 %v2379_v47  ;;  %v2327_v50 = vpop.f32.mrf.mxu0 }
 0x513   : > { %2392 = vmax.xlane.f32.xlu2 %v2391_v45  ;;  %v7421_v54 = vadd.f32 %v5580_v48, %v2327_v50 }
 0x515   : > { %v2303_v53 = vpop.f32.mrf.mxu3  ;;  %v2397_v61 = vsel %vm2354_vm4, %v7421_v54, -inf }
 0x516   : > { %2362 = vmax.xlane.f32.xlu0 %v2361_v52  ;;  %v7423_v55 = vadd.f32 %v5581_v49, %v2303_v53 }
 0x517   : > { %v2351_v56 = vpop.f32.mrf.mxu1 }
 0x518   : > { %v7425_v57 = vadd.f32 %v5582_v51, %v2351_v56  ;;  %v2394_v59 = vsel %vm2354_vm4, %v7423_v55, -inf }
 0x51a   : > { %2395 = vmax.xlane.f32.xlu1 %v2394_v59  ;;  %v2400_v63 = vsel %vm2354_vm4, %v7425_v57, -inf }
 0x51b   : > { %2398 = vmax.xlane.f32.xlu2 %v2397_v61 }
 0x51e   : > { %2401 = vmax.xlane.f32.xlu0 %v2400_v63 }
 0x523   : > { %2368 = vmax.xlane.f32.xlu2 %v2367_v4 }
 0x526   : > { %2383 = vmax.xlane.f32.xlu0 %v2382_v6 }
 0x52b   : > { %2371 = vmax.xlane.f32.xlu2 %v2370_v8 }
 0x560   : > { %v2375_v9 = vpop.xlane.xlu0 %2374 }
 0x561   : > { %v2409_v10 = vsub.f32 %v7366_v5, %v2375_v9 }
 0x563   : > { %v2431_v11 = vmul.f32 1.442695, %v2409_v10 }
 0x565   : > { %5591 = vpow2.f32 %v2431_v11 }
 0x56b   : > { %v7449_v12 = vpop.eup %5591 }
 0x56c   : > { %v2469_v13 = vsel %vm2354_vm4, %v7449_v12, 0.0 }
 0x56d   : > { %2470 = vadd.xlane.f32.xlu2 %v2469_v13  ;;  %v2387_v16 = vpop.xlane.xlu1 %2386 }
 0x56e   : > { %v2413_v30 = vsub.f32 %v7372_v14, %v2387_v16 }
 0x570   : > { %v2439_v34 = vmul.f32 1.442695, %v2413_v30 }
 0x575   : > { %v2453_v17 = vpop.xlane.xlu1 %2452 }
 0x576   : > { %v2378_v18 = vpop.xlane.xlu2 %2377  ;;  %5593 = vrcp.f32 %v2453_v17 }
 0x577   : > { %v2410_v19 = vsub.f32 %v7382_v22, %v2378_v18 }
 0x579   : > { %v2433_v21 = vmul.f32 1.442695, %v2410_v19 }
 0x57b   : > { %5595 = vpow2.f32 %v2433_v21 }
 0x57c   : > { %v5594_v24 = vpop.eup %5593 }
 0x57d   : > { %v2515_v26 = vmul.f32 %v5594_v24, %v7380_v20  ;;  %v2366_v20 = vpop.xlane.xlu1 %2365 }
 0x57e   : > { %v2360_v5 = vpop.xlane.xlu2 %2359  ;;  %v2406_v37 = vsub.f32 %v7390_v29, %v2366_v20 }
 0x57f   : > { %v2404_v27 = vsub.f32 %v7392_v31, %v2360_v5  ;;  %5222 = vmatmul.msk.f32.vlgmr.msrb.gmra.mxu2 %vm2354_vm4, %v2515_v26 }
 0x580   : > { %2733 = vmatpush.msrb.mxu2 %v7307_v25  ;;  %v2425_v47 = vmul.f32 1.442695, %v2406_v37 }
 0x581   : > { %v7458_v28 = vpop.eup %5595  ;;  %v2421_v32 = vmul.f32 1.442695, %v2404_v27  ;;  %v2390_v33 = vpop.xlane.xlu0 %2389 }
 0x582   : > { %v2472_v22 = vsel %vm2354_vm4, %v7458_v28, 0.0  ;;  %v2414_v44 = vsub.f32 %v7401_v39, %v2390_v33 }
 0x583   : > { %5597 = vpow2.f32 %v2421_v32  ;;  %2473 = vadd.xlane.f32.xlu1 %v2472_v22 }
 0x584   : > { %5599 = vpow2.f32 %v2439_v34  ;;  %v2441_v49 = vmul.f32 1.442695, %v2414_v44 }
 0x585   : > { %v2381_v16 = vpop.xlane.xlu1 %2380 }
 0x586   : > { %v2393_v35 = vpop.xlane.xlu2 %2392  ;;  %v2411_v18 = vsub.f32 %v7406_v42, %v2381_v16 }
 0x587   : > { %v2415_v31 = vsub.f32 %v7403_v40, %v2393_v35 }
 0x588   : > { %v2435_v19 = vmul.f32 1.442695, %v2411_v18 }
 0x589   : > { %v7464_v36 = vpop.eup %5597  ;;  %v2443_v38 = vmul.f32 1.442695, %v2415_v31  ;;  %v2363_v41 = vpop.xlane.xlu0 %2362 }
 0x58a   : > { %v2405_v14 = vsub.f32 %v7412_v46, %v2363_v41  ;;  %v2454_v43 = vsel %vm2354_vm4, %v7464_v36, 0.0  ;;  %v7471_v48 = vpop.eup %5599 }
 0x58b   : > { %5601 = vpow2.f32 %v2443_v38  ;;  %2455 = vadd.xlane.f32.xlu2 %v2454_v43  ;;  %v2481_v51 = vsel %vm2354_vm4, %v7471_v48, 0.0 }
 0x58c   : > { %v2423_v45 = vmul.f32 1.442695, %v2405_v14  ;;  %v5536_v14 = vunpack.i.h.bf16 %v7358_v58 }
 0x58d   : > { %v2396_v42 = vpop.xlane.xlu1 %2395 }
 0x58e   : > { %5603 = vpow2.f32 %v2423_v45  ;;  %v2399_v40 = vpop.xlane.xlu2 %2398  ;;  %v2416_v30 = vsub.f32 %v7423_v55, %v2396_v42 }
 0x58f   : > { %5605 = vpow2.f32 %v2425_v47  ;;  %v2417_v29 = vsub.f32 %v7421_v54, %v2399_v40 }
 0x590   : > { %5607 = vpow2.f32 %v2441_v49 }
 0x591   : > { %v7473_v50 = vpop.eup %5601  ;;  %v2447_v52 = vmul.f32 1.442695, %v2417_v29  ;;  %v2402_v9 = vpop.xlane.xlu0 %2401 }
 0x592   : > { %v2487_v46 = vsel %vm2354_vm4, %v7473_v50, 0.0  ;;  %v2418_v11 = vsub.f32 %v7425_v57, %v2402_v9 }
 0x593   : > { %2488 = vadd.xlane.f32.xlu1 %v2487_v46  ;;  %2482 = vadd.xlane.f32.xlu2 %v2481_v51  ;;  %5609 = vpow2.f32 %v2447_v52 }
 0x594   : > { %v7480_v39 = vpop.eup %5603  ;;  %v2449_v17 = vmul.f32 1.442695, %v2418_v11 }
 0x595   : > { %v2457_v53 = vsel %vm2354_vm4, %v7480_v39, 0.0  ;;  %v7484_v59 = vpop.eup %5605 }
 0x596   : > { %2458 = vadd.xlane.f32.xlu0 %v2457_v53  ;;  %v2369_v56 = vpop.xlane.xlu2 %2368  ;;  %v7487_v61 = vpop.eup %5607  ;;  %v2460_v62 = vsel %vm2354_vm4, %v7484_v59, 0.0 }
 0x597   : > { %v2407_v54 = vsub.f32 %v7435_v1, %v2369_v56  ;;  %v2484_v63 = vsel %vm2354_vm4, %v7487_v61, 0.0 }
 0x599   : > { %v2427_v60 = vmul.f32 1.442695, %v2407_v54  ;;  %v7493_v3 = vpop.eup %5609  ;;  %v2384_v21 = vpop.xlane.xlu0 %2383 }
 0x59a   : > { %v2493_v6 = vsel %vm2354_vm4, %v7493_v3, 0.0  ;;  %v2412_v26 = vsub.f32 %v7437_v2, %v2384_v21  ;;  %v2445_v2 = vmul.f32 1.442695, %v2416_v30 }
 0x59b   : > { %5611 = vpow2.f32 %v2427_v60  ;;  %2461 = vadd.xlane.f32.xlu2 %v2460_v62 }
 0x59c   : > { %v2437_v5 = vmul.f32 1.442695, %v2412_v26 }
 0x59e   : > { %2485 = vadd.xlane.f32.xlu0 %v2484_v63  ;;  %v2372_v8 = vpop.xlane.xlu2 %2371 }
 0x59f   : > { %v2408_v10 = vsub.f32 %v7444_v7, %v2372_v8 }
 0x5a1   : > { %v7495_v4 = vpop.eup %5611  ;;  %v2429_v13 = vmul.f32 1.442695, %v2408_v10 }
 0x5a2   : > { %v2463_v1 = vsel %vm2354_vm4, %v7495_v4, 0.0 }
 0x5a3   : > { %2464 = vadd.xlane.f32.xlu1 %v2463_v1  ;;  %2494 = vadd.xlane.f32.xlu2 %v2493_v6  ;;  %5613 = vpow2.f32 %v2429_v13  ;;  %v5541_v1 = vunpack.i.h.bf16 %v7362_v0 }
 0x5a4   : > { %5615 = vpow2.f32 %v2449_v17 }
 0x5a5   : > { %5617 = vpow2.f32 %v2435_v19 }
 0x5a6   : > { %5619 = vpow2.f32 %v2437_v5 }
 0x5a7   : > { %5621 = vpow2.f32 %v2445_v2 }
 0x5a9   : > { %v7514_v24 = vpop.eup %5613 }
 0x5aa   : > { %v2466_v7 = vsel %vm2354_vm4, %v7514_v24, 0.0 }
 0x5b2   : > { %1899 = vrot.lane.b32.xlu0 %v7289_v23, %s6607_s4 }
 0x5ba   : > { %1889 = vrot.lane.b32.xlu0 %v7307_v25, %s6604_s7 }
 0x5bb   : > { %1877 = vrot.lane.b32.xlu2 %v7307_v25, %s6601_s6 }
 0x5bc   : > { %1893 = vrot.lane.b32.xlu1 %v7289_v23, %s6606_s15  ;;  %v7516_v23 = vpop.eup %5615 }
 0x5bd   : > { %v2496_v57 = vsel %vm2354_vm4, %v7516_v23, 0.0  ;;  %v7523_v27 = vpop.eup %5617 }
 0x5be   : > { %v2475_v32 = vsel %vm2354_vm4, %v7523_v27, 0.0  ;;  %v7528_v33 = vpop.eup %5619 }
 0x5bf   : > { %v2478_v22 = vsel %vm2354_vm4, %v7528_v33, 0.0  ;;  %v7532_v20 = vpop.eup %5621 }
 0x5c0   : > { %v2490_v35 = vsel %vm2354_vm4, %v7532_v20, 0.0 }
 0x5c3   : > { %1901 = vrot.lane.b32.xlu2 %v7307_v25, %s6607_s4 }
 0x5e0   : > { %v2471_v34 = vpop.xlane.xlu2 %2470 }
 0x5e4   : > { %2467 = vadd.xlane.f32.xlu0 %v2466_v7 }
 0x5e6   : > { %2497 = vadd.xlane.f32.xlu1 %v2496_v57 }
 0x5ec   : > { %2476 = vadd.xlane.f32.xlu0 %v2475_v32 }
 0x5f4   : > { %2479 = vadd.xlane.f32.xlu0 %v2478_v22 }
 0x5f6   : > { %v2474_v37 = vpop.xlane.xlu1 %2473 }
 0x5fc   : > { %2491 = vadd.xlane.f32.xlu0 %v2490_v35 }
 0x5fe   : > { %v2456_v55 = vpop.xlane.xlu2 %2455 }
 0x5ff   : > { %5623 = vrcp.f32 %v2456_v55 }
 0x605   : > { %v5624_v31 = vpop.eup %5623 }
 0x606   : > { %v2516_v38 = vmul.f32 %v5624_v31, %v7464_v36  ;;  %v2483_v41 = vpop.xlane.xlu2 %2482  ;;  %v2489_v44 = vpop.xlane.xlu1 %2488 }
 0x608   : > { %5223 = vmatmul.msk.f32.vlgmr.msrb.gmra.mxu3 %vm2354_vm4, %v2516_v38 }
 0x609   : > { %2756 = vmatpush.msrb.mxu3 %v5536_v14  ;;  %v2459_v43 = vpop.xlane.xlu0 %2458 }
 0x60a   : > { %5625 = vrcp.f32 %v2459_v43 }
 0x60e   : > { %v2462_v45 = vpop.xlane.xlu2 %2461 }
 0x60f   : > { %5627 = vrcp.f32 %v2462_v45 }
 0x610   : > { %v5626_v47 = vpop.eup %5625  ;;  %1895 = vrot.lane.b32.xlu0 %v7307_v25, %s6606_s15  ;;  %v5546_v25 = vunpack.i.h.bf16 %v7374_v15 }
 0x611   : > { %v2517_v40 = vmul.f32 %v5626_v47, %v7480_v39  ;;  %v2486_v46 = vpop.xlane.xlu0 %2485  ;;  %v2990_v47 = vld [vmem:[%s7172_s2 + $0x78] sm:$0xff] }
 0x613   : > { %5224 = vmatmul.msk.f32.vlgmr.msrb.gmra.mxu0 %vm2354_vm4, %v2517_v40  ;;  %v2989_v40 = vld [vmem:[%s7172_s2 + $0x70] sm:$0xff] }
 0x615   : > { %v5628_v36 = vpop.eup %5627 }
 0x616   : > { %v2518_v49 = vmul.f32 %v5628_v36, %v7484_v59  ;;  %v7544_v58 = vpop.xlane.xlu2 %2494  ;;  %v2465_v29 = vpop.xlane.xlu1 %2464  ;;  %v2988_v36 = vld [vmem:[%s7172_s2 + $0x68] sm:$0xff] }
 0x617   : > { %5629 = vrcp.f32 %v2465_v29  ;;  %v2985_v29 = vld [vmem:[%s7172_s2 + $0x50] sm:$0xff] }
 0x618   : > { %5225 = vmatmul.msk.f32.vlgmr.msra.gmra.mxu1 %vm2354_vm4, %v2518_v49  ;;  %5631 = vrcp.f32 %v2474_v37  ;;  %v2987_v49 = vld [vmem:[%s7172_s2 + $0x60] sm:$0xff] }
 0x619   : > { %5633 = vrcp.f32 %v2486_v46  ;;  %v2984_v46 = vld [vmem:[%s7172_s2 + $0x48] sm:$0xff] }
 0x61a   : > { %5635 = vrcp.f32 %v2471_v34 }
 0x61b   : > { %5637 = vrcp.f32 %v2483_v41 }
 0x61d   : > { %v5630_v51 = vpop.eup %5629 }
 0x61e   : > { %v1878_v52 = vpop.permute.xlu2 %1877  ;;  %v2519_v53 = vmul.f32 %v5630_v51, %v7495_v4  ;;  %v5632_v39 = vpop.eup %5631  ;;  %v2983_v51 = vld [vmem:[%s7172_s2 + $0x40] sm:$0xff] }
 0x61f   : > { %v2522_v59 = vmul.f32 %v5632_v39, %v7458_v28  ;;  %v5634_v60 = vpop.eup %5633  ;;  %v2979_v39 = vld [vmem:[%s7172_s2 + $0x20] sm:$0xff] }
 0x620   : > { %5226 = vmatmul.msk.f32.vlgmr.msra.gmra.mxu2 %vm2354_vm4, %v2519_v53  ;;  %v5636_v62 = vpop.eup %5635  ;;  %v2526_v15 = vmul.f32 %v5634_v60, %v7487_v61  ;;  %v2981_v53 = vld [vmem:[%s7172_s2 + $0x30] sm:$0xff]  ;;  %v2975_v60 = vld [vmem:[%s7172_s2] sm:$0xff] }
 0x621   : > { %2825 = vmatpush.msra.mxu2 %v5546_v25  ;;  %v2521_v63 = vmul.f32 %v5636_v62, %v7449_v12  ;;  %v5638_v28 = vpop.eup %5637  ;;  %v2980_v25 = vld [vmem:[%s7172_s2 + $0x28] sm:$0xff] }
 0x622   : > { %v2525_v6 = vmul.f32 %v5638_v28, %v7471_v48 }
 0x624   : > { %v1900_v56 = vpop.permute.xlu0 %1899 }
 0x625   : > { %2710 = vmatpush.msrb.mxu1 %v1900_v56  ;;  %v2978_v56 = vld [vmem:[%s7172_s2 + $0x18] sm:$0xff] }
 0x626   : > { %v1902_v54 = vpop.permute.xlu2 %1901  ;;  %5229 = vmatmul.msk.f32.vlgmr.msrb.gmra.mxu1 %vm2354_vm4, %v2522_v59  ;;  %v2977_v59 = vld [vmem:[%s7172_s2 + $0x10] sm:$0xff] }
 0x627   : > { %2802 = vmatpush.msra.mxu1 %v1878_v52  ;;  %v2982_v52 = vld [vmem:[%s7172_s2 + $0x38] sm:$0xff] }
 0x629   : > { %2894 = vmatpush.msrb.mxu1 %v1902_v54  ;;  %v2976_v54 = vld [vmem:[%s7172_s2 + $0x8] sm:$0xff] }
 0x62c   : > { %v1890_v8 = vpop.permute.xlu0 %1889 }
 0x62e   : > { %v1894_v4 = vpop.permute.xlu1 %1893  ;;  %5233 = vmatmul.msk.f32.vlgmr.msra.gmra.mxu1 %vm2354_vm4, %v2526_v15 }
 0x62f   : > { %2687 = vmatpush.msra.mxu0 %v1894_v4 }
 0x630   : > { %5228 = vmatmul.msk.f32.vlgmr.msra.gmra.mxu0 %vm2354_vm4, %v2521_v63 }
 0x631   : > { %2779 = vmatpush.msrb.mxu0 %v5541_v1 }
 0x638   : > { %5232 = vmatmul.msk.f32.vlgmr.msrb.gmra.mxu0 %vm2354_vm4, %v2525_v6 }
 0x657   : > { %v2468_v9 = vpop.xlane.xlu0 %2467 }
 0x658   : > { %5639 = vrcp.f32 %v2468_v9 }
 0x659   : > { %v2498_v61 = vpop.xlane.xlu1 %2497 }
 0x65a   : > { %5641 = vrcp.f32 %v2498_v61 }
 0x65e   : > { %v5640_v12 = vpop.eup %5639 }
 0x65f   : > { %v2520_v10 = vmul.f32 %v5640_v12, %v7514_v24  ;;  %v2477_v0 = vpop.xlane.xlu0 %2476 }
 0x660   : > { %v5642_v11 = vpop.eup %5641  ;;  %5643 = vrcp.f32 %v2477_v0 }
 0x661   : > { %v2530_v13 = vmul.f32 %v5642_v11, %v7516_v23  ;;  %5227 = vmatmul.msk.f32.vlgmr.msra.gmra.mxu3 %vm2354_vm4, %v2520_v10  ;;  %5645 = vrcp.f32 %v2489_v44 }
 0x662   : > { %2848 = vmatpush.msra.mxu3 %v1890_v8 }
 0x663   : > { %5237 = vmatmul.msk.f32.vlgmr.msrb.gmra.mxu1 %vm2354_vm4, %v2530_v13 }
 0x666   : > { %v5644_v48 = vpop.eup %5643 }
 0x667   : > { %v2523_v16 = vmul.f32 %v5644_v48, %v7523_v27  ;;  %v2480_v17 = vpop.xlane.xlu0 %2479  ;;  %v5646_v18 = vpop.eup %5645 }
 0x668   : > { %5647 = vrcp.f32 %v2480_v17  ;;  %v2527_v21 = vmul.f32 %v5646_v18, %v7473_v50 }
 0x669   : > { %5230 = vmatmul.msk.f32.vlgmr.msrb.gmra.mxu2 %vm2354_vm4, %v2523_v16 }
 0x66a   : > { %2995 = vmatpush.msrb.mxu2 %v2990_v47  ;;  %v3321_v47 = vld [vmem:[%s7177_s12 + $0x790] sm:$0xff] }
 0x66b   : > { %3417 = vmatpush.msra.mxu1 %v3321_v47  ;;  %v3096_v47 = vld [vmem:[%s7177_s12 + $0x88] sm:$0xff] }
 0x66c   : > { %2996 = vmatpush.msrb.mxu2 %v2989_v40  ;;  %v3322_v40 = vld [vmem:[%s7177_s12 + $0x798] sm:$0xff] }
 0x66e   : > { %v5648_v19 = vpop.eup %5647  ;;  %2997 = vmatpush.msrb.mxu2 %v2988_v36  ;;  %v3303_v36 = vld [vmem:[%s7177_s12 + $0x700] sm:$0xff] }
 0x66f   : > { %v2524_v24 = vmul.f32 %v5648_v19, %v7528_v33  ;;  %v2492_v23 = vpop.xlane.xlu0 %2491 }
 0x670   : > { %5649 = vrcp.f32 %v2492_v23  ;;  %2998 = vmatpush.msrb.mxu2 %v2987_v49  ;;  %v3304_v49 = vld [vmem:[%s7177_s12 + $0x708] sm:$0xff] }
 0x671   : > { %5231 = vmatmul.msk.f32.vlgmr.msrb.gmra.mxu3 %vm2354_vm4, %v2524_v24  ;;  %5234 = vmatmul.msk.f32.vlgmr.msra.gmra.mxu2 %vm2354_vm4, %v2527_v21  ;;  %5651 = vrcp.f32 %v7544_v58  ;;  %v2986_v58 = vld [vmem:[%s7172_s2 + $0x58] sm:$0xff] }
 0x672   : > { %2999 = vmatpush.msrb.mxu2 %v2986_v58  ;;  %v3305_v58 = vld [vmem:[%s7177_s12 + $0x710] sm:$0xff] }
 0x673   : > { %3418 = vmatpush.msra.mxu1 %v3305_v58  ;;  %v3079_v58 = vld [vmem:[%s7177_s12] sm:$0xff] }
 0x674   : > { %3000 = vmatpush.msrb.mxu2 %v2985_v29  ;;  %v3306_v29 = vld [vmem:[%s7177_s12 + $0x718] sm:$0xff] }
 0x676   : > { %v5650_v26 = vpop.eup %5649  ;;  %3001 = vmatpush.msrb.mxu2 %v2984_v46  ;;  %v3287_v46 = vld [vmem:[%s7177_s12 + $0x680] sm:$0xff] }
 0x677   : > { %v2528_v7 = vmul.f32 %v5650_v26, %v7532_v20  ;;  %v5652_v57 = vpop.eup %5651  ;;  %v7576_v20 = vpop.f32.mrf.mxu2 }
 0x678   : > { %v2529_v5 = vmul.f32 %v5652_v57, %v7493_v3  ;;  %3002 = vmatpush.msrb.mxu2 %v2983_v51  ;;  %v3288_v51 = vld [vmem:[%s7177_s12 + $0x688] sm:$0xff] }
 0x679   : > { %5235 = vmatmul.msk.f32.vlgmr.msra.gmra.mxu3 %vm2354_vm4, %v2528_v7 }
 0x67a   : > { %3003 = vmatpush.msrb.mxu2 %v2982_v52  ;;  %v3289_v52 = vld [vmem:[%s7177_s12 + $0x690] sm:$0xff] }
 0x67b   : > { %3419 = vmatpush.msra.mxu1 %v3289_v52  ;;  %v3323_v52 = vld [vmem:[%s7177_s12 + $0x7a0] sm:$0xff] }
 0x67c   : > { %3004 = vmatpush.msrb.mxu2 %v2981_v53  ;;  %v3290_v53 = vld [vmem:[%s7177_s12 + $0x698] sm:$0xff] }
 0x67e   : > { %3005 = vmatpush.msrb.mxu2 %v2980_v25 }
 0x680   : > { %3006 = vmatpush.msrb.mxu2 %v2979_v39  ;;  %v3271_v39 = vld [vmem:[%s7177_s12 + $0x600] sm:$0xff] }
 0x682   : > { %v1896_v42 = vpop.permute.xlu0 %1895  ;;  %3007 = vmatpush.msrb.mxu2 %v2978_v56  ;;  %v3272_v56 = vld [vmem:[%s7177_s12 + $0x608] sm:$0xff] }
 0x683   : > { %2871 = vmatpush.msra.mxu0 %v1896_v42 }
 0x684   : > { %5236 = vmatmul.msk.f32.vlgmr.msra.gmra.mxu0 %vm2354_vm4, %v2529_v5  ;;  %3008 = vmatpush.msrb.mxu2 %v2977_v59  ;;  %v3273_v59 = vld [vmem:[%s7177_s12 + $0x610] sm:$0xff] }
 0x685   : > { %3420 = vmatpush.msra.mxu1 %v3273_v59  ;;  %v3308_v59 = vld [vmem:[%s7177_s12 + $0x728] sm:$0xff] }
 0x686   : > { %3009 = vmatpush.msrb.mxu2 %v2976_v54  ;;  %v3274_v54 = vld [vmem:[%s7177_s12 + $0x618] sm:$0xff] }
 0x688   : > { %3010 = vmatpush.msrb.mxu2 %v2975_v60  ;;  %v3255_v60 = vld [vmem:[%s7177_s12 + $0x580] sm:$0xff] }
 0x68a   : > { %3440 = vmatpush.msra.mxu2 %v3322_v40  ;;  %v3097_v40 = vld [vmem:[%s7177_s12 + $0x90] sm:$0xff] }
 0x68b   : > { %v2574_v35 = vpop.f32.mrf.mxu3 }
 0x68c   : > { %3441 = vmatpush.msra.mxu2 %v3306_v29  ;;  %v3080_v29 = vld [vmem:[%s7177_s12 + $0x8] sm:$0xff] }
 0x68e   : > { %3442 = vmatpush.msra.mxu2 %v3290_v53  ;;  %v3324_v53 = vld [vmem:[%s7177_s12 + $0x7a8] sm:$0xff] }
 0x690   : > { %v2597_v30 = vpop.f32.mrf.mxu0  ;;  %3443 = vmatpush.msra.mxu2 %v3274_v54  ;;  %v3309_v54 = vld [vmem:[%s7177_s12 + $0x730] sm:$0xff] }
 0x695   : > { %v2620_v50 = vpop.f32.mrf.mxu1 }
 0x6a3   : > { %v2712_v27 = vpop.f32.mrf.mxu1  ;;  %v2643_v3 = vpop.f32.mrf.mxu2 }
 0x6ab   : > { %v2804_v32 = vpop.f32.mrf.mxu1 }
 0x6ac   : > { %v5552_v2 = vpack.i.bf16 %v2804_v32, %v2620_v50 }
 0x6ad   : > { %v2689_v33 = vpop.f32.mrf.mxu0 }
 0x6ae   : > { %5553 = vrot.lane.b32.xlu0 %v5552_v2, %s6604_s7  ;;  %v5583_v2 = vld [vmem:[%s1335_s24] ss:$0 sm:$0xff] }
 0x6b5   : > { %v2781_v22 = vpop.f32.mrf.mxu0 }
 0x6b6   : > { %v5547_v34 = vpack.i.bf16 %v2781_v22, %v2597_v30 }
 0x6b8   : > { %5548 = vrot.lane.b32.xlu2 %v5547_v34, %s6606_s15  ;;  %v5663_v34 = vld [vmem:[#allocation2] sm:$0xff] }
 0x6e0   : > { %v2896_v45 = vpop.f32.mrf.mxu1 }
 0x6e4   : > { %v2666_v55 = vpop.f32.mrf.mxu3 }
 0x6e5   : > { %2933 = vrot.lane.b32.xlu2 %v2666_v55, %s6601_s6  ;;  %v5664_v55 = vld [vmem:[#allocation2 + $0x8] sm:$0xff] }
 0x6ec   : > { %v7579_v31 = vpop.f32.mrf.mxu2 }
 0x6ed   : > { %2949 = vrot.lane.b32.xlu2 %v2712_v27, %s6603_s10 }
 0x6f4   : > { %v2758_v37 = vpop.f32.mrf.mxu3  ;;  %v2827_v38 = vpop.f32.mrf.mxu2 }
 0x6f5   : > { %v5557_v41 = vpack.i.bf16 %v2758_v37, %v2574_v35  ;;  %v5562_v14 = vpack.i.bf16 %v2827_v38, %v2643_v3  ;;  %v6608_v37 = vmov 128.0  }
 0x6f6   : > { %5653 = vrcp.f32 %v6608_v37  ;;  %v3111_v37 = vld [vmem:[%s7177_s12 + $0x100] sm:$0xff] }
 0x6f7   : > { %5558 = vrot.lane.b32.xlu0 %v5557_v41, %s6607_s4  ;;  %5563 = vrot.lane.b32.xlu1 %v5562_v14, %s6605_s22 }
 0x6fc   : > { %v2850_v44 = vpop.f32.mrf.mxu3  ;;  %v5654_v38 = vpop.eup %5653 }
 0x6fd   : > { %v3027_v41 = vmul.f32 128.0, %v5654_v38  ;;  %vm3031_vm11 = vweird.f32 %v5654_v38 }
 0x6ff   : > { %2941 = vrot.lane.b32.xlu0 %v2689_v33, %s6602_s16  ;;  %v3028_v14 = vsub.f32 1.0, %v3027_v41  ;;  %v3112_v41 = vld [vmem:[%s7177_s12 + $0x108] sm:$0xff] }
 0x701   : > { %v2873_v43 = vpop.f32.mrf.mxu0 }
 0x702   : > { %2943 = vrot.lane.b32.xlu2 %v2873_v43, %s6602_s16  ;;  %v3029_v43 = vmul.f32 %v5654_v38, %v3028_v14  ;;  %v3113_v14 = vld [vmem:[%s7177_s12 + $0x110] sm:$0xff] }
 0x704   : > { %v3030_v25 = vadd.f32 %v5654_v38, %v3029_v43 }
 0x707   : > { %2935 = vrot.lane.b32.xlu0 %v2850_v44, %s6601_s6  ;;  %v3319_v44 = vld [vmem:[%s7177_s12 + $0x780] sm:$0xff] }
 0x708   : > { %3371 = vmatpush.msrb.mxu3 %v3319_v44  ;;  %v3114_v44 = vld [vmem:[%s7177_s12 + $0x118] sm:$0xff] }
 0x70a   : > { %3372 = vmatpush.msrb.mxu3 %v3303_v36 }
 0x70c   : > { %3373 = vmatpush.msrb.mxu3 %v3287_v46 }
 0x70e   : > { %3374 = vmatpush.msrb.mxu3 %v3271_v39  ;;  %v3326_v39 = vld [vmem:[%s7177_s12 + $0x7b8] sm:$0xff] }
 0x70f   : > { %2951 = vrot.lane.b32.xlu0 %v2896_v45, %s6603_s10  ;;  %v3320_v45 = vld [vmem:[%s7177_s12 + $0x788] sm:$0xff] }
 0x710   : > { %3394 = vmatpush.msrb.mxu0 %v3320_v45  ;;  %3375 = vmatpush.msrb.mxu3 %v3255_v60  ;;  %v3095_v45 = vld [vmem:[%s7177_s12 + $0x80] sm:$0xff]  ;;  %v3310_v60 = vld [vmem:[%s7177_s12 + $0x738] sm:$0xff] }
 0x712   : > { %v5549_v62 = vpop.permute.xlu2 %5548  ;;  %3395 = vmatpush.msrb.mxu0 %v3304_v49  ;;  %v3098_v49 = vld [vmem:[%s7177_s12 + $0x98] sm:$0xff] }
 0x713   : > { %v5550_v6 = vunpack.i.l.bf16 %v5549_v62  ;;  %v5551_v21 = vunpack.i.h.bf16 %v5549_v62  ;;  %v3256_v62 = vld [vmem:[%s7177_s12 + $0x588] sm:$0xff] }
 0x714   : > { %3396 = vmatpush.msrb.mxu0 %v3288_v51  ;;  %v3081_v51 = vld [vmem:[%s7177_s12 + $0x10] sm:$0xff] }
 0x716   : > { %3397 = vmatpush.msrb.mxu0 %v3272_v56  ;;  %v3307_v56 = vld [vmem:[%s7177_s12 + $0x720] sm:$0xff] }
 0x718   : > { %3398 = vmatpush.msrb.mxu0 %v3256_v62  ;;  %v3291_v62 = vld [vmem:[%s7177_s12 + $0x6a0] sm:$0xff] }
 0x720   : > { %v5554_v15 = vpop.permute.xlu0 %5553 }
 0x721   : > { %v5555_v8 = vunpack.i.l.bf16 %v5554_v15  ;;  %v5556_v23 = vunpack.i.h.bf16 %v5554_v15  ;;  %v3257_v15 = vld [vmem:[%s7177_s12 + $0x590] sm:$0xff] }
 0x722   : > { %3421 = vmatpush.msra.mxu1 %v3257_v15  ;;  %v3292_v15 = vld [vmem:[%s7177_s12 + $0x6a8] sm:$0xff] }
 0x73f   : > { %v2934_v63 = vpop.permute.xlu2 %2933 }
 0x747   : > { %v2950_v16 = vpop.permute.xlu2 %2949 }
 0x75c   : > { %v2944_v50 = vpop.permute.xlu2 %2943 }
 0x769   : > { %v5559_v4 = vpop.permute.xlu0 %5558  ;;  %v5564_v28 = vpop.permute.xlu1 %5563 }
 0x76a   : > { %v5560_v1 = vunpack.i.l.bf16 %v5559_v4  ;;  %v5565_v12 = vunpack.i.l.bf16 %v5564_v28  ;;  %v5561_v11 = vunpack.i.h.bf16 %v5559_v4  ;;  %v5566_v57 = vunpack.i.h.bf16 %v5564_v28  ;;  %v3240_v28 = vld [vmem:[%s7177_s12 + $0x508] sm:$0xff] }
 0x76b   : > { %v7648_v4 = vsel %vm3031_vm11, %v5654_v38, %v3030_v25  ;;  %3399 = vmatpush.msrb.mxu0 %v3240_v28  ;;  %v3325_v25 = vld [vmem:[%s7177_s12 + $0x7b0] sm:$0xff]  ;;  %v3275_v28 = vld [vmem:[%s7177_s12 + $0x620] sm:$0xff] }
 0x76c   : > { %v2955_v9 = vsel %vm1969_vm3, %v7576_v20, %v5560_v1  ;;  %v2956_v19 = vsel %vm1969_vm3, %v7579_v31, %v5561_v11  ;;  %v3239_v1 = vld [vmem:[%s7177_s12 + $0x500] sm:$0xff]  ;;  %v3226_v11 = vld [vmem:[%s7177_s12 + $0x498] sm:$0xff] }
 0x76d   : > { %v2958_v61 = vsel %vm2957_vm5, %v2955_v9, %v5550_v6  ;;  %v2959_v24 = vsel %vm2957_vm5, %v2956_v19, %v5551_v21  ;;  %v3241_v6 = vld [vmem:[%s7177_s12 + $0x510] sm:$0xff]  ;;  %3376 = vmatpush.msrb.mxu3 %v3239_v1  ;;  %v3191_v19 = vld [vmem:[%s7177_s12 + $0x380] sm:$0xff]  ;;  %v3294_v1 = vld [vmem:[%s7177_s12 + $0x6b8] sm:$0xff] }
 0x76e   : > { %v2961_v10 = vsel %vm2960_vm6, %v2958_v61, %v5555_v8  ;;  %v2962_v7 = vsel %vm2960_vm6, %v2959_v24, %v5556_v23  ;;  %v3242_v8 = vld [vmem:[%s7177_s12 + $0x518] sm:$0xff]  ;;  %v3223_v61 = vld [vmem:[%s7177_s12 + $0x480] sm:$0xff]  ;;  %3422 = vmatpush.msra.mxu1 %v3241_v6  ;;  %v3192_v24 = vld [vmem:[%s7177_s12 + $0x388] sm:$0xff] }
 0x76f   : > { %v2964_v0 = vsel %vm2963_vm7, %v2961_v10, %v5565_v12  ;;  %v2965_v5 = vsel %vm2963_vm7, %v2962_v7, %v5566_v57  ;;  %v3224_v12 = vld [vmem:[%s7177_s12 + $0x488] sm:$0xff]  ;;  %3377 = vmatpush.msrb.mxu3 %v3223_v61  ;;  %v3193_v23 = vld [vmem:[%s7177_s12 + $0x390] sm:$0xff]  ;;  %v3175_v7 = vld [vmem:[%s7177_s12 + $0x300] sm:$0xff] }
 0x770   : > { %v2967_v13 = vsel %vm2966_vm8, %v2964_v0, %v2934_v63  ;;  %v3258_v63 = vld [vmem:[%s7177_s12 + $0x598] sm:$0xff]  ;;  %v3225_v0 = vld [vmem:[%s7177_s12 + $0x490] sm:$0xff]  ;;  %3400 = vmatpush.msrb.mxu0 %v3224_v12  ;;  %v3176_v57 = vld [vmem:[%s7177_s12 + $0x308] sm:$0xff] }
 0x771   : > { %v2942_v48 = vpop.permute.xlu0 %2941  ;;  %3444 = vmatpush.msra.mxu2 %v3258_v63  ;;  %3423 = vmatpush.msra.mxu1 %v3225_v0  ;;  %v3293_v63 = vld [vmem:[%s7177_s12 + $0x6b0] sm:$0xff]  ;;  %v3276_v6 = vld [vmem:[%s7177_s12 + $0x628] sm:$0xff]  ;;  %v3259_v61 = vld [vmem:[%s7177_s12 + $0x5a0] sm:$0xff] }
 0x772   : > { %v2970_v17 = vsel %vm2969_vm9, %v2967_v13, %v2942_v48  ;;  %v3207_v13 = vld [vmem:[%s7177_s12 + $0x400] sm:$0xff]  ;;  %v3208_v48 = vld [vmem:[%s7177_s12 + $0x408] sm:$0xff]  ;;  %v3262_v0 = vld [vmem:[%s7177_s12 + $0x5b8] sm:$0xff] }
 0x773   : > { %v2973_v18 = vsel %vm2972_vm10, %v2970_v17, %v2950_v16  ;;  %3445 = vmatpush.msra.mxu2 %v3242_v8  ;;  %v3209_v17 = vld [vmem:[%s7177_s12 + $0x410] sm:$0xff]  ;;  %3378 = vmatpush.msrb.mxu3 %v3207_v13  ;;  %v3260_v12 = vld [vmem:[%s7177_s12 + $0x5a8] sm:$0xff] }
 0x774   : > { %3011 = vmatmul.f32.vlgmr.msrb.gmra.mxu2 %v2973_v18  ;;  %v3210_v18 = vld [vmem:[%s7177_s12 + $0x418] sm:$0xff]  ;;  %3401 = vmatpush.msrb.mxu0 %v3208_v48  ;;  %v3277_v8 = vld [vmem:[%s7177_s12 + $0x630] sm:$0xff]  ;;  %v3244_v13 = vld [vmem:[%s7177_s12 + $0x528] sm:$0xff] }
 0x775   : > { %3446 = vmatpush.msra.mxu2 %v3226_v11  ;;  %3424 = vmatpush.msra.mxu1 %v3209_v17  ;;  %v3243_v11 = vld [vmem:[%s7177_s12 + $0x520] sm:$0xff]  ;;  %v3245_v48 = vld [vmem:[%s7177_s12 + $0x530] sm:$0xff]  ;;  %v3246_v17 = vld [vmem:[%s7177_s12 + $0x538] sm:$0xff] }
 0x776   : > { %3379 = vmatpush.msrb.mxu3 %v3191_v19  ;;  %3402 = vmatpush.msrb.mxu0 %v3192_v24  ;;  %v3228_v19 = vld [vmem:[%s7177_s12 + $0x4a8] sm:$0xff]  ;;  %v3230_v24 = vld [vmem:[%s7177_s12 + $0x4b8] sm:$0xff] }
 0x777   : > { %3447 = vmatpush.msra.mxu2 %v3210_v18  ;;  %3425 = vmatpush.msra.mxu1 %v3193_v23  ;;  %v3227_v18 = vld [vmem:[%s7177_s12 + $0x4a0] sm:$0xff] }
 0x778   : > { %3380 = vmatpush.msrb.mxu3 %v3175_v7  ;;  %3403 = vmatpush.msrb.mxu0 %v3176_v57  ;;  %v3211_v23 = vld [vmem:[%s7177_s12 + $0x420] sm:$0xff]  ;;  %v3213_v7 = vld [vmem:[%s7177_s12 + $0x430] sm:$0xff]  ;;  %v3214_v57 = vld [vmem:[%s7177_s12 + $0x438] sm:$0xff] }
 0x779   : > { %v2936_v26 = vpop.permute.xlu0 %2935 }
 0x77a   : > { %v2968_v42 = vsel %vm2966_vm8, %v2965_v5, %v2936_v26  ;;  %v3194_v26 = vld [vmem:[%s7177_s12 + $0x398] sm:$0xff]  ;;  %v3177_v5 = vld [vmem:[%s7177_s12 + $0x310] sm:$0xff] }
 0x77b   : > { %v2971_v30 = vsel %vm2969_vm9, %v2968_v42, %v2944_v50  ;;  %v3178_v42 = vld [vmem:[%s7177_s12 + $0x318] sm:$0xff]  ;;  %v3159_v50 = vld [vmem:[%s7177_s12 + $0x280] sm:$0xff]  ;;  %3448 = vmatpush.msra.mxu2 %v3194_v26  ;;  %3426 = vmatpush.msra.mxu1 %v3177_v5  ;;  %v3212_v26 = vld [vmem:[%s7177_s12 + $0x428] sm:$0xff] }
 0x77c   : > { %3381 = vmatpush.msrb.mxu3 %v3159_v50  ;;  %v3195_v5 = vld [vmem:[%s7177_s12 + $0x3a0] sm:$0xff]  ;;  %v3197_v50 = vld [vmem:[%s7177_s12 + $0x3b0] sm:$0xff] }
 0x77d   : > { %3449 = vmatpush.msra.mxu2 %v3178_v42  ;;  %v3196_v42 = vld [vmem:[%s7177_s12 + $0x3a8] sm:$0xff] }
 0x781   : > { %v2952_v27 = vpop.permute.xlu0 %2951 }
 0x782   : > { %v2974_v32 = vsel %vm2972_vm10, %v2971_v30, %v2952_v27  ;;  %v3160_v27 = vld [vmem:[%s7177_s12 + $0x288] sm:$0xff]  ;;  %v3161_v30 = vld [vmem:[%s7177_s12 + $0x290] sm:$0xff] }
 0x783   : > { %3014 = vmatmul.f32.gmra.mxu2 %v2974_v32  ;;  %v3162_v32 = vld [vmem:[%s7177_s12 + $0x298] sm:$0xff]  ;;  %3404 = vmatpush.msrb.mxu0 %v3160_v27 }
 0x784   : > { %3427 = vmatpush.msra.mxu1 %v3161_v30  ;;  %3450 = vmatpush.msra.mxu2 %v3162_v32  ;;  %v3198_v27 = vld [vmem:[%s7177_s12 + $0x3b8] sm:$0xff]  ;;  %v3179_v30 = vld [vmem:[%s7177_s12 + $0x320] sm:$0xff]  ;;  %v3180_v32 = vld [vmem:[%s7177_s12 + $0x328] sm:$0xff] }
 0x7f7   : > { %v3012_v33 = vpop.f32.mrf.mxu2 }
 0x7f8   : > { %v3013_v22 = vadd.f32 %v5583_v2, %v3012_v33  ;;  %v3144_v33 = vld [vmem:[%s7177_s12 + $0x208] sm:$0xff] }
 0x7f9   : > { %3405 = vmatpush.msrb.mxu0 %v3144_v33  ;;  %v3182_v33 = vld [vmem:[%s7177_s12 + $0x338] sm:$0xff] }
 0x7fa   : > { %v7622_v20 = vadd.f32 %v5663_v34, %v3013_v22  ;;  %v3145_v22 = vld [vmem:[%s7177_s12 + $0x210] sm:$0xff]  ;;  %v3146_v34 = vld [vmem:[%s7177_s12 + $0x218] sm:$0xff] }
 0x7fb   : > { %3428 = vmatpush.msra.mxu1 %v3145_v22  ;;  %3451 = vmatpush.msra.mxu2 %v3146_v34  ;;  %v3163_v22 = vld [vmem:[%s7177_s12 + $0x2a0] sm:$0xff]  ;;  %v3164_v34 = vld [vmem:[%s7177_s12 + $0x2a8] sm:$0xff] }
 0x7fc   : > { %3022 = vadd.xlane.f32.xlu1 %v7622_v20 }
 0x806   : > { %v3015_v35 = vpop.f32.mrf.mxu2 }
 0x807   : > { %v3016_v3 = vadd.f32 %v5583_v2, %v3015_v35  ;;  %v3143_v2 = vld [vmem:[%s7177_s12 + $0x200] sm:$0xff]  ;;  %v3128_v35 = vld [vmem:[%s7177_s12 + $0x188] sm:$0xff] }
 0x808   : > { %3382 = vmatpush.msrb.mxu3 %v3143_v2  ;;  %3406 = vmatpush.msrb.mxu0 %v3128_v35  ;;  %v3181_v2 = vld [vmem:[%s7177_s12 + $0x330] sm:$0xff]  ;;  %v3166_v35 = vld [vmem:[%s7177_s12 + $0x2b8] sm:$0xff] }
 0x809   : > { %v7625_v31 = vadd.f32 %v5664_v55, %v3016_v3  ;;  %v3129_v3 = vld [vmem:[%s7177_s12 + $0x190] sm:$0xff]  ;;  %v3130_v55 = vld [vmem:[%s7177_s12 + $0x198] sm:$0xff] }
 0x80a   : > { %3429 = vmatpush.msra.mxu1 %v3129_v3  ;;  %3452 = vmatpush.msra.mxu2 %v3130_v55  ;;  %v3147_v3 = vld [vmem:[%s7177_s12 + $0x220] sm:$0xff]  ;;  %v3148_v55 = vld [vmem:[%s7177_s12 + $0x228] sm:$0xff] }
 0x80b   : > { %3024 = vadd.xlane.f32.xlu2 %v7625_v31  ;;  %3407 = vmatpush.msrb.mxu0 %v3112_v41  ;;  %v3131_v41 = vld [vmem:[%s7177_s12 + $0x1a0] sm:$0xff] }
 0x80c   : > { %3430 = vmatpush.msra.mxu1 %v3113_v14  ;;  %3453 = vmatpush.msra.mxu2 %v3114_v44  ;;  %v3132_v14 = vld [vmem:[%s7177_s12 + $0x1a8] sm:$0xff]  ;;  %v3134_v44 = vld [vmem:[%s7177_s12 + $0x1b8] sm:$0xff] }
 0x80d   : > { %3408 = vmatpush.msrb.mxu0 %v3096_v47  ;;  %v3116_v47 = vld [vmem:[%s7177_s12 + $0x128] sm:$0xff] }
 0x80e   : > { %3431 = vmatpush.msra.mxu1 %v3097_v40  ;;  %3454 = vmatpush.msra.mxu2 %v3098_v49  ;;  %v3117_v40 = vld [vmem:[%s7177_s12 + $0x130] sm:$0xff]  ;;  %v3118_v49 = vld [vmem:[%s7177_s12 + $0x138] sm:$0xff] }
 0x80f   : > { %3409 = vmatpush.msrb.mxu0 %v3080_v29  ;;  %v3100_v29 = vld [vmem:[%s7177_s12 + $0xa8] sm:$0xff] }
 0x810   : > { %3432 = vmatpush.msra.mxu1 %v3081_v51  ;;  %v3102_v51 = vld [vmem:[%s7177_s12 + $0xb8] sm:$0xff] }
 0x811   : > { %3486 = vmatpush.msra.mxu0 %v3324_v53  ;;  %v3085_v53 = vld [vmem:[%s7177_s12 + $0x30] sm:$0xff] }
 0x812   : > { %3509 = vmatpush.msrb.mxu1 %v3325_v25  ;;  %v3086_v25 = vld [vmem:[%s7177_s12 + $0x38] sm:$0xff] }
 0x813   : > { %3487 = vmatpush.msra.mxu0 %v3308_v59 }
 0x814   : > { %3510 = vmatpush.msrb.mxu1 %v3309_v54 }
 0x815   : > { %3488 = vmatpush.msra.mxu0 %v3292_v15 }
 0x816   : > { %3511 = vmatpush.msrb.mxu1 %v3293_v63 }
 0x817   : > { %3489 = vmatpush.msra.mxu0 %v3276_v6 }
 0x818   : > { %3512 = vmatpush.msrb.mxu1 %v3277_v8 }
 0x819   : > { %3490 = vmatpush.msra.mxu0 %v3260_v12  ;;  %v7778_v12 = vld [vmem:[%s1353_s14] ss:$0 sm:$0xff] }
 0x81b   : > { %3491 = vmatpush.msra.mxu0 %v3244_v13 }
 0x81d   : > { %3492 = vmatpush.msra.mxu0 %v3228_v19 }
 0x81f   : > { %3493 = vmatpush.msra.mxu0 %v3212_v26 }
 0x821   : > { %3494 = vmatpush.msra.mxu0 %v3196_v42  ;;  %v3296_v42 = vld [vmem:[%s7177_s12 + $0x6c8] sm:$0xff] }
 0x823   : > { %3495 = vmatpush.msra.mxu0 %v3180_v32  ;;  %v3279_v32 = vld [vmem:[%s7177_s12 + $0x640] sm:$0xff] }
 0x825   : > { %3496 = vmatpush.msra.mxu0 %v3164_v34  ;;  %v3282_v34 = vld [vmem:[%s7177_s12 + $0x658] sm:$0xff] }
 0x827   : > { %3497 = vmatpush.msra.mxu0 %v3148_v55  ;;  %v3265_v55 = vld [vmem:[%s7177_s12 + $0x5d0] sm:$0xff] }
 0x829   : > { %3498 = vmatpush.msra.mxu0 %v3132_v14  ;;  %v3248_v14 = vld [vmem:[%s7177_s12 + $0x548] sm:$0xff] }
 0x82b   : > { %3499 = vmatpush.msra.mxu0 %v3116_v47  ;;  %v3231_v47 = vld [vmem:[%s7177_s12 + $0x4c0] sm:$0xff] }
 0x82d   : > { %3500 = vmatpush.msra.mxu0 %v3100_v29  ;;  %v3216_v29 = vld [vmem:[%s7177_s12 + $0x448] sm:$0xff] }
 0x86f   : > { %v3023_v9 = vpop.xlane.xlu1 %3022 }
 0x870   : > { %v3033_v10 = vmul.f32 %v7648_v4, %v3023_v9  ;;  %v3278_v9 = vld [vmem:[%s7177_s12 + $0x638] sm:$0xff] }
 0x872   : > { %v7662_v16 = vsub.f32 %v7622_v20, %v3033_v10  ;;  %v3127_v20 = vld [vmem:[%s7177_s12 + $0x180] sm:$0xff]  ;;  %v3261_v10 = vld [vmem:[%s7177_s12 + $0x5b0] sm:$0xff] }
 0x873   : > { %3383 = vmatpush.msrb.mxu3 %v3127_v20  ;;  %3513 = vmatpush.msrb.mxu1 %v3261_v10  ;;  %v3165_v20 = vld [vmem:[%s7177_s12 + $0x2b0] sm:$0xff] }
 0x874   : > { %v3037_v21 = vmul.f32 %v7662_v16, %v7662_v16 }
 0x875   : > { %3384 = vmatpush.msrb.mxu3 %v3111_v37  ;;  %3514 = vmatpush.msrb.mxu1 %v3245_v48  ;;  %v3149_v37 = vld [vmem:[%s7177_s12 + $0x230] sm:$0xff] }
 0x876   : > { %3039 = vadd.xlane.f32.xlu0 %v3037_v21  ;;  %v3229_v21 = vld [vmem:[%s7177_s12 + $0x4b0] sm:$0xff] }
 0x877   : > { %3385 = vmatpush.msrb.mxu3 %v3095_v45  ;;  %3515 = vmatpush.msrb.mxu1 %v3229_v21  ;;  %v3115_v45 = vld [vmem:[%s7177_s12 + $0x120] sm:$0xff]  ;;  %v3329_v21 = vld [vmem:[%s7177_s12 + $0x7d0] sm:$0xff] }
 0x879   : > { %3386 = vmatpush.msrb.mxu3 %v3079_v58  ;;  %3516 = vmatpush.msrb.mxu1 %v3213_v7  ;;  %v3099_v58 = vld [vmem:[%s7177_s12 + $0xa0] sm:$0xff]  ;;  %v3313_v7 = vld [vmem:[%s7177_s12 + $0x750] sm:$0xff] }
 0x87b   : > { %3463 = vmatpush.msra.mxu3 %v3323_v52  ;;  %3517 = vmatpush.msrb.mxu1 %v3197_v50  ;;  %v3084_v52 = vld [vmem:[%s7177_s12 + $0x28] sm:$0xff] }
 0x87c   : > { %3501 = vmatpush.msra.mxu0 %v3084_v52  ;;  %v3199_v52 = vld [vmem:[%s7177_s12 + $0x3c0] sm:$0xff] }
 0x87d   : > { %3464 = vmatpush.msra.mxu3 %v3307_v56  ;;  %3518 = vmatpush.msrb.mxu1 %v3181_v2  ;;  %v3280_v2 = vld [vmem:[%s7177_s12 + $0x648] sm:$0xff] }
 0x87e   : > { %v3025_v38 = vpop.xlane.xlu2 %3024 }
 0x87f   : > { %v3034_v43 = vmul.f32 %v7648_v4, %v3025_v38  ;;  %3465 = vmatpush.msra.mxu3 %v3291_v62  ;;  %3519 = vmatpush.msrb.mxu1 %v3165_v20  ;;  %v3150_v38 = vld [vmem:[%s7177_s12 + $0x238] sm:$0xff]  ;;  %v3263_v20 = vld [vmem:[%s7177_s12 + $0x5c0] sm:$0xff] }
 0x881   : > { %v7697_v36 = vsub.f32 %v7625_v31, %v3034_v43  ;;  %v3082_v31 = vld [vmem:[%s7177_s12 + $0x18] sm:$0xff]  ;;  %3466 = vmatpush.msra.mxu3 %v3275_v28  ;;  %3520 = vmatpush.msrb.mxu1 %v3149_v37  ;;  %v3133_v43 = vld [vmem:[%s7177_s12 + $0x1b0] sm:$0xff] }
 0x882   : > { %3455 = vmatpush.msra.mxu2 %v3082_v31  ;;  %v3083_v31 = vld [vmem:[%s7177_s12 + $0x20] sm:$0xff]  ;;  %v3266_v37 = vld [vmem:[%s7177_s12 + $0x5d8] sm:$0xff] }
 0x883   : > { %v3038_v46 = vmul.f32 %v7697_v36, %v7697_v36  ;;  %3467 = vmatpush.msra.mxu3 %v3259_v61  ;;  %3521 = vmatpush.msrb.mxu1 %v3133_v43  ;;  %v3249_v43 = vld [vmem:[%s7177_s12 + $0x550] sm:$0xff] }
 0x884   : > { %3532 = vmatpush.msrb.mxu2 %v3326_v39 }
 0x885   : > { %3041 = vadd.xlane.f32.xlu1 %v3038_v46  ;;  %3468 = vmatpush.msra.mxu3 %v3243_v11  ;;  %v3101_v46 = vld [vmem:[%s7177_s12 + $0xb0] sm:$0xff] }
 0x886   : > { %3533 = vmatpush.msrb.mxu2 %v3310_v60  ;;  %3522 = vmatpush.msrb.mxu1 %v3117_v40  ;;  %v3233_v40 = vld [vmem:[%s7177_s12 + $0x4d0] sm:$0xff] }
 0x887   : > { %3469 = vmatpush.msra.mxu3 %v3227_v18  ;;  %v3328_v18 = vld [vmem:[%s7177_s12 + $0x7c8] sm:$0xff] }
 0x888   : > { %3534 = vmatpush.msrb.mxu2 %v3294_v1  ;;  %3523 = vmatpush.msrb.mxu1 %v3101_v46 }
 0x889   : > { %3470 = vmatpush.msra.mxu3 %v3211_v23  ;;  %v3312_v23 = vld [vmem:[%s7177_s12 + $0x748] sm:$0xff] }
 0x88a   : > { %3535 = vmatpush.msrb.mxu2 %v3278_v9  ;;  %3524 = vmatpush.msrb.mxu1 %v3085_v53  ;;  %v7774_v9 = vld [vmem:[%s1344_s26] ss:$0 sm:$0xff] }
 0x88b   : > { %3471 = vmatpush.msra.mxu3 %v3195_v5  ;;  %v3295_v5 = vld [vmem:[%s7177_s12 + $0x6c0] sm:$0xff]  ;;  %v3200_v53 = vld [vmem:[%s7177_s12 + $0x3c8] sm:$0xff] }
 0x88c   : > { %3536 = vmatpush.msrb.mxu2 %v3262_v0 }
 0x88d   : > { %3472 = vmatpush.msra.mxu3 %v3179_v30  ;;  %v3298_v30 = vld [vmem:[%s7177_s12 + $0x6d8] sm:$0xff] }
 0x88e   : > { %3537 = vmatpush.msrb.mxu2 %v3246_v17  ;;  %v3327_v17 = vld [vmem:[%s7177_s12 + $0x7c0] sm:$0xff] }
 0x88f   : > { %3473 = vmatpush.msra.mxu3 %v3163_v22  ;;  %v3281_v22 = vld [vmem:[%s7177_s12 + $0x650] sm:$0xff] }
 0x890   : > { %3538 = vmatpush.msrb.mxu2 %v3230_v24  ;;  %v3311_v24 = vld [vmem:[%s7177_s12 + $0x740] sm:$0xff] }
 0x891   : > { %3474 = vmatpush.msra.mxu3 %v3147_v3 }
 0x892   : > { %3539 = vmatpush.msrb.mxu2 %v3214_v57  ;;  %v3314_v57 = vld [vmem:[%s7177_s12 + $0x758] sm:$0xff] }
 0x893   : > { %3475 = vmatpush.msra.mxu3 %v3131_v41  ;;  %v3247_v41 = vld [vmem:[%s7177_s12 + $0x540] sm:$0xff] }
 0x894   : > { %3540 = vmatpush.msrb.mxu2 %v3198_v27  ;;  %v3297_v27 = vld [vmem:[%s7177_s12 + $0x6d0] sm:$0xff] }
 0x895   : > { %3476 = vmatpush.msra.mxu3 %v3115_v45 }
 0x896   : > { %3541 = vmatpush.msrb.mxu2 %v3182_v33 }
 0x897   : > { %3477 = vmatpush.msra.mxu3 %v3099_v58  ;;  %v3215_v58 = vld [vmem:[%s7177_s12 + $0x440] sm:$0xff] }
 0x898   : > { %3542 = vmatpush.msrb.mxu2 %v3166_v35  ;;  %v3264_v35 = vld [vmem:[%s7177_s12 + $0x5c8] sm:$0xff] }
 0x899   : > { %3478 = vmatpush.msra.mxu3 %v3083_v31  ;;  %v3218_v31 = vld [vmem:[%s7177_s12 + $0x458] sm:$0xff] }
 0x89a   : > { %3543 = vmatpush.msrb.mxu2 %v3150_v38 }
 0x89c   : > { %3544 = vmatpush.msrb.mxu2 %v3134_v44  ;;  %v3250_v44 = vld [vmem:[%s7177_s12 + $0x558] sm:$0xff] }
 0x89e   : > { %3545 = vmatpush.msrb.mxu2 %v3118_v49  ;;  %v3234_v49 = vld [vmem:[%s7177_s12 + $0x4d8] sm:$0xff] }
 0x8a0   : > { %3546 = vmatpush.msrb.mxu2 %v3102_v51  ;;  %v3217_v51 = vld [vmem:[%s7177_s12 + $0x450] sm:$0xff] }
 0x8a2   : > { %3547 = vmatpush.msrb.mxu2 %v3086_v25  ;;  %v3201_v25 = vld [vmem:[%s7177_s12 + $0x3d0] sm:$0xff] }
 0x8e9   : > { %v3040_v39 = vpop.xlane.xlu0 %3039 }
 0x8ea   : > { %v3043_v56 = vmul.f32 %v3040_v39, %v7648_v4  ;;  %v3202_v39 = vld [vmem:[%s7177_s12 + $0x3d8] sm:$0xff] }
 0x8ec   : > { %v3045_v59 = vadd.f32 1e-05, %v3043_v56  ;;  %v3183_v56 = vld [vmem:[%s7177_s12 + $0x340] sm:$0xff] }
 0x8ee   : > { %5655 = vrsqrt.f32 %v3045_v59  ;;  %vm3053_vm13 = vweird.f32 %v3045_v59 }
 0x8f4   : > { %v5656_v54 = vpop.eup %5655 }
 0x8f5   : > { %v3048_v60 = vmul.f32 %v5656_v54, %v3045_v59  ;;  %vm3054_vm12 = vweird.f32 %v5656_v54  ;;  %v3184_v59 = vld [vmem:[%s7177_s12 + $0x348] sm:$0xff] }
 0x8f6   : > { %vm3055_vm14 = vmor %vm3053_vm13, %vm3054_vm12 }
 0x8f7   : > { %v3049_v62 = vmul.f32 %v5656_v54, %v3048_v60  ;;  %v3186_v60 = vld [vmem:[%s7177_s12 + $0x358] sm:$0xff] }
 0x8f8   : > { %v3042_v15 = vpop.xlane.xlu1 %3041 }
 0x8f9   : > { %v3050_v63 = vmul.f32 0.5, %v3049_v62  ;;  %v3044_v1 = vmul.f32 %v3042_v15, %v7648_v4  ;;  %v3167_v62 = vld [vmem:[%s7177_s12 + $0x2c0] sm:$0xff]  ;;  %v3168_v15 = vld [vmem:[%s7177_s12 + $0x2c8] sm:$0xff] }
 0x8fb   : > { %v3051_v28 = vsub.f32 1.5, %v3050_v63  ;;  %v3046_v6 = vadd.f32 1e-05, %v3044_v1  ;;  %v3169_v63 = vld [vmem:[%s7177_s12 + $0x2d0] sm:$0xff]  ;;  %v3170_v1 = vld [vmem:[%s7177_s12 + $0x2d8] sm:$0xff] }
 0x8fd   : > { %v3052_v8 = vmul.f32 %v5656_v54, %v3051_v28  ;;  %5657 = vrsqrt.f32 %v3046_v6  ;;  %vm3063_vm0 = vweird.f32 %v3046_v6  ;;  %v3151_v28 = vld [vmem:[%s7177_s12 + $0x240] sm:$0xff] }
 0x8ff   : > { %v3056_v61 = vsel %vm3055_vm14, %v5656_v54, %v3052_v8  ;;  %v3185_v54 = vld [vmem:[%s7177_s12 + $0x350] sm:$0xff] }
 0x900   : > { %v3067_v10 = vmul.f32 %v3056_v61, %v7662_v16  ;;  %v3330_v16 = vld [vmem:[%s7177_s12 + $0x7d8] sm:$0xff]  ;;  %v3153_v8 = vld [vmem:[%s7177_s12 + $0x250] sm:$0xff]  ;;  %v3135_v61 = vld [vmem:[%s7177_s12 + $0x1c0] sm:$0xff] }
 0x902   : > { %v3072_v0 = vmul.f32 %v7774_v9, %v3067_v10  ;;  %v3137_v10 = vld [vmem:[%s7177_s12 + $0x1d0] sm:$0xff] }
 0x903   : > { %v5658_v11 = vpop.eup %5657 }
 0x904   : > { %v7783_v13 = vadd.f32 %v7778_v12, %v3072_v0  ;;  %v3058_v48 = vmul.f32 %v5658_v11, %v3046_v6  ;;  %vm3064_vm15 = vweird.f32 %v5658_v11  ;;  %v3152_v6 = vld [vmem:[%s7177_s12 + $0x248] sm:$0xff]  ;;  %v3138_v0 = vld [vmem:[%s7177_s12 + $0x1d8] sm:$0xff] }
 0x905   : > { %vm3065_vm1 = vmor %vm3063_vm0, %vm3064_vm15 }
 0x906   : > { %v3059_v19 = vmul.f32 %v5658_v11, %v3058_v48  ;;  %3387 = vmatmul.f32.vlgmr.msrb.gmra.mxu3 %v7783_v13  ;;  %3410 = vmatmul.f32.vlgmr.msrb.gmra.mxu0 %v7783_v13  ;;  %v3120_v48 = vld [vmem:[%s7177_s12 + $0x148] sm:$0xff] }
 0x907   : > { %3433 = vmatmul.f32.vlgmr.msra.gmra.mxu1 %v7783_v13  ;;  %3456 = vmatmul.f32.vlgmr.msra.gmra.mxu2 %v7783_v13 }
 0x908   : > { %v3060_v26 = vmul.f32 0.5, %v3059_v19  ;;  %3555 = vmatpush.msrb.mxu3 %v3327_v17  ;;  %3578 = vmatpush.msrb.mxu0 %v3328_v18  ;;  %v3121_v17 = vld [vmem:[%s7177_s12 + $0x150] sm:$0xff]  ;;  %v3122_v18 = vld [vmem:[%s7177_s12 + $0x158] sm:$0xff]  ;;  %v3103_v19 = vld [vmem:[%s7177_s12 + $0xc0] sm:$0xff] }
 0x909   : > { %3601 = vmatpush.msra.mxu1 %v3329_v21  ;;  %3624 = vmatpush.msra.mxu2 %v3330_v16  ;;  %v3104_v21 = vld [vmem:[%s7177_s12 + $0xc8] sm:$0xff]  ;;  %v3105_v16 = vld [vmem:[%s7177_s12 + $0xd0] sm:$0xff] }
 0x90a   : > { %v3061_v50 = vsub.f32 1.5, %v3060_v26  ;;  %3556 = vmatpush.msrb.mxu3 %v3311_v24  ;;  %3579 = vmatpush.msrb.mxu0 %v3312_v23  ;;  %v3106_v24 = vld [vmem:[%s7177_s12 + $0xd8] sm:$0xff]  ;;  %v3087_v23 = vld [vmem:[%s7177_s12 + $0x40] sm:$0xff]  ;;  %v3088_v26 = vld [vmem:[%s7177_s12 + $0x48] sm:$0xff] }
 0x90b   : > { %3602 = vmatpush.msra.mxu1 %v3313_v7  ;;  %3625 = vmatpush.msra.mxu2 %v3314_v57  ;;  %v3089_v7 = vld [vmem:[%s7177_s12 + $0x50] sm:$0xff]  ;;  %v3090_v57 = vld [vmem:[%s7177_s12 + $0x58] sm:$0xff] }
 0x90c   : > { %v3062_v33 = vmul.f32 %v5658_v11, %v3061_v50  ;;  %3557 = vmatpush.msrb.mxu3 %v3295_v5  ;;  %3580 = vmatpush.msrb.mxu0 %v3296_v42  ;;  %v3331_v5 = vld [vmem:[%s7177_s12 + $0x7e0] sm:$0xff]  ;;  %v3332_v42 = vld [vmem:[%s7177_s12 + $0x7e8] sm:$0xff]  ;;  %v3333_v50 = vld [vmem:[%s7177_s12 + $0x7f0] sm:$0xff] }
 0x90d   : > { %3603 = vmatpush.msra.mxu1 %v3297_v27  ;;  %3626 = vmatpush.msra.mxu2 %v3298_v30  ;;  %v3334_v27 = vld [vmem:[%s7177_s12 + $0x7f8] sm:$0xff]  ;;  %v3315_v30 = vld [vmem:[%s7177_s12 + $0x760] sm:$0xff] }
 0x90e   : > { %v3066_v3 = vsel %vm3065_vm1, %v5658_v11, %v3062_v33  ;;  %3558 = vmatpush.msrb.mxu3 %v3279_v32  ;;  %3581 = vmatpush.msrb.mxu0 %v3280_v2  ;;  %v3119_v11 = vld [vmem:[%s7177_s12 + $0x140] sm:$0xff]  ;;  %v3316_v32 = vld [vmem:[%s7177_s12 + $0x768] sm:$0xff]  ;;  %v3317_v2 = vld [vmem:[%s7177_s12 + $0x770] sm:$0xff] }
 0x90f   : > { %v3068_v38 = vmul.f32 %v3066_v3, %v7697_v36  ;;  %3604 = vmatpush.msra.mxu1 %v3281_v22  ;;  %3627 = vmatpush.msra.mxu2 %v3282_v34  ;;  %v3232_v36 = vld [vmem:[%s7177_s12 + $0x4c8] sm:$0xff]  ;;  %v3318_v33 = vld [vmem:[%s7177_s12 + $0x778] sm:$0xff]  ;;  %v3299_v22 = vld [vmem:[%s7177_s12 + $0x6e0] sm:$0xff] }
 0x910   : > { %3559 = vmatpush.msrb.mxu3 %v3263_v20  ;;  %3582 = vmatpush.msrb.mxu0 %v3264_v35  ;;  %v3300_v34 = vld [vmem:[%s7177_s12 + $0x6e8] sm:$0xff]  ;;  %v3301_v20 = vld [vmem:[%s7177_s12 + $0x6f0] sm:$0xff]  ;;  %v3302_v35 = vld [vmem:[%s7177_s12 + $0x6f8] sm:$0xff] }
 0x911   : > { %v3073_v45 = vmul.f32 %v7774_v9, %v3068_v38  ;;  %3605 = vmatpush.msra.mxu1 %v3265_v55  ;;  %3628 = vmatpush.msra.mxu2 %v3266_v37  ;;  %v3154_v9 = vld [vmem:[%s7177_s12 + $0x258] sm:$0xff]  ;;  %v3283_v3 = vld [vmem:[%s7177_s12 + $0x660] sm:$0xff]  ;;  %v3284_v55 = vld [vmem:[%s7177_s12 + $0x668] sm:$0xff] }
 0x912   : > { %3560 = vmatpush.msrb.mxu3 %v3247_v41  ;;  %3583 = vmatpush.msrb.mxu0 %v3248_v14  ;;  %v3285_v37 = vld [vmem:[%s7177_s12 + $0x670] sm:$0xff]  ;;  %v3286_v38 = vld [vmem:[%s7177_s12 + $0x678] sm:$0xff]  ;;  %v3267_v41 = vld [vmem:[%s7177_s12 + $0x5e0] sm:$0xff] }
 0x913   : > { %3606 = vmatpush.msra.mxu1 %v3249_v43  ;;  %3629 = vmatpush.msra.mxu2 %v3250_v44  ;;  %v7823_v46 = vadd.f32 %v7778_v12, %v3073_v45  ;;  %v3136_v12 = vld [vmem:[%s7177_s12 + $0x1c8] sm:$0xff]  ;;  %v3269_v43 = vld [vmem:[%s7177_s12 + $0x5f0] sm:$0xff]  ;;  %v3270_v44 = vld [vmem:[%s7177_s12 + $0x5f8] sm:$0xff] }
 0x914   : > { %3561 = vmatpush.msrb.mxu3 %v3231_v47  ;;  %3584 = vmatpush.msrb.mxu0 %v3232_v36  ;;  %v3268_v14 = vld [vmem:[%s7177_s12 + $0x5e8] sm:$0xff]  ;;  %v3251_v45 = vld [vmem:[%s7177_s12 + $0x560] sm:$0xff]  ;;  %v3253_v36 = vld [vmem:[%s7177_s12 + $0x570] sm:$0xff] }
 0x915   : > { %3607 = vmatpush.msra.mxu1 %v3233_v40  ;;  %3630 = vmatpush.msra.mxu2 %v3234_v49  ;;  %v3252_v47 = vld [vmem:[%s7177_s12 + $0x568] sm:$0xff]  ;;  %v3254_v40 = vld [vmem:[%s7177_s12 + $0x578] sm:$0xff]  ;;  %v3235_v49 = vld [vmem:[%s7177_s12 + $0x4e0] sm:$0xff] }
 0x916   : > { %3562 = vmatpush.msrb.mxu3 %v3215_v58  ;;  %3585 = vmatpush.msrb.mxu0 %v3216_v29  ;;  %v3236_v58 = vld [vmem:[%s7177_s12 + $0x4e8] sm:$0xff]  ;;  %v3237_v29 = vld [vmem:[%s7177_s12 + $0x4f0] sm:$0xff] }
 0x917   : > { %3608 = vmatpush.msra.mxu1 %v3217_v51  ;;  %3631 = vmatpush.msra.mxu2 %v3218_v31  ;;  %v3238_v51 = vld [vmem:[%s7177_s12 + $0x4f8] sm:$0xff]  ;;  %v3219_v31 = vld [vmem:[%s7177_s12 + $0x460] sm:$0xff] }
 0x918   : > { %3390 = vmatmul.f32.gmra.mxu3 %v7823_v46  ;;  %3413 = vmatmul.f32.gmra.mxu0 %v7823_v46 }
 0x919   : > { %3436 = vmatmul.f32.gmra.mxu1 %v7823_v46  ;;  %3459 = vmatmul.f32.gmra.mxu2 %v7823_v46 }
 0x91a   : > { %3563 = vmatpush.msrb.mxu3 %v3199_v52  ;;  %3586 = vmatpush.msrb.mxu0 %v3200_v53  ;;  %v3220_v52 = vld [vmem:[%s7177_s12 + $0x468] sm:$0xff]  ;;  %v3221_v53 = vld [vmem:[%s7177_s12 + $0x470] sm:$0xff] }
 0x91b   : > { %3609 = vmatpush.msra.mxu1 %v3201_v25  ;;  %3632 = vmatpush.msra.mxu2 %v3202_v39  ;;  %v3222_v25 = vld [vmem:[%s7177_s12 + $0x478] sm:$0xff]  ;;  %v3203_v39 = vld [vmem:[%s7177_s12 + $0x3e0] sm:$0xff] }
 0x91c   : > { %3564 = vmatpush.msrb.mxu3 %v3183_v56  ;;  %3587 = vmatpush.msrb.mxu0 %v3184_v59  ;;  %v3204_v56 = vld [vmem:[%s7177_s12 + $0x3e8] sm:$0xff]  ;;  %v3205_v59 = vld [vmem:[%s7177_s12 + $0x3f0] sm:$0xff] }
 0x91d   : > { %3610 = vmatpush.msra.mxu1 %v3185_v54  ;;  %3633 = vmatpush.msra.mxu2 %v3186_v60  ;;  %v3206_v54 = vld [vmem:[%s7177_s12 + $0x3f8] sm:$0xff]  ;;  %v3187_v60 = vld [vmem:[%s7177_s12 + $0x360] sm:$0xff] }
 0x91e   : > { %3565 = vmatpush.msrb.mxu3 %v3167_v62  ;;  %3588 = vmatpush.msrb.mxu0 %v3168_v15  ;;  %v3188_v62 = vld [vmem:[%s7177_s12 + $0x368] sm:$0xff]  ;;  %v3189_v15 = vld [vmem:[%s7177_s12 + $0x370] sm:$0xff] }
 0x91f   : > { %3611 = vmatpush.msra.mxu1 %v3169_v63  ;;  %3634 = vmatpush.msra.mxu2 %v3170_v1  ;;  %v3190_v63 = vld [vmem:[%s7177_s12 + $0x378] sm:$0xff]  ;;  %v3171_v1 = vld [vmem:[%s7177_s12 + $0x2e0] sm:$0xff] }
 0x920   : > { %3566 = vmatpush.msrb.mxu3 %v3151_v28  ;;  %3589 = vmatpush.msrb.mxu0 %v3152_v6  ;;  %v3172_v28 = vld [vmem:[%s7177_s12 + $0x2e8] sm:$0xff]  ;;  %v3173_v6 = vld [vmem:[%s7177_s12 + $0x2f0] sm:$0xff] }
 0x921   : > { %3612 = vmatpush.msra.mxu1 %v3153_v8  ;;  %3635 = vmatpush.msra.mxu2 %v3154_v9  ;;  %v3174_v8 = vld [vmem:[%s7177_s12 + $0x2f8] sm:$0xff]  ;;  %v3155_v9 = vld [vmem:[%s7177_s12 + $0x260] sm:$0xff] }
 0x922   : > { %3479 = vmatmul.f32.vlgmr.msra.gmra.mxu3 %v7783_v13  ;;  %3502 = vmatmul.f32.vlgmr.msra.gmra.mxu0 %v7783_v13 }
 0x923   : > { %3525 = vmatmul.f32.vlgmr.msrb.gmra.mxu1 %v7783_v13  ;;  %3548 = vmatmul.f32.vlgmr.msrb.gmra.mxu2 %v7783_v13 }
 0x924   : > { %3567 = vmatpush.msrb.mxu3 %v3135_v61  ;;  %3590 = vmatpush.msrb.mxu0 %v3136_v12  ;;  %v3156_v61 = vld [vmem:[%s7177_s12 + $0x268] sm:$0xff]  ;;  %v3157_v12 = vld [vmem:[%s7177_s12 + $0x270] sm:$0xff] }
 0x925   : > { %3613 = vmatpush.msra.mxu1 %v3137_v10  ;;  %3636 = vmatpush.msra.mxu2 %v3138_v0  ;;  %v3158_v10 = vld [vmem:[%s7177_s12 + $0x278] sm:$0xff]  ;;  %v3139_v0 = vld [vmem:[%s7177_s12 + $0x1e0] sm:$0xff] }
 0x926   : > { %3568 = vmatpush.msrb.mxu3 %v3119_v11  ;;  %3591 = vmatpush.msrb.mxu0 %v3120_v48  ;;  %v3140_v11 = vld [vmem:[%s7177_s12 + $0x1e8] sm:$0xff]  ;;  %v3141_v48 = vld [vmem:[%s7177_s12 + $0x1f0] sm:$0xff] }
 0x927   : > { %3614 = vmatpush.msra.mxu1 %v3121_v17  ;;  %3637 = vmatpush.msra.mxu2 %v3122_v18  ;;  %v3142_v17 = vld [vmem:[%s7177_s12 + $0x1f8] sm:$0xff]  ;;  %v3123_v18 = vld [vmem:[%s7177_s12 + $0x160] sm:$0xff] }
 0x928   : > { %3569 = vmatpush.msrb.mxu3 %v3103_v19  ;;  %3592 = vmatpush.msrb.mxu0 %v3104_v21  ;;  %v3124_v19 = vld [vmem:[%s7177_s12 + $0x168] sm:$0xff]  ;;  %v3125_v21 = vld [vmem:[%s7177_s12 + $0x170] sm:$0xff] }
 0x929   : > { %3615 = vmatpush.msra.mxu1 %v3105_v16  ;;  %3638 = vmatpush.msra.mxu2 %v3106_v24  ;;  %v3126_v16 = vld [vmem:[%s7177_s12 + $0x178] sm:$0xff]  ;;  %v3107_v24 = vld [vmem:[%s7177_s12 + $0xe0] sm:$0xff] }
 0x92a   : > { %3570 = vmatpush.msrb.mxu3 %v3087_v23  ;;  %3593 = vmatpush.msrb.mxu0 %v3088_v26  ;;  %v3108_v23 = vld [vmem:[%s7177_s12 + $0xe8] sm:$0xff]  ;;  %v3109_v26 = vld [vmem:[%s7177_s12 + $0xf0] sm:$0xff] }
 0x92b   : > { %3616 = vmatpush.msra.mxu1 %v3089_v7  ;;  %3639 = vmatpush.msra.mxu2 %v3090_v57  ;;  %v3110_v7 = vld [vmem:[%s7177_s12 + $0xf8] sm:$0xff]  ;;  %v3091_v57 = vld [vmem:[%s7177_s12 + $0x60] sm:$0xff] }
 0x92c   : > { %3482 = vmatmul.f32.gmra.mxu3 %v7823_v46  ;;  %3505 = vmatmul.f32.gmra.mxu0 %v7823_v46 }
 0x92d   : > { %3528 = vmatmul.f32.gmra.mxu1 %v7823_v46  ;;  %3551 = vmatmul.f32.gmra.mxu2 %v7823_v46 }
 0x92e   : > { %3647 = vmatpush.msra.mxu3 %v3331_v5  ;;  %3670 = vmatpush.msra.mxu0 %v3332_v42  ;;  %v3092_v5 = vld [vmem:[%s7177_s12 + $0x68] sm:$0xff]  ;;  %v3093_v42 = vld [vmem:[%s7177_s12 + $0x70] sm:$0xff] }
 0x92f   : > { %3693 = vmatpush.msrb.mxu1 %v3333_v50  ;;  %3716 = vmatpush.msrb.mxu2 %v3334_v27  ;;  %v3094_v50 = vld [vmem:[%s7177_s12 + $0x78] sm:$0xff] }
 0x930   : > { %3648 = vmatpush.msra.mxu3 %v3315_v30  ;;  %3671 = vmatpush.msra.mxu0 %v3316_v32  ;;  %v3802_v27 = vld [vmem:[%s7181_s5 + $0xf8] sm:$0xff] }
 0x931   : > { %3694 = vmatpush.msrb.mxu1 %v3317_v2  ;;  %3717 = vmatpush.msrb.mxu2 %v3318_v33  ;;  %v3818_v30 = vld [vmem:[%s7181_s5 + $0x178] sm:$0xff]  ;;  %v3801_v33 = vld [vmem:[%s7181_s5 + $0xf0] sm:$0xff] }
 0x932   : > { %3649 = vmatpush.msra.mxu3 %v3299_v22  ;;  %3672 = vmatpush.msra.mxu0 %v3300_v34  ;;  %v3786_v32 = vld [vmem:[%s7181_s5 + $0x78] sm:$0xff]  ;;  %v3817_v22 = vld [vmem:[%s7181_s5 + $0x170] sm:$0xff] }
 0x933   : > { %3695 = vmatpush.msrb.mxu1 %v3301_v20  ;;  %3718 = vmatpush.msrb.mxu2 %v3302_v35  ;;  %v3834_v2 = vld [vmem:[%s7181_s5 + $0x1f8] sm:$0xff]  ;;  %v3785_v34 = vld [vmem:[%s7181_s5 + $0x70] sm:$0xff]  ;;  %v3800_v35 = vld [vmem:[%s7181_s5 + $0xe8] sm:$0xff] }
 0x934   : > { %3650 = vmatpush.msra.mxu3 %v3283_v3  ;;  %3673 = vmatpush.msra.mxu0 %v3284_v55  ;;  %v3833_v20 = vld [vmem:[%s7181_s5 + $0x1f0] sm:$0xff]  ;;  %v3816_v3 = vld [vmem:[%s7181_s5 + $0x168] sm:$0xff] }
 0x935   : > { %3696 = vmatpush.msrb.mxu1 %v3285_v37  ;;  %3719 = vmatpush.msrb.mxu2 %v3286_v38  ;;  %v3784_v55 = vld [vmem:[%s7181_s5 + $0x68] sm:$0xff]  ;;  %v3799_v38 = vld [vmem:[%s7181_s5 + $0xe0] sm:$0xff] }
 0x936   : > { %3571 = vmatmul.f32.vlgmr.msrb.gmra.mxu3 %v7783_v13  ;;  %3594 = vmatmul.f32.vlgmr.msrb.gmra.mxu0 %v7783_v13  ;;  %v3832_v37 = vld [vmem:[%s7181_s5 + $0x1e8] sm:$0xff] }
 0x937   : > { %3617 = vmatmul.f32.vlgmr.msra.gmra.mxu1 %v7783_v13  ;;  %3640 = vmatmul.f32.vlgmr.msra.gmra.mxu2 %v7783_v13 }
 0x938   : > { %3651 = vmatpush.msra.mxu3 %v3267_v41  ;;  %3674 = vmatpush.msra.mxu0 %v3268_v14  ;;  %v3815_v41 = vld [vmem:[%s7181_s5 + $0x160] sm:$0xff] }
 0x939   : > { %3697 = vmatpush.msrb.mxu1 %v3269_v43  ;;  %3720 = vmatpush.msrb.mxu2 %v3270_v44  ;;  %v3783_v14 = vld [vmem:[%s7181_s5 + $0x60] sm:$0xff]  ;;  %v3798_v44 = vld [vmem:[%s7181_s5 + $0xd8] sm:$0xff] }
 0x93a   : > { %3652 = vmatpush.msra.mxu3 %v3251_v45  ;;  %3675 = vmatpush.msra.mxu0 %v3252_v47  ;;  %v3831_v43 = vld [vmem:[%s7181_s5 + $0x1e0] sm:$0xff]  ;;  %v3814_v45 = vld [vmem:[%s7181_s5 + $0x158] sm:$0xff] }
 0x93b   : > { %3698 = vmatpush.msrb.mxu1 %v3253_v36  ;;  %3721 = vmatpush.msrb.mxu2 %v3254_v40  ;;  %v3782_v47 = vld [vmem:[%s7181_s5 + $0x58] sm:$0xff]  ;;  %v3797_v40 = vld [vmem:[%s7181_s5 + $0xd0] sm:$0xff] }
 0x93c   : > { %3653 = vmatpush.msra.mxu3 %v3235_v49  ;;  %3676 = vmatpush.msra.mxu0 %v3236_v58  ;;  %v3830_v36 = vld [vmem:[%s7181_s5 + $0x1d8] sm:$0xff]  ;;  %v3813_v49 = vld [vmem:[%s7181_s5 + $0x150] sm:$0xff] }
 0x93d   : > { %3699 = vmatpush.msrb.mxu1 %v3237_v29  ;;  %3722 = vmatpush.msrb.mxu2 %v3238_v51  ;;  %v3781_v58 = vld [vmem:[%s7181_s5 + $0x50] sm:$0xff]  ;;  %v3796_v51 = vld [vmem:[%s7181_s5 + $0xc8] sm:$0xff] }
 0x93e   : > { %3654 = vmatpush.msra.mxu3 %v3219_v31  ;;  %3677 = vmatpush.msra.mxu0 %v3220_v52  ;;  %v3829_v29 = vld [vmem:[%s7181_s5 + $0x1d0] sm:$0xff]  ;;  %v3812_v31 = vld [vmem:[%s7181_s5 + $0x148] sm:$0xff] }
 0x93f   : > { %3700 = vmatpush.msrb.mxu1 %v3221_v53  ;;  %3723 = vmatpush.msrb.mxu2 %v3222_v25  ;;  %v3780_v52 = vld [vmem:[%s7181_s5 + $0x48] sm:$0xff]  ;;  %v3795_v25 = vld [vmem:[%s7181_s5 + $0xc0] sm:$0xff] }
 0x940   : > { %3574 = vmatmul.f32.gmra.mxu3 %v7823_v46  ;;  %3597 = vmatmul.f32.gmra.mxu0 %v7823_v46  ;;  %v3828_v53 = vld [vmem:[%s7181_s5 + $0x1c8] sm:$0xff] }
 0x941   : > { %3620 = vmatmul.f32.gmra.mxu1 %v7823_v46  ;;  %3643 = vmatmul.f32.gmra.mxu2 %v7823_v46 }
 0x942   : > { %3655 = vmatpush.msra.mxu3 %v3203_v39  ;;  %3678 = vmatpush.msra.mxu0 %v3204_v56  ;;  %v3811_v39 = vld [vmem:[%s7181_s5 + $0x140] sm:$0xff] }
 0x943   : > { %3701 = vmatpush.msrb.mxu1 %v3205_v59  ;;  %3724 = vmatpush.msrb.mxu2 %v3206_v54  ;;  %v3779_v56 = vld [vmem:[%s7181_s5 + $0x40] sm:$0xff]  ;;  %v3794_v54 = vld [vmem:[%s7181_s5 + $0xb8] sm:$0xff] }
 0x944   : > { %3656 = vmatpush.msra.mxu3 %v3187_v60  ;;  %3679 = vmatpush.msra.mxu0 %v3188_v62  ;;  %v3827_v59 = vld [vmem:[%s7181_s5 + $0x1c0] sm:$0xff]  ;;  %v3810_v60 = vld [vmem:[%s7181_s5 + $0x138] sm:$0xff] }
 0x945   : > { %3702 = vmatpush.msrb.mxu1 %v3189_v15  ;;  %3725 = vmatpush.msrb.mxu2 %v3190_v63  ;;  %v3778_v62 = vld [vmem:[%s7181_s5 + $0x38] sm:$0xff]  ;;  %v3793_v63 = vld [vmem:[%s7181_s5 + $0xb0] sm:$0xff] }
 0x946   : > { %3657 = vmatpush.msra.mxu3 %v3171_v1  ;;  %3680 = vmatpush.msra.mxu0 %v3172_v28  ;;  %v3826_v15 = vld [vmem:[%s7181_s5 + $0x1b8] sm:$0xff]  ;;  %v3809_v1 = vld [vmem:[%s7181_s5 + $0x130] sm:$0xff] }
 0x947   : > { %3703 = vmatpush.msrb.mxu1 %v3173_v6  ;;  %3726 = vmatpush.msrb.mxu2 %v3174_v8  ;;  %v3777_v28 = vld [vmem:[%s7181_s5 + $0x30] sm:$0xff]  ;;  %v3792_v8 = vld [vmem:[%s7181_s5 + $0xa8] sm:$0xff] }
 0x948   : > { %3658 = vmatpush.msra.mxu3 %v3155_v9  ;;  %3681 = vmatpush.msra.mxu0 %v3156_v61  ;;  %v3825_v6 = vld [vmem:[%s7181_s5 + $0x1b0] sm:$0xff]  ;;  %v3808_v9 = vld [vmem:[%s7181_s5 + $0x128] sm:$0xff] }
 0x949   : > { %3704 = vmatpush.msrb.mxu1 %v3157_v12  ;;  %3727 = vmatpush.msrb.mxu2 %v3158_v10  ;;  %v3776_v61 = vld [vmem:[%s7181_s5 + $0x28] sm:$0xff]  ;;  %v3791_v10 = vld [vmem:[%s7181_s5 + $0xa0] sm:$0xff] }
 0x94a   : > { %3659 = vmatpush.msra.mxu3 %v3139_v0  ;;  %3682 = vmatpush.msra.mxu0 %v3140_v11  ;;  %v3824_v12 = vld [vmem:[%s7181_s5 + $0x1a8] sm:$0xff]  ;;  %v3807_v0 = vld [vmem:[%s7181_s5 + $0x120] sm:$0xff] }
 0x94b   : > { %3705 = vmatpush.msrb.mxu1 %v3141_v48  ;;  %3728 = vmatpush.msrb.mxu2 %v3142_v17  ;;  %v3775_v11 = vld [vmem:[%s7181_s5 + $0x20] sm:$0xff]  ;;  %v3790_v17 = vld [vmem:[%s7181_s5 + $0x98] sm:$0xff] }
 0x94c   : > { %3660 = vmatpush.msra.mxu3 %v3123_v18  ;;  %3683 = vmatpush.msra.mxu0 %v3124_v19  ;;  %v3823_v48 = vld [vmem:[%s7181_s5 + $0x1a0] sm:$0xff]  ;;  %v3806_v18 = vld [vmem:[%s7181_s5 + $0x118] sm:$0xff] }
 0x94d   : > { %3706 = vmatpush.msrb.mxu1 %v3125_v21  ;;  %3729 = vmatpush.msrb.mxu2 %v3126_v16  ;;  %v3774_v19 = vld [vmem:[%s7181_s5 + $0x18] sm:$0xff]  ;;  %v3789_v16 = vld [vmem:[%s7181_s5 + $0x90] sm:$0xff] }
 0x94e   : > { %3661 = vmatpush.msra.mxu3 %v3107_v24  ;;  %3684 = vmatpush.msra.mxu0 %v3108_v23  ;;  %v3822_v21 = vld [vmem:[%s7181_s5 + $0x198] sm:$0xff]  ;;  %v3805_v24 = vld [vmem:[%s7181_s5 + $0x110] sm:$0xff] }
 0x94f   : > { %3707 = vmatpush.msrb.mxu1 %v3109_v26  ;;  %3730 = vmatpush.msrb.mxu2 %v3110_v7  ;;  %v3773_v23 = vld [vmem:[%s7181_s5 + $0x10] sm:$0xff]  ;;  %v3788_v7 = vld [vmem:[%s7181_s5 + $0x88] sm:$0xff] }
 0x950   : > { %3662 = vmatpush.msra.mxu3 %v3091_v57  ;;  %3685 = vmatpush.msra.mxu0 %v3092_v5  ;;  %v3821_v26 = vld [vmem:[%s7181_s5 + $0x190] sm:$0xff]  ;;  %v3804_v57 = vld [vmem:[%s7181_s5 + $0x108] sm:$0xff] }
 0x951   : > { %3708 = vmatpush.msrb.mxu1 %v3093_v42  ;;  %3731 = vmatpush.msrb.mxu2 %v3094_v50  ;;  %v3772_v5 = vld [vmem:[%s7181_s5 + $0x8] sm:$0xff]  ;;  %v3787_v50 = vld [vmem:[%s7181_s5 + $0x80] sm:$0xff] }
 0x952   : > { %3663 = vmatmul.f32.vlgmr.msra.gmra.mxu3 %v7783_v13  ;;  %3686 = vmatmul.f32.vlgmr.msra.gmra.mxu0 %v7783_v13  ;;  %v3820_v42 = vld [vmem:[%s7181_s5 + $0x188] sm:$0xff] }
 0x953   : > { %3709 = vmatmul.f32.vlgmr.msrb.gmra.mxu1 %v7783_v13  ;;  %3732 = vmatmul.f32.vlgmr.msrb.gmra.mxu2 %v7783_v13 }
 0x954   : > { %4054 = vmatpush.msrb.mxu0 %v3802_v27  ;;  %4077 = vmatpush.msra.mxu1 %v3818_v30  ;;  %v3803_v27 = vld [vmem:[%s7181_s5 + $0x100] sm:$0xff]  ;;  %v3866_v30 = vld [vmem:[%s7181_s5 + $0x2f8] sm:$0xff] }
 0x955   : > { %4031 = vmatpush.msrb.mxu3 %v3786_v32  ;;  %4100 = vmatpush.msra.mxu2 %v3834_v2  ;;  %v3882_v32 = vld [vmem:[%s7181_s5 + $0x378] sm:$0xff]  ;;  %v3771_v2 = vld [vmem:[%s7181_s5] sm:$0xff] }
 0x956   : > { %4055 = vmatpush.msrb.mxu0 %v3801_v33  ;;  %4078 = vmatpush.msra.mxu1 %v3817_v22  ;;  %v3819_v33 = vld [vmem:[%s7181_s5 + $0x180] sm:$0xff]  ;;  %v3865_v22 = vld [vmem:[%s7181_s5 + $0x2f0] sm:$0xff] }
 0x957   : > { %4032 = vmatpush.msrb.mxu3 %v3785_v34  ;;  %4101 = vmatpush.msra.mxu2 %v3833_v20  ;;  %v3881_v34 = vld [vmem:[%s7181_s5 + $0x370] sm:$0xff]  ;;  %v3850_v20 = vld [vmem:[%s7181_s5 + $0x278] sm:$0xff] }
 0x958   : > { %4056 = vmatpush.msrb.mxu0 %v3800_v35  ;;  %4079 = vmatpush.msra.mxu1 %v3816_v3  ;;  %v3898_v35 = vld [vmem:[%s7181_s5 + $0x3f8] sm:$0xff]  ;;  %v3864_v3 = vld [vmem:[%s7181_s5 + $0x2e8] sm:$0xff] }
 0x959   : > { %4033 = vmatpush.msrb.mxu3 %v3784_v55  ;;  %4102 = vmatpush.msra.mxu2 %v3832_v37  ;;  %v3880_v55 = vld [vmem:[%s7181_s5 + $0x368] sm:$0xff]  ;;  %v3849_v37 = vld [vmem:[%s7181_s5 + $0x270] sm:$0xff] }
 0x95a   : > { %3666 = vmatmul.f32.gmra.mxu3 %v7823_v46  ;;  %3689 = vmatmul.f32.gmra.mxu0 %v7823_v46 }
 0x95b   : > { %3712 = vmatmul.f32.gmra.mxu1 %v7823_v46  ;;  %3735 = vmatmul.f32.gmra.mxu2 %v7823_v46 }
 0x95c   : > { %4057 = vmatpush.msrb.mxu0 %v3799_v38  ;;  %4080 = vmatpush.msra.mxu1 %v3815_v41  ;;  %v3897_v38 = vld [vmem:[%s7181_s5 + $0x3f0] sm:$0xff]  ;;  %v3863_v41 = vld [vmem:[%s7181_s5 + $0x2e0] sm:$0xff] }
 0x95d   : > { %4034 = vmatpush.msrb.mxu3 %v3783_v14  ;;  %4103 = vmatpush.msra.mxu2 %v3831_v43  ;;  %v3879_v14 = vld [vmem:[%s7181_s5 + $0x360] sm:$0xff]  ;;  %v3848_v43 = vld [vmem:[%s7181_s5 + $0x268] sm:$0xff] }
 0x95e   : > { %4058 = vmatpush.msrb.mxu0 %v3798_v44  ;;  %4081 = vmatpush.msra.mxu1 %v3814_v45  ;;  %v3896_v44 = vld [vmem:[%s7181_s5 + $0x3e8] sm:$0xff]  ;;  %v3862_v45 = vld [vmem:[%s7181_s5 + $0x2d8] sm:$0xff] }
 0x95f   : > { %4035 = vmatpush.msrb.mxu3 %v3782_v47  ;;  %4104 = vmatpush.msra.mxu2 %v3830_v36  ;;  %v3878_v47 = vld [vmem:[%s7181_s5 + $0x358] sm:$0xff]  ;;  %v3847_v36 = vld [vmem:[%s7181_s5 + $0x260] sm:$0xff] }
 0x960   : > { %4059 = vmatpush.msrb.mxu0 %v3797_v40  ;;  %4082 = vmatpush.msra.mxu1 %v3813_v49  ;;  %v3895_v40 = vld [vmem:[%s7181_s5 + $0x3e0] sm:$0xff]  ;;  %v3861_v49 = vld [vmem:[%s7181_s5 + $0x2d0] sm:$0xff] }
 0x961   : > { %4036 = vmatpush.msrb.mxu3 %v3781_v58  ;;  %4105 = vmatpush.msra.mxu2 %v3829_v29  ;;  %v3877_v58 = vld [vmem:[%s7181_s5 + $0x350] sm:$0xff]  ;;  %v3846_v29 = vld [vmem:[%s7181_s5 + $0x258] sm:$0xff] }
 0x962   : > { %4060 = vmatpush.msrb.mxu0 %v3796_v51  ;;  %4083 = vmatpush.msra.mxu1 %v3812_v31  ;;  %v3894_v51 = vld [vmem:[%s7181_s5 + $0x3d8] sm:$0xff]  ;;  %v3860_v31 = vld [vmem:[%s7181_s5 + $0x2c8] sm:$0xff] }
 0x963   : > { %4037 = vmatpush.msrb.mxu3 %v3780_v52  ;;  %4106 = vmatpush.msra.mxu2 %v3828_v53  ;;  %v3876_v52 = vld [vmem:[%s7181_s5 + $0x348] sm:$0xff]  ;;  %v3845_v53 = vld [vmem:[%s7181_s5 + $0x250] sm:$0xff] }
 0x964   : > { %4061 = vmatpush.msrb.mxu0 %v3795_v25  ;;  %4084 = vmatpush.msra.mxu1 %v3811_v39  ;;  %v3893_v25 = vld [vmem:[%s7181_s5 + $0x3d0] sm:$0xff]  ;;  %v3859_v39 = vld [vmem:[%s7181_s5 + $0x2c0] sm:$0xff] }
 0x965   : > { %4038 = vmatpush.msrb.mxu3 %v3779_v56  ;;  %4107 = vmatpush.msra.mxu2 %v3827_v59  ;;  %v3875_v56 = vld [vmem:[%s7181_s5 + $0x340] sm:$0xff]  ;;  %v3844_v59 = vld [vmem:[%s7181_s5 + $0x248] sm:$0xff] }
 0x966   : > { %4062 = vmatpush.msrb.mxu0 %v3794_v54  ;;  %4085 = vmatpush.msra.mxu1 %v3810_v60  ;;  %v3892_v54 = vld [vmem:[%s7181_s5 + $0x3c8] sm:$0xff]  ;;  %v3858_v60 = vld [vmem:[%s7181_s5 + $0x2b8] sm:$0xff] }
 0x967   : > { %4039 = vmatpush.msrb.mxu3 %v3778_v62  ;;  %4108 = vmatpush.msra.mxu2 %v3826_v15  ;;  %v3874_v62 = vld [vmem:[%s7181_s5 + $0x338] sm:$0xff]  ;;  %v3843_v15 = vld [vmem:[%s7181_s5 + $0x240] sm:$0xff] }
 0x968   : > { %4063 = vmatpush.msrb.mxu0 %v3793_v63  ;;  %4086 = vmatpush.msra.mxu1 %v3809_v1  ;;  %v3891_v63 = vld [vmem:[%s7181_s5 + $0x3c0] sm:$0xff] }
 0x969   : > { %4040 = vmatpush.msrb.mxu3 %v3777_v28  ;;  %4109 = vmatpush.msra.mxu2 %v3825_v6  ;;  %v8050_v1 = vld [vmem:[%s7179_s3] sm:$0xff] }
 0x96a   : > { %4064 = vmatpush.msrb.mxu0 %v3792_v8  ;;  %4087 = vmatpush.msra.mxu1 %v3808_v9  ;;  %v3857_v28 = vld [vmem:[%s7181_s5 + $0x2b0] sm:$0xff]  ;;  %v3842_v8 = vld [vmem:[%s7181_s5 + $0x238] sm:$0xff] }
 0x96b   : > { %4041 = vmatpush.msrb.mxu3 %v3776_v61  ;;  %4110 = vmatpush.msra.mxu2 %v3824_v12  ;;  %v3873_v6 = vld [vmem:[%s7181_s5 + $0x330] sm:$0xff]  ;;  %v3890_v9 = vld [vmem:[%s7181_s5 + $0x3b8] sm:$0xff]  ;;  %v3856_v61 = vld [vmem:[%s7181_s5 + $0x2a8] sm:$0xff] }
 0x96c   : > { %4065 = vmatpush.msrb.mxu0 %v3791_v10  ;;  %4088 = vmatpush.msra.mxu1 %v3807_v0  ;;  %v3872_v12 = vld [vmem:[%s7181_s5 + $0x328] sm:$0xff]  ;;  %v3340_v10 = vperm.slane %v8050_v1, 1  ;;  %v3341_v0 = vperm.slane %v8050_v1, 2 }
 0x96d   : > { %4042 = vmatpush.msrb.mxu3 %v3775_v11  ;;  %4111 = vmatpush.msra.mxu2 %v3823_v48  ;;  %v3841_v11 = vld [vmem:[%s7181_s5 + $0x230] sm:$0xff] }
 0x96e   : > { %4066 = vmatpush.msrb.mxu0 %v3790_v17  ;;  %4089 = vmatpush.msra.mxu1 %v3806_v18  ;;  %v3889_v48 = vld [vmem:[%s7181_s5 + $0x3b0] sm:$0xff] }
 0x96f   : > { %4043 = vmatpush.msrb.mxu3 %v3774_v19  ;;  %4112 = vmatpush.msra.mxu2 %v3822_v21  ;;  %v3855_v19 = vld [vmem:[%s7181_s5 + $0x2a0] sm:$0xff] }
 0x970   : > { %4067 = vmatpush.msrb.mxu0 %v3789_v16  ;;  %4090 = vmatpush.msra.mxu1 %v3805_v24  ;;  %v3871_v21 = vld [vmem:[%s7181_s5 + $0x320] sm:$0xff]  ;;  %v3840_v16 = vld [vmem:[%s7181_s5 + $0x228] sm:$0xff] }
 0x971   : > { %4044 = vmatpush.msrb.mxu3 %v3773_v23  ;;  %4113 = vmatpush.msra.mxu2 %v3821_v26  ;;  %v3888_v24 = vld [vmem:[%s7181_s5 + $0x3a8] sm:$0xff]  ;;  %v3854_v23 = vld [vmem:[%s7181_s5 + $0x298] sm:$0xff] }
 0x972   : > { %4068 = vmatpush.msrb.mxu0 %v3788_v7  ;;  %4091 = vmatpush.msra.mxu1 %v3804_v57  ;;  %v3870_v26 = vld [vmem:[%s7181_s5 + $0x318] sm:$0xff] }
 0x973   : > { %4045 = vmatpush.msrb.mxu3 %v3772_v5  ;;  %4114 = vmatpush.msra.mxu2 %v3820_v42  ;;  %v3839_v5 = vld [vmem:[%s7181_s5 + $0x220] sm:$0xff] }
 0x974   : > { %4069 = vmatpush.msrb.mxu0 %v3787_v50  ;;  %4092 = vmatpush.msra.mxu1 %v3803_v27  ;;  %v3887_v42 = vld [vmem:[%s7181_s5 + $0x3a0] sm:$0xff]  ;;  %v3853_v50 = vld [vmem:[%s7181_s5 + $0x290] sm:$0xff] }
 0x975   : > { %4046 = vmatpush.msrb.mxu3 %v3771_v2  ;;  %4115 = vmatpush.msra.mxu2 %v3819_v33  ;;  %v3869_v27 = vld [vmem:[%s7181_s5 + $0x310] sm:$0xff] }
 0x976   : > { %4146 = vmatpush.msra.mxu0 %v3866_v30  ;;  %4169 = vmatpush.msrb.mxu1 %v3882_v32  ;;  %v3838_v30 = vld [vmem:[%s7181_s5 + $0x218] sm:$0xff] }
 0x977   : > { %4123 = vmatpush.msra.mxu3 %v3850_v20  ;;  %4192 = vmatpush.msrb.mxu2 %v3898_v35  ;;  %v3886_v32 = vld [vmem:[%s7181_s5 + $0x398] sm:$0xff]  ;;  %v3339_v20 = vperm.slane %v8050_v1, 0  ;;  %v3342_v35 = vperm.slane %v8050_v1, 3 }
 0x978   : > { %4147 = vmatpush.msra.mxu0 %v3865_v22  ;;  %4170 = vmatpush.msrb.mxu1 %v3881_v34  ;;  %v3852_v22 = vld [vmem:[%s7181_s5 + $0x288] sm:$0xff] }
 0x979   : > { %4124 = vmatpush.msra.mxu3 %v3849_v37  ;;  %4193 = vmatpush.msrb.mxu2 %v3897_v38  ;;  %v3868_v34 = vld [vmem:[%s7181_s5 + $0x308] sm:$0xff]  ;;  %v3851_v37 = vld [vmem:[%s7181_s5 + $0x280] sm:$0xff] }
 0x97a   : > { %4148 = vmatpush.msra.mxu0 %v3864_v3  ;;  %4171 = vmatpush.msrb.mxu1 %v3880_v55  ;;  %v3867_v38 = vld [vmem:[%s7181_s5 + $0x300] sm:$0xff] }
 0x97b   : > { %4125 = vmatpush.msra.mxu3 %v3848_v43  ;;  %4194 = vmatpush.msrb.mxu2 %v3896_v44 }
 0x97c   : > { %4149 = vmatpush.msra.mxu0 %v3863_v41  ;;  %4172 = vmatpush.msrb.mxu1 %v3879_v14  ;;  %v3930_v41 = vld [vmem:[%s7181_s5 + $0x4f8] sm:$0xff] }
 0x97d   : > { %4126 = vmatpush.msra.mxu3 %v3847_v36  ;;  %4195 = vmatpush.msrb.mxu2 %v3895_v40  ;;  %v3946_v14 = vld [vmem:[%s7181_s5 + $0x578] sm:$0xff]  ;;  %v3929_v36 = vld [vmem:[%s7181_s5 + $0x4f0] sm:$0xff] }
 0x97e   : > { %4150 = vmatpush.msra.mxu0 %v3862_v45  ;;  %4173 = vmatpush.msrb.mxu1 %v3878_v47  ;;  %v3837_v45 = vld [vmem:[%s7181_s5 + $0x210] sm:$0xff] }
 0x97f   : > { %4127 = vmatpush.msra.mxu3 %v3846_v29  ;;  %4196 = vmatpush.msrb.mxu2 %v3894_v51  ;;  %v3885_v47 = vld [vmem:[%s7181_s5 + $0x390] sm:$0xff]  ;;  %v3928_v29 = vld [vmem:[%s7181_s5 + $0x4e8] sm:$0xff] }
 0x980   : > { %4151 = vmatpush.msra.mxu0 %v3861_v49  ;;  %4174 = vmatpush.msrb.mxu1 %v3877_v58  ;;  %v3945_v40 = vld [vmem:[%s7181_s5 + $0x570] sm:$0xff]  ;;  %v3836_v49 = vld [vmem:[%s7181_s5 + $0x208] sm:$0xff] }
 0x981   : > { %4128 = vmatpush.msra.mxu3 %v3845_v53  ;;  %4197 = vmatpush.msrb.mxu2 %v3893_v25  ;;  %v3884_v58 = vld [vmem:[%s7181_s5 + $0x388] sm:$0xff]  ;;  %v3835_v53 = vld [vmem:[%s7181_s5 + $0x200] sm:$0xff] }
 0x982   : > { %4152 = vmatpush.msra.mxu0 %v3860_v31  ;;  %4175 = vmatpush.msrb.mxu1 %v3876_v52  ;;  %v3944_v51 = vld [vmem:[%s7181_s5 + $0x568] sm:$0xff]  ;;  %v3883_v25 = vld [vmem:[%s7181_s5 + $0x380] sm:$0xff] }
 0x983   : > { %4129 = vmatpush.msra.mxu3 %v3844_v59  ;;  %4198 = vmatpush.msrb.mxu2 %v3892_v54  ;;  %v3411_v17 = vpop.f32.mrf.mxu0  ;;  %v3943_v59 = vld [vmem:[%s7181_s5 + $0x560] sm:$0xff]  ;;  %v3962_v54 = vld [vmem:[%s7181_s5 + $0x5f8] sm:$0xff] }
 0x984   : > { %4153 = vmatpush.msra.mxu0 %v3859_v39  ;;  %4176 = vmatpush.msrb.mxu1 %v3875_v56  ;;  %v3434_v18 = vpop.f32.mrf.mxu1  ;;  %v3412_v7 = vadd.f32 %v3411_v17, %v3340_v10  ;;  %v3914_v39 = vld [vmem:[%s7181_s5 + $0x478] sm:$0xff]  ;;  %v3927_v56 = vld [vmem:[%s7181_s5 + $0x4e0] sm:$0xff] }
 0x985   : > { %4130 = vmatpush.msra.mxu3 %v3843_v15  ;;  %4199 = vmatpush.msrb.mxu2 %v3891_v63  ;;  %v3435_v57 = vadd.f32 %v3434_v18, %v3341_v0  ;;  %v3911_v17 = vld [vmem:[%s7181_s5 + $0x460] sm:$0xff]  ;;  %v3924_v18 = vld [vmem:[%s7181_s5 + $0x4c8] sm:$0xff] }
 0x986   : > { %4154 = vmatpush.msra.mxu0 %v3858_v60  ;;  %4177 = vmatpush.msrb.mxu1 %v3874_v62  ;;  %v3740_v2 = vmax.f32 %v3412_v7, 0.0  ;;  %v3913_v60 = vld [vmem:[%s7181_s5 + $0x470] sm:$0xff]  ;;  %v3926_v62 = vld [vmem:[%s7181_s5 + $0x4d8] sm:$0xff] }
 0x987   : > { %4131 = vmatpush.msra.mxu3 %v3842_v8  ;;  %4200 = vmatpush.msrb.mxu2 %v3890_v9  ;;  %v3741_v33 = vmax.f32 %v3435_v57, 0.0  ;;  %v3912_v8 = vld [vmem:[%s7181_s5 + $0x468] sm:$0xff]  ;;  %v3925_v9 = vld [vmem:[%s7181_s5 + $0x4d0] sm:$0xff] }
 0x988   : > { %4155 = vmatpush.msra.mxu0 %v3857_v28  ;;  %4178 = vmatpush.msrb.mxu1 %v3873_v6  ;;  %v3942_v28 = vld [vmem:[%s7181_s5 + $0x558] sm:$0xff]  ;;  %v3961_v6 = vld [vmem:[%s7181_s5 + $0x5f0] sm:$0xff] }
 0x989   : > { %4132 = vmatpush.msra.mxu3 %v3841_v11  ;;  %4201 = vmatpush.msrb.mxu2 %v3889_v48  ;;  %v3388_v3 = vpop.f32.mrf.mxu3  ;;  %v3941_v11 = vld [vmem:[%s7181_s5 + $0x550] sm:$0xff]  ;;  %v3960_v48 = vld [vmem:[%s7181_s5 + $0x5e8] sm:$0xff] }
 0x98a   : > { %4156 = vmatpush.msra.mxu0 %v3856_v61  ;;  %4179 = vmatpush.msrb.mxu1 %v3872_v12  ;;  %v3457_v55 = vpop.f32.mrf.mxu2  ;;  %v3389_v43 = vadd.f32 %v3388_v3, %v3339_v20  ;;  %v3908_v3 = vld [vmem:[%s7181_s5 + $0x448] sm:$0xff] }
 0x98b   : > { %4133 = vmatpush.msra.mxu3 %v3840_v16  ;;  %4202 = vmatpush.msrb.mxu2 %v3888_v24  ;;  %v3458_v44 = vadd.f32 %v3457_v55, %v3342_v35  ;;  %v3923_v16 = vld [vmem:[%s7181_s5 + $0x4c0] sm:$0xff]  ;;  %v3921_v55 = vld [vmem:[%s7181_s5 + $0x4b0] sm:$0xff] }
 0x98c   : > { %4157 = vmatpush.msra.mxu0 %v3855_v19  ;;  %4180 = vmatpush.msrb.mxu1 %v3871_v21  ;;  %v3739_v31 = vmax.f32 %v3389_v43, 0.0  ;;  %v3940_v19 = vld [vmem:[%s7181_s5 + $0x548] sm:$0xff]  ;;  %v3959_v21 = vld [vmem:[%s7181_s5 + $0x5e0] sm:$0xff] }
 0x98d   : > { %4134 = vmatpush.msra.mxu3 %v3839_v5  ;;  %4203 = vmatpush.msrb.mxu2 %v3887_v42  ;;  %v3742_v52 = vmax.f32 %v3458_v44, 0.0  ;;  %v3909_v5 = vld [vmem:[%s7181_s5 + $0x450] sm:$0xff]  ;;  %v3922_v42 = vld [vmem:[%s7181_s5 + $0x4b8] sm:$0xff] }
 0x98e   : > { %4158 = vmatpush.msra.mxu0 %v3854_v23  ;;  %4181 = vmatpush.msrb.mxu1 %v3870_v26  ;;  %v3939_v23 = vld [vmem:[%s7181_s5 + $0x540] sm:$0xff]  ;;  %v3958_v26 = vld [vmem:[%s7181_s5 + $0x5d8] sm:$0xff] }
 0x98f   : > { %4135 = vmatpush.msra.mxu3 %v3838_v30  ;;  %4204 = vmatpush.msrb.mxu2 %v3886_v32 }
 0x990   : > { %4159 = vmatpush.msra.mxu0 %v3853_v50  ;;  %4182 = vmatpush.msrb.mxu1 %v3869_v27  ;;  %v3344_v50 = vperm.slane %v8050_v1, 5  ;;  %v3345_v27 = vperm.slane %v8050_v1, 6 }
 0x991   : > { %4070 = vmatmul.f32.vlgmr.msrb.gmra.mxu0 %v3740_v2  ;;  %4093 = vmatmul.f32.vlgmr.msra.gmra.mxu1 %v3741_v33  ;;  %v3938_v2 = vld [vmem:[%s7181_s5 + $0x538] sm:$0xff]  ;;  %v3957_v33 = vld [vmem:[%s7181_s5 + $0x5d0] sm:$0xff] }
 0x992   : > { %4160 = vmatpush.msra.mxu0 %v3852_v22  ;;  %4183 = vmatpush.msrb.mxu1 %v3868_v34 }
 0x993   : > { %4136 = vmatpush.msra.mxu3 %v3837_v45  ;;  %4205 = vmatpush.msrb.mxu2 %v3885_v47  ;;  %v3936_v45 = vld [vmem:[%s7181_s5 + $0x528] sm:$0xff]  ;;  %v3955_v47 = vld [vmem:[%s7181_s5 + $0x5c0] sm:$0xff] }
 0x994   : > { %4161 = vmatpush.msra.mxu0 %v3851_v37  ;;  %4184 = vmatpush.msrb.mxu1 %v3867_v38  ;;  %v3937_v37 = vld [vmem:[%s7181_s5 + $0x530] sm:$0xff]  ;;  %v3956_v38 = vld [vmem:[%s7181_s5 + $0x5c8] sm:$0xff] }
 0x995   : > { %4137 = vmatpush.msra.mxu3 %v3836_v49  ;;  %4206 = vmatpush.msrb.mxu2 %v3884_v58  ;;  %v3414_v15 = vpop.f32.mrf.mxu0  ;;  %v3343_v49 = vperm.slane %v8050_v1, 4  ;;  %v3346_v58 = vperm.slane %v8050_v1, 7 }
 0x996   : > { %4238 = vmatpush.msrb.mxu0 %v3930_v41  ;;  %4261 = vmatpush.msra.mxu1 %v3946_v14  ;;  %v3437_v63 = vpop.f32.mrf.mxu1  ;;  %v3415_v61 = vadd.f32 %v3414_v15, %v3340_v10  ;;  %v3910_v10 = vld [vmem:[%s7181_s5 + $0x458] sm:$0xff]  ;;  %v3907_v41 = vld [vmem:[%s7181_s5 + $0x440] sm:$0xff]  ;;  %v3920_v14 = vld [vmem:[%s7181_s5 + $0x4a8] sm:$0xff] }
 0x997   : > { %4138 = vmatpush.msra.mxu3 %v3835_v53  ;;  %4207 = vmatpush.msrb.mxu2 %v3883_v25  ;;  %v3438_v12 = vadd.f32 %v3437_v63, %v3341_v0 }
 0x998   : > { %4239 = vmatpush.msrb.mxu0 %v3929_v36  ;;  %4262 = vmatpush.msra.mxu1 %v3945_v40  ;;  %v3756_v24 = vmax.f32 %v3415_v61, 0.0  ;;  %v3906_v36 = vld [vmem:[%s7181_s5 + $0x438] sm:$0xff]  ;;  %v3919_v40 = vld [vmem:[%s7181_s5 + $0x4a0] sm:$0xff] }
 0x999   : > { %4047 = vmatmul.f32.vlgmr.msrb.gmra.mxu3 %v3739_v31  ;;  %4116 = vmatmul.f32.vlgmr.msra.gmra.mxu2 %v3742_v52  ;;  %v3757_v0 = vmax.f32 %v3438_v12, 0.0  ;;  %v3935_v31 = vld [vmem:[%s7181_s5 + $0x520] sm:$0xff]  ;;  %v3954_v52 = vld [vmem:[%s7181_s5 + $0x5b8] sm:$0xff] }
 0x99a   : > { %4240 = vmatpush.msrb.mxu0 %v3928_v29  ;;  %4263 = vmatpush.msra.mxu1 %v3944_v51 }
 0x99b   : > { %4215 = vmatpush.msrb.mxu3 %v3914_v39  ;;  %4284 = vmatpush.msra.mxu2 %v3962_v54  ;;  %v3391_v7 = vpop.f32.mrf.mxu3  ;;  %v3905_v39 = vld [vmem:[%s7181_s5 + $0x430] sm:$0xff] }
 0x99c   : > { %4241 = vmatpush.msrb.mxu0 %v3927_v56  ;;  %4264 = vmatpush.msra.mxu1 %v3943_v59  ;;  %v3460_v57 = vpop.f32.mrf.mxu2  ;;  %v3392_v30 = vadd.f32 %v3391_v7, %v3339_v20  ;;  %v3918_v56 = vld [vmem:[%s7181_s5 + $0x498] sm:$0xff] }
 0x99d   : > { %4216 = vmatpush.msrb.mxu3 %v3913_v60  ;;  %4285 = vmatpush.msra.mxu2 %v3961_v6  ;;  %v3461_v32 = vadd.f32 %v3460_v57, %v3342_v35  ;;  %v3934_v60 = vld [vmem:[%s7181_s5 + $0x518] sm:$0xff]  ;;  %v3917_v6 = vld [vmem:[%s7181_s5 + $0x490] sm:$0xff] }
 0x99e   : > { %4242 = vmatpush.msrb.mxu0 %v3926_v62  ;;  %4265 = vmatpush.msra.mxu1 %v3942_v28  ;;  %v3755_v43 = vmax.f32 %v3392_v30, 0.0  ;;  %v3953_v62 = vld [vmem:[%s7181_s5 + $0x5b0] sm:$0xff]  ;;  %v3904_v28 = vld [vmem:[%s7181_s5 + $0x428] sm:$0xff]  ;;  %v3950_v7 = vld [vmem:[%s7181_s5 + $0x598] sm:$0xff] }
 0x99f   : > { %4217 = vmatpush.msrb.mxu3 %v3912_v8  ;;  %4286 = vmatpush.msra.mxu2 %v3960_v48  ;;  %v3503_v22 = vpop.f32.mrf.mxu0  ;;  %v3758_v44 = vmax.f32 %v3461_v32, 0.0  ;;  %v3933_v8 = vld [vmem:[%s7181_s5 + $0x510] sm:$0xff]  ;;  %v3916_v48 = vld [vmem:[%s7181_s5 + $0x488] sm:$0xff] }
 0x9a0   : > { %4243 = vmatpush.msrb.mxu0 %v3925_v9  ;;  %4266 = vmatpush.msra.mxu1 %v3941_v11  ;;  %v3526_v34 = vpop.f32.mrf.mxu1  ;;  %v3504_v20 = vadd.f32 %v3503_v22, %v3344_v50  ;;  %v3952_v9 = vld [vmem:[%s7181_s5 + $0x5a8] sm:$0xff]  ;;  %v3903_v11 = vld [vmem:[%s7181_s5 + $0x420] sm:$0xff]  ;;  %v3949_v22 = vld [vmem:[%s7181_s5 + $0x590] sm:$0xff] }
 0x9a1   : > { %4218 = vmatpush.msrb.mxu3 %v3911_v17  ;;  %4287 = vmatpush.msra.mxu2 %v3959_v21  ;;  %v3527_v35 = vadd.f32 %v3526_v34, %v3345_v27  ;;  %v3951_v21 = vld [vmem:[%s7181_s5 + $0x5a0] sm:$0xff] }
 0x9a2   : > { %4244 = vmatpush.msrb.mxu0 %v3924_v18  ;;  %4267 = vmatpush.msra.mxu1 %v3940_v19  ;;  %v3744_v29 = vmax.f32 %v3504_v20, 0.0  ;;  %v3932_v19 = vld [vmem:[%s7181_s5 + $0x508] sm:$0xff] }
 0x9a3   : > { %4219 = vmatpush.msrb.mxu3 %v3910_v10  ;;  %4288 = vmatpush.msra.mxu2 %v3958_v26  ;;  %v3745_v51 = vmax.f32 %v3527_v35, 0.0  ;;  %v3902_v10 = vld [vmem:[%s7181_s5 + $0x418] sm:$0xff]  ;;  %v3931_v26 = vld [vmem:[%s7181_s5 + $0x500] sm:$0xff]  ;;  %v3948_v20 = vld [vmem:[%s7181_s5 + $0x588] sm:$0xff] }
 0x9a4   : > { %4245 = vmatpush.msrb.mxu0 %v3923_v16  ;;  %4268 = vmatpush.msra.mxu1 %v3939_v23  ;;  %v3915_v16 = vld [vmem:[%s7181_s5 + $0x480] sm:$0xff] }
 0x9a5   : > { %4073 = vmatmul.f32.gmra.mxu0 %v3756_v24  ;;  %4096 = vmatmul.f32.gmra.mxu1 %v3757_v0  ;;  %v3480_v53 = vpop.f32.mrf.mxu3  ;;  %v8175_v24 = vld [vmem:[%s7179_s3 + $0x8] sm:$0xff]  ;;  %s8485_s3 = sld [smem:[#allocation74_spill]] }
 0x9a6   : > { %4220 = vmatpush.msrb.mxu3 %v3909_v5  ;;  %4246 = vmatpush.msrb.mxu0 %v3922_v42  ;;  %v3549_v25 = vpop.f32.mrf.mxu2  ;;  %v3481_v59 = vadd.f32 %v3480_v53, %v3343_v49  ;;  %v3994_v42 = vld [vmem:[%s7181_s5 + $0x6f8] sm:$0xff]  ;;  %v3349_v30 = vperm.slane %v8175_v24, 2 }
 0x9a7   : > { %4269 = vmatpush.msra.mxu1 %v3938_v2  ;;  %4289 = vmatpush.msra.mxu2 %v3957_v33  ;;  %v3550_v54 = vadd.f32 %v3549_v25, %v3346_v58  ;;  %v3901_v33 = vld [vmem:[%s7181_s5 + $0x410] sm:$0xff] }
 0x9a8   : > { %4221 = vmatpush.msrb.mxu3 %v3908_v3  ;;  %4247 = vmatpush.msrb.mxu0 %v3921_v55  ;;  %v3743_v17 = vmax.f32 %v3481_v59, 0.0  ;;  %v3993_v55 = vld [vmem:[%s7181_s5 + $0x6f0] sm:$0xff]  ;;  %v4006_v59 = vld [vmem:[%s7181_s5 + $0x758] sm:$0xff] }
 0x9a9   : > { %4270 = vmatpush.msra.mxu1 %v3937_v37  ;;  %4290 = vmatpush.msra.mxu2 %v3956_v38  ;;  %v3506_v15 = vpop.f32.mrf.mxu0  ;;  %v3746_v18 = vmax.f32 %v3550_v54, 0.0  ;;  %v4009_v37 = vld [vmem:[%s7181_s5 + $0x770] sm:$0xff]  ;;  %v3900_v38 = vld [vmem:[%s7181_s5 + $0x408] sm:$0xff] }
 0x9aa   : > { %4222 = vmatpush.msrb.mxu3 %v3907_v41  ;;  %4248 = vmatpush.msrb.mxu0 %v3920_v14  ;;  %v3529_v63 = vpop.f32.mrf.mxu1  ;;  %v3507_v61 = vadd.f32 %v3506_v15, %v3344_v50  ;;  %v4010_v50 = vld [vmem:[%s7181_s5 + $0x778] sm:$0xff]  ;;  %v3992_v41 = vld [vmem:[%s7181_s5 + $0x6e8] sm:$0xff]  ;;  %v4025_v54 = vld [vmem:[%s7181_s5 + $0x7f0] sm:$0xff] }
 0x9ab   : > { %4271 = vmatpush.msra.mxu1 %v3936_v45  ;;  %4291 = vmatpush.msra.mxu2 %v3955_v47  ;;  %v3530_v12 = vadd.f32 %v3529_v63, %v3345_v27  ;;  %v3348_v27 = vperm.slane %v8175_v24, 1  ;;  %v4008_v14 = vld [vmem:[%s7181_s5 + $0x768] sm:$0xff]  ;;  %v3899_v45 = vld [vmem:[%s7181_s5 + $0x400] sm:$0xff]  ;;  %p5238_p5 = scmp.ne.s32.totalorder %s8485_s3, 11 }
 0x9ac   : > { %4050 = vmatmul.f32.gmra.mxu3 %v3755_v43  ;;  %4119 = vmatmul.f32.gmra.mxu2 %v3758_v44  ;;  %v3760_v0 = vmax.f32 %v3507_v61, 0.0  ;;  %v3947_v47 = vld [vmem:[%s7181_s5 + $0x580] sm:$0xff] }
 0x9ad   : > { %4223 = vmatpush.msrb.mxu3 %v3906_v36  ;;  %4249 = vmatpush.msrb.mxu0 %v3919_v40  ;;  %v3761_v23 = vmax.f32 %v3530_v12, 0.0  ;;  %v3978_v36 = vld [vmem:[%s7181_s5 + $0x678] sm:$0xff]  ;;  %v3991_v40 = vld [vmem:[%s7181_s5 + $0x6e0] sm:$0xff] }
 0x9ae   : > { %4272 = vmatpush.msra.mxu1 %v3935_v31  ;;  %4292 = vmatpush.msra.mxu2 %v3954_v52  ;;  %v4007_v31 = vld [vmem:[%s7181_s5 + $0x760] sm:$0xff]  ;;  %v4026_v52 = vld [vmem:[%s7181_s5 + $0x7f8] sm:$0xff] }
 0x9af   : > { %4162 = vmatmul.f32.vlgmr.msra.gmra.mxu0 %v3744_v29  ;;  %4185 = vmatmul.f32.vlgmr.msrb.gmra.mxu1 %v3745_v51  ;;  %v3483_v57 = vpop.f32.mrf.mxu3 }
 0x9b0   : > { %4224 = vmatpush.msrb.mxu3 %v3905_v39  ;;  %4250 = vmatpush.msrb.mxu0 %v3918_v56  ;;  %v3552_v5 = vpop.f32.mrf.mxu2  ;;  %v3484_v32 = vadd.f32 %v3483_v57, %v3343_v49  ;;  %v3347_v49 = vperm.slane %v8175_v24, 0  ;;  %v3977_v39 = vld [vmem:[%s7181_s5 + $0x670] sm:$0xff]  ;;  %v3990_v56 = vld [vmem:[%s7181_s5 + $0x6d8] sm:$0xff] }
 0x9b1   : > { %4273 = vmatpush.msra.mxu1 %v3934_v60  ;;  %4293 = vmatpush.msra.mxu2 %v3953_v62  ;;  %v3553_v2 = vadd.f32 %v3552_v5, %v3346_v58  ;;  %v3350_v58 = vperm.slane %v8175_v24, 3 }
 0x9b2   : > { %4225 = vmatpush.msrb.mxu3 %v3904_v28  ;;  %4251 = vmatpush.msrb.mxu0 %v3917_v6  ;;  %v3759_v43 = vmax.f32 %v3484_v32, 0.0  ;;  %v3976_v28 = vld [vmem:[%s7181_s5 + $0x668] sm:$0xff]  ;;  %v3989_v6 = vld [vmem:[%s7181_s5 + $0x6d0] sm:$0xff] }
 0x9b3   : > { %4274 = vmatpush.msra.mxu1 %v3933_v8  ;;  %4294 = vmatpush.msra.mxu2 %v3952_v9  ;;  %v3595_v34 = vpop.f32.mrf.mxu0  ;;  %v3762_v44 = vmax.f32 %v3553_v2, 0.0  ;;  %v4005_v8 = vld [vmem:[%s7181_s5 + $0x750] sm:$0xff]  ;;  %v4024_v9 = vld [vmem:[%s7181_s5 + $0x7e8] sm:$0xff] }
 0x9b4   : > { %4226 = vmatpush.msrb.mxu3 %v3903_v11  ;;  %4252 = vmatpush.msrb.mxu0 %v3916_v48  ;;  %v3618_v3 = vpop.f32.mrf.mxu1  ;;  %v3596_v1 = vadd.f32 %v3595_v34, %v3348_v27  ;;  %v3975_v11 = vld [vmem:[%s7181_s5 + $0x660] sm:$0xff]  ;;  %v3988_v48 = vld [vmem:[%s7181_s5 + $0x6c8] sm:$0xff]  ;;  %v4001_v34 = vld [vmem:[%s7181_s5 + $0x730] sm:$0xff] }
 0x9b5   : > { %4275 = vmatpush.msra.mxu1 %v3932_v19  ;;  %4295 = vmatpush.msra.mxu2 %v3951_v21  ;;  %v3619_v35 = vadd.f32 %v3618_v3, %v3349_v30  ;;  %v4004_v19 = vld [vmem:[%s7181_s5 + $0x748] sm:$0xff]  ;;  %v4023_v21 = vld [vmem:[%s7181_s5 + $0x7e0] sm:$0xff] }
 0x9b6   : > { %4139 = vmatmul.f32.vlgmr.msra.gmra.mxu3 %v3743_v17  ;;  %4208 = vmatmul.f32.vlgmr.msrb.gmra.mxu2 %v3746_v18  ;;  %v3748_v29 = vmax.f32 %v3596_v1, 0.0  ;;  %v4020_v3 = vld [vmem:[%s7181_s5 + $0x7c8] sm:$0xff] }
 0x9b7   : > { %4227 = vmatpush.msrb.mxu3 %v3902_v10  ;;  %4253 = vmatpush.msrb.mxu0 %v3915_v16  ;;  %v3749_v51 = vmax.f32 %v3619_v35, 0.0  ;;  %v3974_v10 = vld [vmem:[%s7181_s5 + $0x658] sm:$0xff]  ;;  %v3987_v16 = vld [vmem:[%s7181_s5 + $0x6c0] sm:$0xff]  ;;  %v4000_v1 = vld [vmem:[%s7181_s5 + $0x728] sm:$0xff] }
 0x9b8   : > { %4276 = vmatpush.msra.mxu1 %v3931_v26  ;;  %4296 = vmatpush.msra.mxu2 %v3950_v7  ;;  %v4003_v26 = vld [vmem:[%s7181_s5 + $0x740] sm:$0xff]  ;;  %v4022_v7 = vld [vmem:[%s7181_s5 + $0x7d8] sm:$0xff] }
 0x9b9   : > { %4165 = vmatmul.f32.gmra.mxu0 %v3760_v0  ;;  %4188 = vmatmul.f32.gmra.mxu1 %v3761_v23  ;;  %v3572_v53 = vpop.f32.mrf.mxu3  ;;  %v4019_v35 = vld [vmem:[%s7181_s5 + $0x7c0] sm:$0xff] }
 0x9ba   : > { %4330 = vmatpush.msra.mxu0 %v3994_v42  ;;  %4353 = vmatpush.msrb.mxu1 %v4010_v50  ;;  %v3641_v25 = vpop.f32.mrf.mxu2  ;;  %v3573_v60 = vadd.f32 %v3572_v53, %v3347_v49  ;;  %v3973_v42 = vld [vmem:[%s7181_s5 + $0x650] sm:$0xff]  ;;  %v3986_v50 = vld [vmem:[%s7181_s5 + $0x6b8] sm:$0xff] }
 0x9bb   : > { %4228 = vmatpush.msrb.mxu3 %v3901_v33  ;;  %4297 = vmatpush.msra.mxu2 %v3949_v22  ;;  %v3642_v62 = vadd.f32 %v3641_v25, %v3350_v58  ;;  %v3972_v33 = vld [vmem:[%s7181_s5 + $0x648] sm:$0xff]  ;;  %v3985_v22 = vld [vmem:[%s7181_s5 + $0x6b0] sm:$0xff] }
 0x9bc   : > { %4331 = vmatpush.msra.mxu0 %v3993_v55  ;;  %4354 = vmatpush.msrb.mxu1 %v4009_v37  ;;  %v3747_v17 = vmax.f32 %v3573_v60, 0.0  ;;  %v3971_v55 = vld [vmem:[%s7181_s5 + $0x640] sm:$0xff]  ;;  %v3984_v37 = vld [vmem:[%s7181_s5 + $0x6a8] sm:$0xff] }
 0x9bd   : > { %4229 = vmatpush.msrb.mxu3 %v3900_v38  ;;  %4298 = vmatpush.msra.mxu2 %v3948_v20  ;;  %v3598_v15 = vpop.f32.mrf.mxu0  ;;  %v3750_v18 = vmax.f32 %v3642_v62, 0.0 }
 0x9be   : > { %4332 = vmatpush.msra.mxu0 %v3992_v41  ;;  %4355 = vmatpush.msrb.mxu1 %v4008_v14  ;;  %v3621_v63 = vpop.f32.mrf.mxu1  ;;  %v3599_v61 = vadd.f32 %v3598_v15, %v3348_v27  ;;  %v4002_v27 = vld [vmem:[%s7181_s5 + $0x738] sm:$0xff]  ;;  %v3983_v14 = vld [vmem:[%s7181_s5 + $0x6a0] sm:$0xff]  ;;  %v3996_v15 = vld [vmem:[%s7181_s5 + $0x708] sm:$0xff] }
 0x9bf   : > { %4230 = vmatpush.msrb.mxu3 %v3899_v45  ;;  %4299 = vmatpush.msra.mxu2 %v3947_v47  ;;  %v3622_v12 = vadd.f32 %v3621_v63, %v3349_v30  ;;  %v4021_v30 = vld [vmem:[%s7181_s5 + $0x7d0] sm:$0xff]  ;;  %v3970_v41 = vld [vmem:[%s7181_s5 + $0x638] sm:$0xff]  ;;  %v3999_v45 = vld [vmem:[%s7181_s5 + $0x720] sm:$0xff] }
 0x9c0   : > { %4142 = vmatmul.f32.gmra.mxu3 %v3759_v43  ;;  %4211 = vmatmul.f32.gmra.mxu2 %v3762_v44  ;;  %v3764_v0 = vmax.f32 %v3599_v61, 0.0  ;;  %v4018_v47 = vld [vmem:[%s7181_s5 + $0x7b8] sm:$0xff]  ;;  %v4015_v63 = vld [vmem:[%s7181_s5 + $0x7a0] sm:$0xff] }
 0x9c1   : > { %4307 = vmatpush.msra.mxu3 %v3978_v36  ;;  %4333 = vmatpush.msra.mxu0 %v3991_v40  ;;  %v3765_v23 = vmax.f32 %v3622_v12, 0.0  ;;  %v3352_v36 = vperm.slane %v8175_v24, 5  ;;  %v3353_v40 = vperm.slane %v8175_v24, 6 }
 0x9c2   : > { %4356 = vmatpush.msrb.mxu1 %v4007_v31  ;;  %4376 = vmatpush.msrb.mxu2 %v4026_v52  ;;  %v3968_v31 = vld [vmem:[%s7181_s5 + $0x628] sm:$0xff]  ;;  %v3981_v52 = vld [vmem:[%s7181_s5 + $0x690] sm:$0xff] }
 0x9c3   : > { %4254 = vmatmul.f32.vlgmr.msrb.gmra.mxu0 %v3748_v29  ;;  %4277 = vmatmul.f32.vlgmr.msra.gmra.mxu1 %v3749_v51  ;;  %v3575_v57 = vpop.f32.mrf.mxu3  ;;  %v3998_v29 = vld [vmem:[%s7181_s5 + $0x718] sm:$0xff]  ;;  %v4017_v51 = vld [vmem:[%s7181_s5 + $0x7b0] sm:$0xff] }
 0x9c4   : > { %4308 = vmatpush.msra.mxu3 %v3977_v39  ;;  %4334 = vmatpush.msra.mxu0 %v3990_v56  ;;  %v3644_v5 = vpop.f32.mrf.mxu2  ;;  %v3576_v32 = vadd.f32 %v3575_v57, %v3347_v49  ;;  %v3969_v49 = vld [vmem:[%s7181_s5 + $0x630] sm:$0xff]  ;;  %v4016_v56 = vld [vmem:[%s7181_s5 + $0x7a8] sm:$0xff] }
 0x9c5   : > { %4357 = vmatpush.msrb.mxu1 %v4006_v59  ;;  %4377 = vmatpush.msrb.mxu2 %v4025_v54  ;;  %v3645_v2 = vadd.f32 %v3644_v5, %v3350_v58  ;;  %v3982_v58 = vld [vmem:[%s7181_s5 + $0x698] sm:$0xff]  ;;  %v3997_v39 = vld [vmem:[%s7181_s5 + $0x710] sm:$0xff]  ;;  %v3967_v59 = vld [vmem:[%s7181_s5 + $0x620] sm:$0xff] }
 0x9c6   : > { %4309 = vmatpush.msra.mxu3 %v3976_v28  ;;  %4335 = vmatpush.msra.mxu0 %v3989_v6  ;;  %v3763_v38 = vmax.f32 %v3576_v32, 0.0  ;;  %v3980_v54 = vld [vmem:[%s7181_s5 + $0x688] sm:$0xff]  ;;  %v3351_v28 = vperm.slane %v8175_v24, 4  ;;  %v3354_v6 = vperm.slane %v8175_v24, 7  ;;  %v3963_v5 = vld [vmem:[%s7181_s5 + $0x600] sm:$0xff] }
 0x9c7   : > { %4358 = vmatpush.msrb.mxu1 %v4005_v8  ;;  %4378 = vmatpush.msrb.mxu2 %v4024_v9  ;;  %v3766_v20 = vmax.f32 %v3645_v2, 0.0  ;;  %v3966_v8 = vld [vmem:[%s7181_s5 + $0x618] sm:$0xff]  ;;  %v3979_v9 = vld [vmem:[%s7181_s5 + $0x680] sm:$0xff] }
 0x9c8   : > { %4310 = vmatpush.msra.mxu3 %v3975_v11  ;;  %4336 = vmatpush.msra.mxu0 %v3988_v48  ;;  %v3995_v11 = vld [vmem:[%s7181_s5 + $0x700] sm:$0xff]  ;;  %v4014_v48 = vld [vmem:[%s7181_s5 + $0x798] sm:$0xff] }
 0x9c9   : > { %4359 = vmatpush.msrb.mxu1 %v4004_v19  ;;  %4379 = vmatpush.msrb.mxu2 %v4023_v21  ;;  %v3965_v21 = vld [vmem:[%s7181_s5 + $0x610] sm:$0xff] }
 0x9ca   : > { %4231 = vmatmul.f32.vlgmr.msrb.gmra.mxu3 %v3747_v17  ;;  %4300 = vmatmul.f32.vlgmr.msra.gmra.mxu2 %v3750_v18 }
 0x9cb   : > { %4311 = vmatpush.msra.mxu3 %v3974_v10  ;;  %4337 = vmatpush.msra.mxu0 %v3987_v16  ;;  %v4013_v10 = vld [vmem:[%s7181_s5 + $0x790] sm:$0xff] }
 0x9cc   : > { %4360 = vmatpush.msrb.mxu1 %v4003_v26  ;;  %4380 = vmatpush.msrb.mxu2 %v4022_v7  ;;  %v4012_v26 = vld [vmem:[%s7181_s5 + $0x788] sm:$0xff] }
 0x9cd   : > { %4257 = vmatmul.f32.gmra.mxu0 %v3764_v0  ;;  %4280 = vmatmul.f32.gmra.mxu1 %v3765_v23  ;;  %v3964_v23 = vld [vmem:[%s7181_s5 + $0x608] sm:$0xff] }
 0x9ce   : > { %4312 = vmatpush.msra.mxu3 %v3973_v42  ;;  %4338 = vmatpush.msra.mxu0 %v3986_v50  ;;  %v4011_v42 = vld [vmem:[%s7181_s5 + $0x780] sm:$0xff]  ;;  %s8486_s5 = sld [smem:[#allocation70_spill]] (!%p5238_p5) }
 0x9cf   : > { %4361 = vmatpush.msrb.mxu1 %v4002_v27  ;;  %4381 = vmatpush.msrb.mxu2 %v4021_v30  ;;  %v3687_v43 = vpop.f32.mrf.mxu0 }
 0x9d0   : > { %4313 = vmatpush.msra.mxu3 %v3972_v33  ;;  %4339 = vmatpush.msra.mxu0 %v3985_v22  ;;  %v3710_v44 = vpop.f32.mrf.mxu1  ;;  %v3688_v53 = vadd.f32 %v3687_v43, %v3352_v36 }
 0x9d1   : > { %4362 = vmatpush.msrb.mxu1 %v4001_v34  ;;  %4382 = vmatpush.msrb.mxu2 %v4020_v3  ;;  %v3711_v25 = vadd.f32 %v3710_v44, %v3353_v40 }
 0x9d2   : > { %4314 = vmatpush.msra.mxu3 %v3971_v55  ;;  %4340 = vmatpush.msra.mxu0 %v3984_v37  ;;  %v3752_v61 = vmax.f32 %v3688_v53, 0.0 }
 0x9d3   : > { %4363 = vmatpush.msrb.mxu1 %v4000_v1  ;;  %4383 = vmatpush.msrb.mxu2 %v4019_v35  ;;  %v3753_v12 = vmax.f32 %v3711_v25, 0.0 }
 0x9d4   : > { %4234 = vmatmul.f32.gmra.mxu3 %v3763_v38  ;;  %4303 = vmatmul.f32.gmra.mxu2 %v3766_v20 }
 0x9d5   : > { %4315 = vmatpush.msra.mxu3 %v3970_v41  ;;  %4341 = vmatpush.msra.mxu0 %v3983_v14  ;;  %v3664_v60 = vpop.f32.mrf.mxu3  ;;  %v5586_v41 = vld [vmem:[%s1392_s8] ss:$0 sm:$0xff]  ;;  %s8484_s8 = scalar_lea.vmem [#allocation25], %s7157_s1  ;;  %s8488_s1 = sld [smem:[#allocation71_spill]] (!%p5238_p5) }
 0x9d6   : > { %4364 = vmatpush.msrb.mxu1 %v3999_v45  ;;  %4384 = vmatpush.msrb.mxu2 %v4018_v47  ;;  %v3733_v62 = vpop.f32.mrf.mxu2  ;;  %v3665_v24 = vadd.f32 %v3664_v60, %v3351_v28 }
 0x9d7   : > { %4316 = vmatpush.msra.mxu3 %v3969_v49  ;;  %4342 = vmatpush.msra.mxu0 %v3982_v58  ;;  %v3690_v17 = vpop.f32.mrf.mxu0  ;;  %v3734_v19 = vadd.f32 %v3733_v62, %v3354_v6 }
 0x9d8   : > { %4365 = vmatpush.msrb.mxu1 %v3998_v29  ;;  %4385 = vmatpush.msrb.mxu2 %v4017_v51  ;;  %v3713_v18 = vpop.f32.mrf.mxu1  ;;  %v3691_v16 = vadd.f32 %v3690_v17, %v3352_v36  ;;  %v3751_v7 = vmax.f32 %v3665_v24, 0.0 }
 0x9d9   : > { %4317 = vmatpush.msra.mxu3 %v3968_v31  ;;  %4343 = vmatpush.msra.mxu0 %v3981_v52  ;;  %v3714_v0 = vadd.f32 %v3713_v18, %v3353_v40  ;;  %v3754_v57 = vmax.f32 %v3734_v19, 0.0 }
 0x9da   : > { %4366 = vmatpush.msrb.mxu1 %v3997_v39  ;;  %4386 = vmatpush.msrb.mxu2 %v4016_v56  ;;  %v3768_v30 = vmax.f32 %v3691_v16, 0.0 }
 0x9db   : > { %4318 = vmatpush.msra.mxu3 %v3967_v59  ;;  %4344 = vmatpush.msra.mxu0 %v3980_v54  ;;  %v3769_v32 = vmax.f32 %v3714_v0, 0.0 }
 0x9dc   : > { %4367 = vmatpush.msrb.mxu1 %v3996_v15  ;;  %4387 = vmatpush.msrb.mxu2 %v4015_v63 }
 0x9dd   : > { %4319 = vmatpush.msra.mxu3 %v3966_v8  ;;  %4345 = vmatpush.msra.mxu0 %v3979_v9  ;;  %v3667_v50 = vpop.f32.mrf.mxu3 }
 0x9de   : > { %4368 = vmatpush.msrb.mxu1 %v3995_v11  ;;  %4388 = vmatpush.msrb.mxu2 %v4014_v48  ;;  %v3736_v27 = vpop.f32.mrf.mxu2  ;;  %v3668_v2 = vadd.f32 %v3667_v50, %v3351_v28 }
 0x9df   : > { %4346 = vmatmul.f32.vlgmr.msra.gmra.mxu0 %v3752_v61  ;;  %4369 = vmatmul.f32.vlgmr.msrb.gmra.mxu1 %v3753_v12  ;;  %v3737_v33 = vadd.f32 %v3736_v27, %v3354_v6 }
 0x9e0   : > { %4320 = vmatpush.msra.mxu3 %v3965_v21  ;;  %4389 = vmatpush.msrb.mxu2 %v4013_v10  ;;  %v3767_v22 = vmax.f32 %v3668_v2, 0.0 }
 0x9e1   : > { %v3770_v34 = vmax.f32 %v3737_v33, 0.0 }
 0x9e2   : > { %4321 = vmatpush.msra.mxu3 %v3964_v23  ;;  %4390 = vmatpush.msrb.mxu2 %v4012_v26 }
 0x9e4   : > { %4322 = vmatpush.msra.mxu3 %v3963_v5  ;;  %4391 = vmatpush.msrb.mxu2 %v4011_v42 }
 0x9e5   : > { %4323 = vmatmul.f32.vlgmr.msra.gmra.mxu3 %v3751_v7  ;;  %4392 = vmatmul.f32.vlgmr.msrb.gmra.mxu2 %v3754_v57 }
 0x9e7   : > { %4349 = vmatmul.f32.gmra.mxu0 %v3768_v30  ;;  %4372 = vmatmul.f32.gmra.mxu1 %v3769_v32 }
 0x9ed   : > { %4326 = vmatmul.f32.gmra.mxu3 %v3767_v22  ;;  %4395 = vmatmul.f32.gmra.mxu2 %v3770_v34 }
 0xa0e   : > { %v4071_v3 = vpop.f32.mrf.mxu0  ;;  %v4094_v37 = vpop.f32.mrf.mxu1 }
 0xa1c   : > { %v4048_v55 = vpop.f32.mrf.mxu3  ;;  %v4117_v38 = vpop.f32.mrf.mxu2 }
 0xa1d   : > { %v4049_v43 = vadd.f32 %v5586_v41, %v4048_v55 }
 0xa1f   : > { %v4072_v47 = vadd.f32 %v4071_v3, %v4049_v43 }
 0xa21   : > { %v4095_v49 = vadd.f32 %v4094_v37, %v4072_v47 }
 0xa22   : > { %v4074_v20 = vpop.f32.mrf.mxu0  ;;  %v4097_v35 = vpop.f32.mrf.mxu1 }
 0xa23   : > { %v4118_v29 = vadd.f32 %v4117_v38, %v4095_v49 }
 0xa2c   : > { %v4163_v44 = vpop.f32.mrf.mxu0  ;;  %v4186_v36 = vpop.f32.mrf.mxu1 }
 0xa2f   : > { %v4051_v1 = vpop.f32.mrf.mxu3  ;;  %v4120_v14 = vpop.f32.mrf.mxu2 }
 0xa30   : > { %v4052_v58 = vadd.f32 %v5586_v41, %v4051_v1 }
 0xa32   : > { %v4075_v51 = vadd.f32 %v4074_v20, %v4052_v58 }
 0xa34   : > { %v4098_v39 = vadd.f32 %v4097_v35, %v4075_v51 }
 0xa36   : > { %v4166_v31 = vpop.f32.mrf.mxu0  ;;  %v4189_v25 = vpop.f32.mrf.mxu1  ;;  %v4121_v54 = vadd.f32 %v4120_v14, %v4098_v39 }
 0xa39   : > { %v4140_v45 = vpop.f32.mrf.mxu3  ;;  %v4209_v40 = vpop.f32.mrf.mxu2 }
 0xa3a   : > { %v4141_v53 = vadd.f32 %v4140_v45, %v4118_v29 }
 0xa3c   : > { %v4164_v59 = vadd.f32 %v4163_v44, %v4141_v53 }
 0xa3e   : > { %v4187_v60 = vadd.f32 %v4186_v36, %v4164_v59 }
 0xa40   : > { %v4255_v15 = vpop.f32.mrf.mxu0  ;;  %v4278_v28 = vpop.f32.mrf.mxu1  ;;  %v4210_v6 = vadd.f32 %v4209_v40, %v4187_v60 }
 0xa43   : > { %v4143_v52 = vpop.f32.mrf.mxu3  ;;  %v4212_v56 = vpop.f32.mrf.mxu2 }
 0xa44   : > { %v4144_v62 = vadd.f32 %v4143_v52, %v4121_v54  ;;  %v5587_v54 = vld [vmem:[%s1401_s9] ss:$0 sm:$0xff]  ;;  %s8487_s9 = sld [smem:[#allocation69_spill]] (!%p5238_p5) }
 0xa46   : > { %v4167_v8 = vadd.f32 %v4166_v31, %v4144_v62 }
 0xa48   : > { %v4190_v12 = vadd.f32 %v4189_v25, %v4167_v8 }
 0xa4a   : > { %v4258_v48 = vpop.f32.mrf.mxu0  ;;  %v4213_v18 = vadd.f32 %v4212_v56, %v4190_v12  ;;  %v4281_v24 = vpop.f32.mrf.mxu1 }
 0xa4d   : > { %v4232_v63 = vpop.f32.mrf.mxu3  ;;  %v4301_v9 = vpop.f32.mrf.mxu2 }
 0xa4e   : > { %v4233_v61 = vadd.f32 %v4232_v63, %v4210_v6 }
 0xa50   : > { %v4256_v11 = vadd.f32 %v4255_v15, %v4233_v61 }
 0xa52   : > { %v4279_v19 = vadd.f32 %v4278_v28, %v4256_v11 }
 0xa54   : > { %v4302_v16 = vadd.f32 %v4301_v9, %v4279_v19 }
 0xa57   : > { %v4235_v17 = vpop.f32.mrf.mxu3  ;;  %v4304_v10 = vpop.f32.mrf.mxu2 }
 0xa58   : > { %v4236_v21 = vadd.f32 %v4235_v17, %v4213_v18 }
 0xa5a   : > { %v4259_v0 = vadd.f32 %v4258_v48, %v4236_v21 }
 0xa5c   : > { %v4347_v23 = vpop.f32.mrf.mxu0  ;;  %v4370_v57 = vpop.f32.mrf.mxu1  ;;  %v4282_v5 = vadd.f32 %v4281_v24, %v4259_v0 }
 0xa5e   : > { %v4305_v30 = vadd.f32 %v4304_v10, %v4282_v5 }
 0xa64   : > { %v4350_v34 = vpop.f32.mrf.mxu0  ;;  %v4373_v55 = vpop.f32.mrf.mxu1 }
 0xa68   : > { %v4324_v26 = vpop.f32.mrf.mxu3  ;;  %v4393_v50 = vpop.f32.mrf.mxu2 }
 0xa69   : > { %v4325_v7 = vadd.f32 %v4324_v26, %v4302_v16 }
 0xa6b   : > { %v4348_v42 = vadd.f32 %v4347_v23, %v4325_v7 }
 0xa6d   : > { %v4371_v27 = vadd.f32 %v4370_v57, %v4348_v42 }
 0xa6f   : > { %v4394_v32 = vadd.f32 %v4393_v50, %v4371_v27 }
 0xa70   : > { %v4327_v2 = vpop.f32.mrf.mxu3  ;;  %v4396_v38 = vpop.f32.mrf.mxu2 }
 0xa71   : > { %v4328_v33 = vadd.f32 %v4327_v2, %v4305_v30  ;;  %v4399_v22 = vadd.f32 %v4394_v32, %v7783_v13 }
 0xa73   : > { %v4351_v3 = vadd.f32 %v4350_v34, %v4328_v33  ;;  %4403 = vadd.xlane.f32.xlu2 %v4399_v22 }
 0xa75   : > { %v4374_v37 = vadd.f32 %v4373_v55, %v4351_v3 }
 0xa77   : > { %v4397_v20 = vadd.f32 %v4396_v38, %v4374_v37 }
 0xa79   : > { %v4400_v1 = vadd.f32 %v4397_v20, %v7823_v46 }
 0xa7b   : > { %4405 = vadd.xlane.f32.xlu0 %v4400_v1 }
 0xae6   : > { %v4404_v35 = vpop.xlane.xlu2 %4403 }
 0xae7   : > { %v4407_v41 = vmul.f32 %v4404_v35, %v7648_v4 }
 0xae9   : > { %v4409_v14 = vsub.f32 %v4399_v22, %v4407_v41 }
 0xaeb   : > { %v4411_v43 = vmul.f32 %v4409_v14, %v4409_v14 }
 0xaed   : > { %4413 = vadd.xlane.f32.xlu1 %v4411_v43 }
 0xaee   : > { %v4406_v44 = vpop.xlane.xlu0 %4405 }
 0xaef   : > { %v4408_v45 = vmul.f32 %v4406_v44, %v7648_v4 }
 0xaf1   : > { %v4410_v13 = vsub.f32 %v4400_v1, %v4408_v45 }
 0xaf3   : > { %v4412_v47 = vmul.f32 %v4410_v13, %v4410_v13 }
 0xaf5   : > { %4415 = vadd.xlane.f32.xlu2 %v4412_v47 }
 0xb60   : > { %v4414_v36 = vpop.xlane.xlu1 %4413 }
 0xb61   : > { %v4417_v40 = vmul.f32 %v4414_v36, %v7648_v4 }
 0xb63   : > { %v4419_v49 = vadd.f32 1e-05, %v4417_v40 }
 0xb65   : > { %5659 = vrsqrt.f32 %v4419_v49  ;;  %vm4427_vm3 = vweird.f32 %v4419_v49 }
 0xb68   : > { %v4416_v46 = vpop.xlane.xlu2 %4415 }
 0xb69   : > { %v4418_v58 = vmul.f32 %v4416_v46, %v7648_v4  ;;  %v5588_v4 = vld [vmem:[%s8484_s8] ss:$0 sm:$0xff] }
 0xb6b   : > { %v5660_v29 = vpop.eup %5659  ;;  %v4420_v51 = vadd.f32 1e-05, %v4418_v58 }
 0xb6c   : > { %v4422_v31 = vmul.f32 %v5660_v29, %v4419_v49  ;;  %vm4428_vm2 = vweird.f32 %v5660_v29 }
 0xb6d   : > { %5661 = vrsqrt.f32 %v4420_v51  ;;  %vm4429_vm4 = vmor %vm4427_vm3, %vm4428_vm2  ;;  %vm4437_vm8 = vweird.f32 %v4420_v51 }
 0xb6e   : > { %v4423_v52 = vmul.f32 %v5660_v29, %v4422_v31 }
 0xb70   : > { %v4424_v53 = vmul.f32 0.5, %v4423_v52 }
 0xb72   : > { %v4425_v25 = vsub.f32 1.5, %v4424_v53 }
 0xb73   : > { %v5662_v39 = vpop.eup %5661 }
 0xb74   : > { %v4426_v56 = vmul.f32 %v5660_v29, %v4425_v25  ;;  %v4432_v59 = vmul.f32 %v5662_v39, %v4420_v51  ;;  %vm4438_vm6 = vweird.f32 %v5662_v39 }
 0xb75   : > { %vm4439_vm9 = vmor %vm4437_vm8, %vm4438_vm6 }
 0xb76   : > { %v4430_v60 = vsel %vm4429_vm4, %v5660_v29, %v4426_v56  ;;  %v4433_v62 = vmul.f32 %v5662_v39, %v4432_v59 }
 0xb77   : > { %v4441_v15 = vmul.f32 %v4430_v60, %v4409_v14 }
 0xb78   : > { %v4434_v63 = vmul.f32 0.5, %v4433_v62 }
 0xb79   : > { %v4446_v28 = vmul.f32 %v5587_v54, %v4441_v15 }
 0xb7a   : > { %v4435_v6 = vsub.f32 1.5, %v4434_v63 }
 0xb7b   : > { %v8289_v8 = vadd.f32 %v5588_v4, %v4446_v28 }
 0xb7c   : > { %v4436_v9 = vmul.f32 %v5662_v39, %v4435_v6 }
 0xb7d   : > { %4453 = vst [vmem:[#allocation2] sm:$0xff] %v8289_v8 }
 0xb7e   : > { %v4440_v61 = vsel %vm4439_vm9, %v5662_v39, %v4436_v9 }
 0xb7f   : > { %v4442_v12 = vmul.f32 %v4440_v61, %v4410_v13 }
 0xb81   : > { %v4447_v11 = vmul.f32 %v5587_v54, %v4442_v12  ;;  %4458 = sbr.rel (%p5238_p5) target bundleno = 3613 (0xe1d), region = 252 }
 0xb83   : > { %v8292_v48 = vadd.f32 %v5588_v4, %v4447_v11 }
 0xb85   : > { %4454 = vst [vmem:[#allocation2 + $0x8] sm:$0xff] %v8292_v48 }
 0xb86   : > { %v4472_v17 = vld [vmem:[#allocation26] sm:$0x7]  ;;  %vm4481_vm10 = vcmask 1042432   ;;  %v4471_v18 = vld [vmem:[#allocation6] sm:$0x3]  ;;  %vm4477_vm11 = vcmask 23552  }
 0xb87   : > { %5239 = vmatpush.msk.msra.mxu1 %vm4481_vm10, %v4472_v17  ;;  %v4508_v24 = vld [vmem:[#allocation28 + $0x10] sm:$0xff]  ;;  %v4507_v19 = vld [vmem:[#allocation28 + $0x8] sm:$0xff]  ;;  %v4506_v21 = vld [vmem:[#allocation28] sm:$0xff]  ;;  %vm4513_vm12 = vcmask 195584   ;;  %v4459_v25 = vrot.slane %v8289_v8, 4  ;;  %v4465_v39 = vrot.slane %v8292_v48, 4 }
 0xb88   : > { %5240 = vmatmul.msk.f32.vlgmr.msra.gmra.mxu1 %vm4477_vm11, %v4471_v18  ;;  %v4545_v10 = vld [vmem:[#allocation31 + $0x38] sm:$0xff]  ;;  %v4544_v16 = vld [vmem:[#allocation31 + $0x30] sm:$0xff]  ;;  %v4543_v0 = vld [vmem:[#allocation31 + $0x28] sm:$0xff]  ;;  %vm4687_vm13 = vcmask 9216  }
 0xb89   : > { %4530 = vmatpush.msrb.mxu1 %v4508_v24  ;;  %4561 = vmatpush.msra.mxu2 %v4545_v10  ;;  %v4542_v23 = vld [vmem:[#allocation31 + $0x20] sm:$0xff]  ;;  %v4541_v26 = vld [vmem:[#allocation31 + $0x18] sm:$0xff]  ;;  %v4540_v50 = vld [vmem:[#allocation31 + $0x10] sm:$0xff]  ;;  %v4460_v56 = vadd.f32 %v4459_v25, %v8289_v8  ;;  %v4466_v59 = vadd.f32 %v4465_v39, %v8292_v48 }
 0xb8a   : > { %v5665_v7 = vld [vmem:[#allocation27] ss:$0 sm:$0xff]  ;;  %v4539_v27 = vld [vmem:[#allocation31 + $0x8] sm:$0xff]  ;;  %v4603_v2 = vld [vmem:[%s8486_s5 + $0x70] sm:$0xff] }
 0xb8b   : > { %4531 = vmatpush.msrb.mxu1 %v4507_v19  ;;  %4562 = vmatpush.msra.mxu2 %v4544_v16  ;;  %v4538_v30 = vld [vmem:[#allocation31] sm:$0xff]  ;;  %v4602_v22 = vld [vmem:[%s8486_s5 + $0x68] sm:$0xff]  ;;  %v4587_v34 = vld [vmem:[%s8487_s9 + $0x70] sm:$0xff]  ;;  %v4461_v62 = vrot.slane %v4460_v56, 2  ;;  %v4467_v4 = vrot.slane %v4466_v59, 2 }
 0xb8c   : > { %v4604_v32 = vld [vmem:[%s8486_s5 + $0x78] sm:$0xff]  ;;  %v4586_v3 = vld [vmem:[%s8487_s9 + $0x68] sm:$0xff]  ;;  %v4601_v55 = vld [vmem:[%s8486_s5 + $0x60] sm:$0xff] }
 0xb8d   : > { %4532 = vmatpush.msrb.mxu1 %v4506_v21  ;;  %4563 = vmatpush.msra.mxu2 %v4543_v0  ;;  %v4588_v33 = vld [vmem:[%s8487_s9 + $0x78] sm:$0xff]  ;;  %v4585_v37 = vld [vmem:[%s8487_s9 + $0x60] sm:$0xff]  ;;  %v4599_v1 = vld [vmem:[%s8486_s5 + $0x50] sm:$0xff]  ;;  %v4462_v28 = vadd.f32 %v4461_v62, %v4460_v56  ;;  %v4468_v6 = vadd.f32 %v4467_v4, %v4466_v59 }
 0xb8e   : > { %4605 = vmatpush.msra.mxu3 %v4604_v32  ;;  %4630 = vmatpush.msra.mxu0 %v4588_v33  ;;  %v4600_v38 = vld [vmem:[%s8486_s5 + $0x58] sm:$0xff]  ;;  %v4583_v35 = vld [vmem:[%s8487_s9 + $0x50] sm:$0xff]  ;;  %v4598_v41 = vld [vmem:[%s8486_s5 + $0x48] sm:$0xff] }
 0xb8f   : > { %4564 = vmatpush.msra.mxu2 %v4542_v23  ;;  %v4584_v20 = vld [vmem:[%s8487_s9 + $0x58] sm:$0xff]  ;;  %v4582_v14 = vld [vmem:[%s8487_s9 + $0x48] sm:$0xff]  ;;  %v4597_v43 = vld [vmem:[%s8486_s5 + $0x40] sm:$0xff]  ;;  %v4463_v8 = vrot.slane %v4462_v28, 1  ;;  %v4469_v12 = vrot.slane %v4468_v6, 1 }
 0xb90   : > { %4606 = vmatpush.msra.mxu3 %v4603_v2  ;;  %4631 = vmatpush.msra.mxu0 %v4587_v34  ;;  %v4581_v44 = vld [vmem:[%s8487_s9 + $0x40] sm:$0xff]  ;;  %v4596_v45 = vld [vmem:[%s8486_s5 + $0x38] sm:$0xff]  ;;  %v4595_v47 = vld [vmem:[%s8486_s5 + $0x30] sm:$0xff] }
 0xb91   : > { %4565 = vmatpush.msra.mxu2 %v4541_v26  ;;  %v4580_v13 = vld [vmem:[%s8487_s9 + $0x38] sm:$0xff]  ;;  %v4579_v36 = vld [vmem:[%s8487_s9 + $0x30] sm:$0xff]  ;;  %v4594_v40 = vld [vmem:[%s8486_s5 + $0x28] sm:$0xff]  ;;  %v4464_v17 = vadd.f32 %v4463_v8, %v4462_v28  ;;  %v4470_v18 = vadd.f32 %v4469_v12, %v4468_v6 }
 0xb92   : > { %4607 = vmatpush.msra.mxu3 %v4602_v22  ;;  %4632 = vmatpush.msra.mxu0 %v4586_v3  ;;  %v4578_v49 = vld [vmem:[%s8487_s9 + $0x28] sm:$0xff]  ;;  %v4593_v46 = vld [vmem:[%s8486_s5 + $0x20] sm:$0xff]  ;;  %v4592_v58 = vld [vmem:[%s8486_s5 + $0x18] sm:$0xff] }
 0xb93   : > { %4566 = vmatpush.msra.mxu2 %v4540_v50  ;;  %v5666_v29 = vld [vmem:[#allocation29] ss:$0 sm:$0xff]  ;;  %v4590_v54 = vld [vmem:[%s8486_s5 + $0x8] sm:$0xff]  ;;  %v4577_v60 = vld [vmem:[%s8487_s9 + $0x20] sm:$0xff] }
 0xb94   : > { %4608 = vmatpush.msra.mxu3 %v4601_v55  ;;  %4633 = vmatpush.msra.mxu0 %v4585_v37  ;;  %v4591_v51 = vld [vmem:[%s8486_s5 + $0x10] sm:$0xff]  ;;  %v4589_v15 = vld [vmem:[%s8486_s5] sm:$0xff]  ;;  %v4576_v63 = vld [vmem:[%s8487_s9 + $0x18] sm:$0xff] }
 0xb95   : > { %4567 = vmatpush.msra.mxu2 %v4539_v27  ;;  %v4575_v9 = vld [vmem:[%s8487_s9 + $0x10] sm:$0xff]  ;;  %v4574_v61 = vld [vmem:[%s8487_s9 + $0x8] sm:$0xff]  ;;  %v4659_v11 = vld [vmem:[%s8488_s1 + $0x18] sm:$0xff] }
 0xb96   : > { %4609 = vmatpush.msra.mxu3 %v4600_v38  ;;  %4634 = vmatpush.msra.mxu0 %v4584_v20  ;;  %v4573_v48 = vld [vmem:[%s8487_s9] sm:$0xff]  ;;  %v5667_v19 = vld [vmem:[#allocation32] ss:$0 sm:$0xff]  ;;  %v4658_v16 = vld [vmem:[%s8488_s1 + $0x10] sm:$0xff] }
 0xb97   : > { %4568 = vmatpush.msra.mxu2 %v4538_v30  ;;  %4679 = vmatpush.msra.mxu1 %v4659_v11  ;;  %v4657_v0 = vld [vmem:[%s8488_s1 + $0x8] sm:$0xff]  ;;  %v4656_v23 = vld [vmem:[%s8488_s1] sm:$0xff]  ;;  %v5669_v27 = vld [vmem:[#allocation35] ss:$0 sm:$0xff] }
 0xb98   : > { %4610 = vmatpush.msra.mxu3 %v4599_v1  ;;  %4635 = vmatpush.msra.mxu0 %v4583_v35 }
 0xb99   : > { %4680 = vmatpush.msra.mxu1 %v4658_v16 }
 0xb9a   : > { %4611 = vmatpush.msra.mxu3 %v4598_v41  ;;  %4636 = vmatpush.msra.mxu0 %v4582_v14 }
 0xb9b   : > { %4681 = vmatpush.msra.mxu1 %v4657_v0 }
 0xb9c   : > { %4612 = vmatpush.msra.mxu3 %v4597_v43  ;;  %4637 = vmatpush.msra.mxu0 %v4581_v44 }
 0xb9d   : > { %4682 = vmatpush.msra.mxu1 %v4656_v23 }
 0xb9e   : > { %4613 = vmatpush.msra.mxu3 %v4596_v45  ;;  %4638 = vmatpush.msra.mxu0 %v4580_v13 }
 0xba0   : > { %4614 = vmatpush.msra.mxu3 %v4595_v47  ;;  %4639 = vmatpush.msra.mxu0 %v4579_v36 }
 0xba2   : > { %4615 = vmatpush.msra.mxu3 %v4594_v40  ;;  %4640 = vmatpush.msra.mxu0 %v4578_v49 }
 0xba4   : > { %4616 = vmatpush.msra.mxu3 %v4593_v46  ;;  %4641 = vmatpush.msra.mxu0 %v4577_v60 }
 0xba6   : > { %4617 = vmatpush.msra.mxu3 %v4592_v58  ;;  %4642 = vmatpush.msra.mxu0 %v4576_v63 }
 0xba8   : > { %4618 = vmatpush.msra.mxu3 %v4591_v51  ;;  %4643 = vmatpush.msra.mxu0 %v4575_v9 }
 0xbaa   : > { %4619 = vmatpush.msra.mxu3 %v4590_v54  ;;  %4644 = vmatpush.msra.mxu0 %v4574_v61 }
 0xbac   : > { %4620 = vmatpush.msra.mxu3 %v4589_v15  ;;  %4645 = vmatpush.msra.mxu0 %v4573_v48 }
 0xc05   : > { %v4502_v57 = vpop.f32.mrf.mxu1 }
 0xc06   : > { %v4503_v5 = vadd.f32 %v5665_v7, %v4502_v57  ;;  %v5668_v7 = vld [vmem:[#allocation34] ss:$0 sm:$0xff] }
 0xc08   : > { %v4505_v42 = vmax.f32 %v4503_v5, 0.0 }
 0xc0a   : > { %5241 = vmatmul.msk.f32.vlgmr.msrb.gmra.mxu1 %vm4513_vm12, %v4505_v42 }
 0xc87   : > { %v4534_v31 = vpop.f32.mrf.mxu1 }
 0xc88   : > { %v4535_v52 = vadd.f32 %v5666_v29, %v4534_v31 }
 0xc8a   : > { %v4537_v53 = vmax.f32 %v4535_v52, 0.0 }
 0xc8c   : > { %5242 = vmatmul.msk.f32.vlgmr.msra.gmra.mxu2 %vm2963_vm7, %v4537_v53  ;;  %vm4627_vm7 = vcmask 1041409  }
 0xc8d   : > { %v4628_v24 = vsel %vm4627_vm7, %v4470_v18, %v4464_v17 }
 0xc8e   : > { %4646 = vmatmul.f32.vlgmr.msra.gmra.mxu0 %v4628_v24 }
 0xd0b   : > { %v4647_v26 = vpop.f32.mrf.mxu0 }
 0xd0f   : > { %v4570_v21 = vpop.f32.mrf.mxu2 }
 0xd10   : > { %v4571_v10 = vadd.f32 %v5667_v19, %v4570_v21 }
 0xd12   : > { %4621 = vmatmul.f32.vlgmr.msra.gmra.mxu3 %v4571_v10 }
 0xd95   : > { %v4622_v57 = vpop.f32.mrf.mxu3 }
 0xd96   : > { %v4648_v5 = vadd.f32 %v4647_v26, %v4622_v57 }
 0xd98   : > { %v4654_v42 = vadd.f32 %v5668_v7, %v4648_v5 }
 0xd9a   : > { %v4655_v50 = vmax.f32 %v4654_v42, 0.0 }
 0xd9c   : > { %5243 = vmatmul.msk.f32.vlgmr.msra.gmra.mxu1 %vm2957_vm5, %v4655_v50 }
 0xe19   : > { %v4684_v30 = vpop.f32.mrf.mxu1 }
 0xe1a   : > { %v4685_v32 = vadd.f32 %v5669_v27, %v4684_v30 }
 0xe1c   : > { %4688 = vst.msk [vmem:[#allocation37] sm:$0x3] %vm4687_vm13, %v4685_v32 }
 0xe1d PF: > { %s8489_s2 = sld [smem:[#allocation75_spill]]  ;;  %s6609_s14 = smov [#allocation37]  }
 0xe1e   : > { %s8490_s24 = sld [smem:[#allocation72_spill]]  ;;  %s4697_s12 = sshll.u32 %s6609_s14, 4  ;;  %s4698_s12 = int_to_ptr.vmem [resolvable:$true] %s4697_s12 }
 0xe23   : > { %p5420_p8 = scmp.eq.s32.totalorder %s8489_s2, 11 }
 0xe24   : > { %s4699_s26 = sshll.u32 %s8490_s24, 4  ;;  %s6446_s10 = scalar_lea.hbm %s8490_s24, 2  ;;  %s4700_s26 = int_to_ptr.hbm [resolvable:$true] %s4699_s26 }
 0xe25   : > { %s6440_s6 = sshra.s32 %s4700_s26, 4  ;;  %s6441_s6 = int_to_ptr.hbm [resolvable:$true] %s6440_s6 }
 0xe26   : > { %s6442_s16 = scalar_lea.hbm %s6441_s6, 2  ;;  %p6447_p11 = scmp.lt.s32.totalorder %s6441_s6, %s8490_s24 }
 0xe27   : > { %p6443_p10 = scmp.ne.s32.totalorder %s6441_s6, %s6442_s16  ;;  %p6448_p13 = scmp.lt.s32.totalorder %s6446_s10, %s6442_s16 }
 0xe29   : > { %p6444_p7 = pnand %p6443_p10, %p5420_p8  ;;  %p6449_p1 = por %p6448_p13, %p6447_p11 }
 0xe2b   : > { %p6445_p9 = pneg %p6444_p7 }
 0xe2d   : > { %p6450_p4 = pnand %p6449_p1, %p6445_p9 }
 0xe2f   : > { %6453 = shalt.err (!%p6450_p4)
}
 0xe30   : > { %5346 = dma.vmem_to_hbm [thread:$0]  (%p5420_p8), %s4698_s12, 32, %s4700_s26, [#allocation5]  }
 0xe31   : > { %6523 = dma.done.wait (%p5420_p8), [#allocation5], 32  }
 0xe32   : > { %6525 = vsyncadd (%p5420_p8), [#allocation5], 4294967264 }
 0xe33 PF: > { %s79_s0 = sadd.s32 1, %s6548_s0   ;;  %s8491_s15 = sld [smem:[#allocation73_spill]] }
 0xe34   : > { %p76_p12 = scmp.ge.s32.totalorder %s79_s0, 14   ;;  %s8492_s7 = sld [smem:[#allocation78_spill]] }
 0xe35   : > { %s8493_s4 = sld [smem:[#allocation76_spill]]  ;;  %s8494_s16 = smov %s6536_s18 }
 0xe36   : > { %s8496_s22 = smov %s6544_s23 }
 0xe37   :  { %78 = sbr.rel (!%p76_p12) target bundleno = 69 (0x45), region = 397 }
 0xe3a   : > { %s8495_s18 = smov %s8492_s7 }
 0xe3b   : > { %s8497_s23 = smov %s8493_s4 }
 0xe3c   :  { %4713 = vsyncpa [#allocation4], 1 }
 0xe3d   :  { %4715 = vsyncpa [#allocation4 + $0x1], 1 }
 0xe3e   :  { %4716 = vsyncpa [#allocation7], 1 }
 0xe3f   :  { %4717 = vsyncpa [#allocation10], 1 }
 0xe40   :  { %4718 = vsyncpa [#allocation13], 1 }
 0xe41   :  { %4719 = vsyncpa [#allocation30], 1 }
 0xe42   :  { %4720 = vsyncpa [#allocation33], 1 }
 0xe43   :  { %4721 = vsyncpa [#allocation36], 1 }
 0xe44   :  { %4722 = vsyncpa [#allocation5], 1 }
 0xe45   :  { %4724 = vsyncpa [#allocation5 + $0x1], 1 }

</bundles_post_ra>
